<compile_context>
chip_gen: v7x
topology: tpu7x:2x2x1
jax: 0.10.0
libtpu: 0.0.40
codegen_flags: <defaults>
</compile_context>

<pallas_src>
import numpy as np
import jax
import jax.numpy as jnp
from jax import lax
from jax.experimental import pallas as pl
from jax.experimental.pallas import tpu as pltpu

# ----------------------------- configuration --------------------------------
B = 2
H, W = 8, 8
DIM = 32
DIM_OUT = 32
NH = 4
HD = DIM_OUT // NH            # 8
N = 1 + H * W                 # 65 tokens (cls + spatial)
N_PAD = 128                   # lane-dense padded token count (keys axis -> full vreg row)
KH = KW = 3
PAD = KH // 2
NTAP = KH * KW                # 9 real conv taps; cls row handled by a mask
C3 = 3 * DIM_OUT              # 96 folded channels: (q|k|v) x (head x head_dim)
SCALE = HD ** -0.5
LN_EPS = 1e-5


# ----------------------- host-built constant operators -----------------------
def _build_shift_mats():
    """(NTAP, N_PAD, N_PAD) 0/1 matrices. Tap o = di*KW+dj gathers, for every spatial
    token, its 3x3 neighbour at offset (di-1, dj-1) (zero outside the image). Row 0 (cls)
    and all padded rows/cols (>=65) are zero."""
    m = np.zeros((NTAP, N_PAD, N_PAD), np.float32)
    for di in range(KH):
        for dj in range(KW):
            o = di * KW + dj
            for i in range(H):
                for j in range(W):
                    ii, jj = i + di - PAD, j + dj - PAD
                    if 0 <= ii < H and 0 <= jj < W:
                        m[o, 1 + i * W + j, 1 + ii * W + jj] = 1.0
    return m


def _build_group_mean():
    """(C3, C3) block-diagonal matrix averaging each head_dim group of 8 channels."""
    return np.kron(np.eye(C3 // HD, dtype=np.float32),
                   np.full((HD, HD), 1.0 / HD, dtype=np.float32))


SHIFT_MATS = jnp.asarray(_build_shift_mats())                       # (9, 128, 128) f32
GROUP_MEAN = jnp.asarray(_build_group_mean())                       # (96, 96) f32
HEAD_MASK = jnp.asarray(np.repeat(np.eye(NH, dtype=np.float32), HD, axis=1))  # (4, 32)


# --------------------------------- kernel ------------------------------------
def _msa_fused_kernel(x_ref, wqkv_ref, smat_ref, taps_ref, gmat_ref,
                      gamma_ref, beta_ref, hmask_ref, wproj_ref, bproj_ref,
                      out_ref, attn_ref):
    # ---- qkv projection (f32: feeds attn_res through LN; qkv_bias=False) ----
    x = x_ref[0]                                                    # (128, 32) f32, rows>=65 zero
    qkv = jnp.dot(x, wqkv_ref[...], preferred_element_type=jnp.float32)   # (128, 96)

    # ---- depthwise 3x3 pooling for q|k|v simultaneously (96 lanes, f32) -----
    # pooled = sum_o S_o @ (qkv * tap_o): pre-weight on the VPU, accumulate matmul results.
    pooled = jnp.zeros((N_PAD, C3), jnp.float32)
    for o in range(NTAP):
        pooled = pooled + jnp.dot(smat_ref[o], qkv * taps_ref[o:o + 1, :],
                                  preferred_element_type=jnp.float32)
    # cls row bypasses the conv (shift matrices have a zero cls row) -> cheap masked add.
    row_ids = lax.broadcasted_iota(jnp.int32, (N_PAD, 1), 0)
    cls_mask = (row_ids == 0).astype(jnp.float32)                   # (128, 1)
    pooled = pooled + qkv * cls_mask

    # ---- grouped LayerNorm over each head_dim group of 8 channels (f32) -----
    mu = jnp.dot(pooled, gmat_ref[...], preferred_element_type=jnp.float32)
    d = pooled - mu
    var = jnp.dot(d * d, gmat_ref[...], preferred_element_type=jnp.float32)
    normed = d * lax.rsqrt(var + LN_EPS) * gamma_ref[...] + beta_ref[...]

    # ---- split q|k|v once (two lane relayouts total, no per-head 8-lane slices) ----
    q_all = normed[:, :DIM_OUT]                                     # (128, 32)
    k_all = normed[:, DIM_OUT:2 * DIM_OUT]
    v_all = normed[:, 2 * DIM_OUT:]
    qs = q_all * SCALE

    col_valid = lax.broadcasted_iota(jnp.int32, (1, N_PAD), 1) < N  # mask padded key cols
    res_mask = 1.0 - cls_mask                                       # residual skips cls row

    # ---- attention: all NH heads; lane-masked K/V avoid relayouts; output proj fused ----
    xcat = jnp.zeros((N_PAD, DIM_OUT), jnp.float32)
    for h in range(NH):
        hm = hmask_ref[h:h + 1, :]                                  # (1, 32) head-h lane mask
        # scores in f32 (this IS attn_res): full-width Q against lane-masked K.
        s = lax.dot_general(qs, k_all * hm, (((1,), (1,)), ((), ())),
                            preferred_element_type=jnp.float32)     # (128, 128)
        attn_ref[0, h] = s                                          # lane-dense unmasked store

        sm = jnp.where(col_valid, s, -1e30)                         # drop padded key columns
        m = jnp.max(sm, axis=-1, keepdims=True)
        e = jnp.exp(sm - m)
        p = e * pl.reciprocal(jnp.sum(e, axis=-1, keepdims=True), approx=True)

        # lane-masked V drops head-h output into its own lane block of xcat (bf16 MXU ok:
        # only affects `out`, not the stored scores).
        xcat = xcat + jnp.dot(p.astype(jnp.bfloat16),
                              (v_all * hm).astype(jnp.bfloat16),
                              preferred_element_type=jnp.float32)   # (128, 32)

    # residual pooling with cls embed: x[:, :, 1:, :] += q[:, :, 1:, :]
    xcat = xcat + q_all * res_mask
    # single fused output projection (contraction 32)
    out = jnp.dot(xcat.astype(jnp.bfloat16), wproj_ref[...].astype(jnp.bfloat16),
                  preferred_element_type=jnp.float32) + bproj_ref[...]
    out_ref[0] = out.astype(out_ref.dtype)


# ------------------------------ module forward -------------------------------
def _msa_forward(x, p):
    Bx = x.shape[0]
    w_qkv_t = jnp.transpose(p['w_qkv'])                    # (DIM, 3*DIM_OUT)
    w_proj_t = jnp.transpose(p['w_proj'])                  # (DIM_OUT, DIM_OUT)
    b_proj = p['b_proj'].reshape(1, DIM_OUT)

    # torch depthwise weight (HD, 1, KH, KW) -> (KH*KW, HD) taps, tiled over heads.
    def fold_taps(w_conv):
        t = jnp.transpose(w_conv[:, 0], (1, 2, 0)).reshape(KH * KW, HD)
        return jnp.tile(t, (1, NH))                        # (9, 32)

    taps = jnp.concatenate([fold_taps(p['wq_conv']),
                            fold_taps(p['wk_conv']),
                            fold_taps(p['wv_conv'])], axis=1)            # (9, 96)

    gamma = jnp.concatenate([jnp.tile(p['gq'], (1, NH)),
                             jnp.tile(p['gk'], (1, NH)),
                             jnp.tile(p['gv'], (1, NH))], axis=1)        # (1, 96)
    beta = jnp.concatenate([jnp.tile(p['bq'], (1, NH)),
                            jnp.tile(p['bk'], (1, NH)),
                            jnp.tile(p['bv'], (1, NH))], axis=1)         # (1, 96)

    # Pad the token axis to 128 so every in-kernel tile / store is lane-dense.
    x_pad = jnp.pad(x, ((0, 0), (0, N_PAD - N), (0, 0)))

    out_pad, attn_pad = pl.pallas_call(
        _msa_fused_kernel,
        out_shape=(jax.ShapeDtypeStruct((Bx, N_PAD, DIM_OUT), jnp.float32),
                   jax.ShapeDtypeStruct((Bx, NH, N_PAD, N_PAD), jnp.float32)),
        grid=(Bx,),
        in_specs=[pl.BlockSpec((1, N_PAD, DIM), lambda b: (b, 0, 0)),
                  pl.BlockSpec((DIM, C3), lambda b: (0, 0)),
                  pl.BlockSpec((NTAP, N_PAD, N_PAD), lambda b: (0, 0, 0)),
                  pl.BlockSpec((NTAP, C3), lambda b: (0, 0)),
                  pl.BlockSpec((C3, C3), lambda b: (0, 0)),
                  pl.BlockSpec((1, C3), lambda b: (0, 0)),
                  pl.BlockSpec((1, C3), lambda b: (0, 0)),
                  pl.BlockSpec((NH, DIM_OUT), lambda b: (0, 0)),
                  pl.BlockSpec((DIM_OUT, DIM_OUT), lambda b: (0, 0)),
                  pl.BlockSpec((1, DIM_OUT), lambda b: (0, 0))],
        out_specs=(pl.BlockSpec((1, N_PAD, DIM_OUT), lambda b: (b, 0, 0)),
                   pl.BlockSpec((1, NH, N_PAD, N_PAD), lambda b: (b, 0, 0, 0))),
        compiler_params=pltpu.CompilerParams(dimension_semantics=("parallel",)),
    )(x_pad, w_qkv_t, SHIFT_MATS, taps, GROUP_MEAN, gamma, beta,
      HEAD_MASK, w_proj_t, b_proj)

    out = out_pad[:, :N, :]                                # cheap XLA slices back to 65 tokens
    attn_res = attn_pad[:, :, :N, :N]
    q_shape = (H, W)                                       # stride_q = (1, 1)
    return out, q_shape, attn_res


msa_forward = jax.jit(_msa_forward)


# ------------------------- deterministic parameters ---------------------------
def init_params(key):
    ks = jax.random.split(key, 8)
    p = {
        'w_qkv': 0.1 * jax.random.normal(ks[0], (3 * DIM_OUT, DIM), jnp.float32),
        'w_proj': 0.1 * jax.random.normal(ks[1], (DIM_OUT, DIM_OUT), jnp.float32),
        'b_proj': 0.1 * jax.random.normal(ks[2], (DIM_OUT,), jnp.float32),
    }
    for name, kk in zip(('q', 'k', 'v'), ks[3:6]):
        p[f'w{name}_conv'] = 0.3 * jax.random.normal(kk, (HD, 1, KH, KW), jnp.float32)
    kg = jax.random.split(ks[6], 6)
    for i, name in enumerate(('q', 'k', 'v')):
        p[f'g{name}'] = 1.0 + 0.1 * jax.random.normal(kg[2 * i], (1, HD), jnp.float32)
        p[f'b{name}'] = 0.1 * jax.random.normal(kg[2 * i + 1], (1, HD), jnp.float32)
    return p


# ----------------------------- pure-JAX reference -----------------------------
def reference_forward(x, p):
    Bx, Nx, _ = x.shape
    qkv = x @ p['w_qkv'].T
    qkv = jnp.transpose(qkv.reshape(Bx, Nx, 3, NH, HD), (2, 0, 3, 1, 4))
    q, k, v = qkv[0], qkv[1], qkv[2]

    def pool(t, w_conv, g, b):
        cls = t[:, :, :1, :]
        sp = jnp.transpose(t[:, :, 1:, :].reshape(Bx * NH, H, W, HD), (0, 3, 1, 2))
        out = lax.conv_general_dilated(sp, w_conv, (1, 1), ((PAD, PAD), (PAD, PAD)),
                                       feature_group_count=HD,
                                       dimension_numbers=('NCHW', 'OIHW', 'NCHW'))
        out = jnp.transpose(out.reshape(Bx, NH, HD, H * W), (0, 1, 3, 2))
        t2 = jnp.concatenate([cls, out], axis=2)
        mu = t2.mean(-1, keepdims=True)
        var = ((t2 - mu) ** 2).mean(-1, keepdims=True)
        return (t2 - mu) / jnp.sqrt(var + LN_EPS) * g + b

    q = pool(q, p['wq_conv'], p['gq'], p['bq'])
    k = pool(k, p['wk_conv'], p['gk'], p['bk'])
    v = pool(v, p['wv_conv'], p['gv'], p['bv'])

    attn = (q * SCALE) @ jnp.swapaxes(k, -1, -2)
    attn_res = attn
    a = jax.nn.softmax(attn, axis=-1)
    o = a @ v
    o = o.at[:, :, 1:, :].add(q[:, :, 1:, :])
    o = jnp.transpose(o, (0, 2, 1, 3)).reshape(Bx, -1, DIM_OUT)
    out = o @ p['w_proj'].T + p['b_proj']
    return out, attn_res


# ---------------------------------- main --------------------------------------
if __name__ == "__main__":
    key = jax.random.PRNGKey(0)
    kx, kp = jax.random.split(key)
    x = jax.random.normal(kx, (B, N, DIM), jnp.float32)
    params = init_params(kp)

    out, q_shape, attn_res = msa_forward(x, params)
    jax.block_until_ready((out, attn_res))

    # Evaluate the reference with true-f32 matmul precision so the comparison baseline
    # is not itself truncated to bf16 by the TPU default.
    with jax.default_matmul_precision("float32"):
        ref_out, ref_attn = reference_forward(x, params)
        jax.block_until_ready((ref_out, ref_attn))

    np.testing.assert_allclose(np.asarray(out), np.asarray(ref_out),
                               atol=2e-2, rtol=2e-2)
    np.testing.assert_allclose(np.asarray(attn_res), np.asarray(ref_attn),
                               atol=2e-2, rtol=2e-2)
    print("KERNEL_OK")
</pallas_src>

<mosaic_0001>
module attributes {stable_mosaic.version = 11 : i64} {
  func.func @_msa_fused_kernel(%arg0: i32, %arg1: memref<1x128x32xf32, #tpu.memory_space<vmem>>, %arg2: memref<32x96xf32, #tpu.memory_space<vmem>>, %arg3: memref<9x128x128xf32, #tpu.memory_space<vmem>>, %arg4: memref<9x96xf32, #tpu.memory_space<vmem>>, %arg5: memref<96x96xf32, #tpu.memory_space<vmem>>, %arg6: memref<1x96xf32, #tpu.memory_space<vmem>>, %arg7: memref<1x96xf32, #tpu.memory_space<vmem>>, %arg8: memref<4x32xf32, #tpu.memory_space<vmem>>, %arg9: memref<32x32xf32, #tpu.memory_space<vmem>>, %arg10: memref<1x32xf32, #tpu.memory_space<vmem>>, %arg11: memref<1x128x32xf32, #tpu.memory_space<vmem>>, %arg12: memref<1x4x128x128xf32, #tpu.memory_space<vmem>>) attributes {dimension_semantics = [#tpu.dimension_semantics<parallel>], iteration_bounds = array<i64: 2>, scalar_prefetch = 0 : i64, scratch_operands = 0 : i64, tpu.core_type = #tpu.core_type<tc>, window_params = [{transform_indices = @transform_0, window_bounds = array<i64: 1, 128, 32>}, {pipeline_mode = #tpu.pipeline_mode<synchronous>, transform_indices = @transform_1, window_bounds = array<i64: 32, 96>}, {pipeline_mode = #tpu.pipeline_mode<synchronous>, transform_indices = @transform_2, window_bounds = array<i64: 9, 128, 128>}, {pipeline_mode = #tpu.pipeline_mode<synchronous>, transform_indices = @transform_3, window_bounds = array<i64: 9, 96>}, {pipeline_mode = #tpu.pipeline_mode<synchronous>, transform_indices = @transform_4, window_bounds = array<i64: 96, 96>}, {pipeline_mode = #tpu.pipeline_mode<synchronous>, transform_indices = @transform_5, window_bounds = array<i64: 1, 96>}, {pipeline_mode = #tpu.pipeline_mode<synchronous>, transform_indices = @transform_6, window_bounds = array<i64: 1, 96>}, {pipeline_mode = #tpu.pipeline_mode<synchronous>, transform_indices = @transform_7, window_bounds = array<i64: 4, 32>}, {pipeline_mode = #tpu.pipeline_mode<synchronous>, transform_indices = @transform_8, window_bounds = array<i64: 32, 32>}, {pipeline_mode = #tpu.pipeline_mode<synchronous>, transform_indices = @transform_9, window_bounds = array<i64: 1, 32>}, {transform_indices = @transform_10, window_bounds = array<i64: 1, 128, 32>}, {transform_indices = @transform_11, window_bounds = array<i64: 1, 4, 128, 128>}]} {
    %c0 = arith.constant 0 : index
    %c0_0 = arith.constant 0 : index
    %c0_1 = arith.constant 0 : index
    %0 = vector.load %arg1[%c0, %c0_0, %c0_1] : memref<1x128x32xf32, #tpu.memory_space<vmem>>, vector<1x128x32xf32>
    %1 = vector.shape_cast %0 : vector<1x128x32xf32> to vector<128x32xf32>
    %c0_2 = arith.constant 0 : index
    %c0_3 = arith.constant 0 : index
    %2 = vector.load %arg2[%c0_2, %c0_3] : memref<32x96xf32, #tpu.memory_space<vmem>>, vector<32x96xf32>
    %cst = arith.constant dense<0.000000e+00> : vector<128x96xf32>
    %3 = tpu.matmul %1, %2, %cst {dimension_numbers = #tpu.dot_dimension_numbers<[1], [0], [0], [1], [0, 0, 1, 1], [], []>} : vector<128x32xf32>, vector<32x96xf32>, vector<128x96xf32> -> vector<128x96xf32>
    %cst_4 = arith.constant 0.000000e+00 : f32
    %4 = vector.broadcast %cst_4 : f32 to vector<128x96xf32>
    %c0_5 = arith.constant 0 : index
    %c0_6 = arith.constant 0 : index
    %c0_7 = arith.constant 0 : index
    %5 = vector.load %arg3[%c0_5, %c0_6, %c0_7] : memref<9x128x128xf32, #tpu.memory_space<vmem>>, vector<1x128x128xf32>
    %6 = vector.shape_cast %5 : vector<1x128x128xf32> to vector<128x128xf32>
    %c0_8 = arith.constant 0 : index
    %c0_9 = arith.constant 0 : index
    %7 = vector.load %arg4[%c0_8, %c0_9] : memref<9x96xf32, #tpu.memory_space<vmem>>, vector<1x96xf32>
    %8 = vector.broadcast %7 : vector<1x96xf32> to vector<128x96xf32>
    %9 = arith.mulf %3, %8 : vector<128x96xf32>
    %cst_10 = arith.constant dense<0.000000e+00> : vector<128x96xf32>
    %10 = tpu.matmul %6, %9, %cst_10 {dimension_numbers = #tpu.dot_dimension_numbers<[1], [0], [0], [1], [0, 0, 1, 1], [], []>} : vector<128x128xf32>, vector<128x96xf32>, vector<128x96xf32> -> vector<128x96xf32>
    %11 = arith.addf %4, %10 : vector<128x96xf32>
    %c1 = arith.constant 1 : index
    %c0_11 = arith.constant 0 : index
    %c0_12 = arith.constant 0 : index
    %12 = vector.load %arg3[%c1, %c0_11, %c0_12] : memref<9x128x128xf32, #tpu.memory_space<vmem>>, vector<1x128x128xf32>
    %13 = vector.shape_cast %12 : vector<1x128x128xf32> to vector<128x128xf32>
    %c1_13 = arith.constant 1 : index
    %c0_14 = arith.constant 0 : index
    %14 = vector.load %arg4[%c1_13, %c0_14] : memref<9x96xf32, #tpu.memory_space<vmem>>, vector<1x96xf32>
    %15 = vector.broadcast %14 : vector<1x96xf32> to vector<128x96xf32>
    %16 = arith.mulf %3, %15 : vector<128x96xf32>
    %cst_15 = arith.constant dense<0.000000e+00> : vector<128x96xf32>
    %17 = tpu.matmul %13, %16, %cst_15 {dimension_numbers = #tpu.dot_dimension_numbers<[1], [0], [0], [1], [0, 0, 1, 1], [], []>} : vector<128x128xf32>, vector<128x96xf32>, vector<128x96xf32> -> vector<128x96xf32>
    %18 = arith.addf %11, %17 : vector<128x96xf32>
    %c2 = arith.constant 2 : index
    %c0_16 = arith.constant 0 : index
    %c0_17 = arith.constant 0 : index
    %19 = vector.load %arg3[%c2, %c0_16, %c0_17] : memref<9x128x128xf32, #tpu.memory_space<vmem>>, vector<1x128x128xf32>
    %20 = vector.shape_cast %19 : vector<1x128x128xf32> to vector<128x128xf32>
    %c2_18 = arith.constant 2 : index
    %c0_19 = arith.constant 0 : index
    %21 = vector.load %arg4[%c2_18, %c0_19] : memref<9x96xf32, #tpu.memory_space<vmem>>, vector<1x96xf32>
    %22 = vector.broadcast %21 : vector<1x96xf32> to vector<128x96xf32>
    %23 = arith.mulf %3, %22 : vector<128x96xf32>
    %cst_20 = arith.constant dense<0.000000e+00> : vector<128x96xf32>
    %24 = tpu.matmul %20, %23, %cst_20 {dimension_numbers = #tpu.dot_dimension_numbers<[1], [0], [0], [1], [0, 0, 1, 1], [], []>} : vector<128x128xf32>, vector<128x96xf32>, vector<128x96xf32> -> vector<128x96xf32>
    %25 = arith.addf %18, %24 : vector<128x96xf32>
    %c3 = arith.constant 3 : index
    %c0_21 = arith.constant 0 : index
    %c0_22 = arith.constant 0 : index
    %26 = vector.load %arg3[%c3, %c0_21, %c0_22] : memref<9x128x128xf32, #tpu.memory_space<vmem>>, vector<1x128x128xf32>
    %27 = vector.shape_cast %26 : vector<1x128x128xf32> to vector<128x128xf32>
    %c3_23 = arith.constant 3 : index
    %c0_24 = arith.constant 0 : index
    %28 = vector.load %arg4[%c3_23, %c0_24] : memref<9x96xf32, #tpu.memory_space<vmem>>, vector<1x96xf32>
    %29 = vector.broadcast %28 : vector<1x96xf32> to vector<128x96xf32>
    %30 = arith.mulf %3, %29 : vector<128x96xf32>
    %cst_25 = arith.constant dense<0.000000e+00> : vector<128x96xf32>
    %31 = tpu.matmul %27, %30, %cst_25 {dimension_numbers = #tpu.dot_dimension_numbers<[1], [0], [0], [1], [0, 0, 1, 1], [], []>} : vector<128x128xf32>, vector<128x96xf32>, vector<128x96xf32> -> vector<128x96xf32>
    %32 = arith.addf %25, %31 : vector<128x96xf32>
    %c4 = arith.constant 4 : index
    %c0_26 = arith.constant 0 : index
    %c0_27 = arith.constant 0 : index
    %33 = vector.load %arg3[%c4, %c0_26, %c0_27] : memref<9x128x128xf32, #tpu.memory_space<vmem>>, vector<1x128x128xf32>
    %34 = vector.shape_cast %33 : vector<1x128x128xf32> to vector<128x128xf32>
    %c4_28 = arith.constant 4 : index
    %c0_29 = arith.constant 0 : index
    %35 = vector.load %arg4[%c4_28, %c0_29] : memref<9x96xf32, #tpu.memory_space<vmem>>, vector<1x96xf32>
    %36 = vector.broadcast %35 : vector<1x96xf32> to vector<128x96xf32>
    %37 = arith.mulf %3, %36 : vector<128x96xf32>
    %cst_30 = arith.constant dense<0.000000e+00> : vector<128x96xf32>
    %38 = tpu.matmul %34, %37, %cst_30 {dimension_numbers = #tpu.dot_dimension_numbers<[1], [0], [0], [1], [0, 0, 1, 1], [], []>} : vector<128x128xf32>, vector<128x96xf32>, vector<128x96xf32> -> vector<128x96xf32>
    %39 = arith.addf %32, %38 : vector<128x96xf32>
    %c5 = arith.constant 5 : index
    %c0_31 = arith.constant 0 : index
    %c0_32 = arith.constant 0 : index
    %40 = vector.load %arg3[%c5, %c0_31, %c0_32] : memref<9x128x128xf32, #tpu.memory_space<vmem>>, vector<1x128x128xf32>
    %41 = vector.shape_cast %40 : vector<1x128x128xf32> to vector<128x128xf32>
    %c5_33 = arith.constant 5 : index
    %c0_34 = arith.constant 0 : index
    %42 = vector.load %arg4[%c5_33, %c0_34] : memref<9x96xf32, #tpu.memory_space<vmem>>, vector<1x96xf32>
    %43 = vector.broadcast %42 : vector<1x96xf32> to vector<128x96xf32>
    %44 = arith.mulf %3, %43 : vector<128x96xf32>
    %cst_35 = arith.constant dense<0.000000e+00> : vector<128x96xf32>
    %45 = tpu.matmul %41, %44, %cst_35 {dimension_numbers = #tpu.dot_dimension_numbers<[1], [0], [0], [1], [0, 0, 1, 1], [], []>} : vector<128x128xf32>, vector<128x96xf32>, vector<128x96xf32> -> vector<128x96xf32>
    %46 = arith.addf %39, %45 : vector<128x96xf32>
    %c6 = arith.constant 6 : index
    %c0_36 = arith.constant 0 : index
    %c0_37 = arith.constant 0 : index
    %47 = vector.load %arg3[%c6, %c0_36, %c0_37] : memref<9x128x128xf32, #tpu.memory_space<vmem>>, vector<1x128x128xf32>
    %48 = vector.shape_cast %47 : vector<1x128x128xf32> to vector<128x128xf32>
    %c6_38 = arith.constant 6 : index
    %c0_39 = arith.constant 0 : index
    %49 = vector.load %arg4[%c6_38, %c0_39] : memref<9x96xf32, #tpu.memory_space<vmem>>, vector<1x96xf32>
    %50 = vector.broadcast %49 : vector<1x96xf32> to vector<128x96xf32>
    %51 = arith.mulf %3, %50 : vector<128x96xf32>
    %cst_40 = arith.constant dense<0.000000e+00> : vector<128x96xf32>
    %52 = tpu.matmul %48, %51, %cst_40 {dimension_numbers = #tpu.dot_dimension_numbers<[1], [0], [0], [1], [0, 0, 1, 1], [], []>} : vector<128x128xf32>, vector<128x96xf32>, vector<128x96xf32> -> vector<128x96xf32>
    %53 = arith.addf %46, %52 : vector<128x96xf32>
    %c7 = arith.constant 7 : index
    %c0_41 = arith.constant 0 : index
    %c0_42 = arith.constant 0 : index
    %54 = vector.load %arg3[%c7, %c0_41, %c0_42] : memref<9x128x128xf32, #tpu.memory_space<vmem>>, vector<1x128x128xf32>
    %55 = vector.shape_cast %54 : vector<1x128x128xf32> to vector<128x128xf32>
    %c7_43 = arith.constant 7 : index
    %c0_44 = arith.constant 0 : index
    %56 = vector.load %arg4[%c7_43, %c0_44] : memref<9x96xf32, #tpu.memory_space<vmem>>, vector<1x96xf32>
    %57 = vector.broadcast %56 : vector<1x96xf32> to vector<128x96xf32>
    %58 = arith.mulf %3, %57 : vector<128x96xf32>
    %cst_45 = arith.constant dense<0.000000e+00> : vector<128x96xf32>
    %59 = tpu.matmul %55, %58, %cst_45 {dimension_numbers = #tpu.dot_dimension_numbers<[1], [0], [0], [1], [0, 0, 1, 1], [], []>} : vector<128x128xf32>, vector<128x96xf32>, vector<128x96xf32> -> vector<128x96xf32>
    %60 = arith.addf %53, %59 : vector<128x96xf32>
    %c8 = arith.constant 8 : index
    %c0_46 = arith.constant 0 : index
    %c0_47 = arith.constant 0 : index
    %61 = vector.load %arg3[%c8, %c0_46, %c0_47] : memref<9x128x128xf32, #tpu.memory_space<vmem>>, vector<1x128x128xf32>
    %62 = vector.shape_cast %61 : vector<1x128x128xf32> to vector<128x128xf32>
    %c8_48 = arith.constant 8 : index
    %c0_49 = arith.constant 0 : index
    %63 = vector.load %arg4[%c8_48, %c0_49] : memref<9x96xf32, #tpu.memory_space<vmem>>, vector<1x96xf32>
    %64 = vector.broadcast %63 : vector<1x96xf32> to vector<128x96xf32>
    %65 = arith.mulf %3, %64 : vector<128x96xf32>
    %cst_50 = arith.constant dense<0.000000e+00> : vector<128x96xf32>
    %66 = tpu.matmul %62, %65, %cst_50 {dimension_numbers = #tpu.dot_dimension_numbers<[1], [0], [0], [1], [0, 0, 1, 1], [], []>} : vector<128x128xf32>, vector<128x96xf32>, vector<128x96xf32> -> vector<128x96xf32>
    %67 = arith.addf %60, %66 : vector<128x96xf32>
    %68 = tpu.iota {dimensions = array<i32: 0>} : vector<128x1xi32>
    %c0_i32 = arith.constant 0 : i32
    %69 = vector.broadcast %c0_i32 : i32 to vector<128x1xi32>
    %70 = arith.cmpi eq, %68, %69 : vector<128x1xi32>
    %71 = arith.extui %70 : vector<128x1xi1> to vector<128x1xi32>
    %72 = arith.sitofp %71 : vector<128x1xi32> to vector<128x1xf32>
    %73 = vector.broadcast %72 : vector<128x1xf32> to vector<128x96xf32>
    %74 = arith.mulf %3, %73 : vector<128x96xf32>
    %75 = arith.addf %67, %74 : vector<128x96xf32>
    %c0_51 = arith.constant 0 : index
    %c0_52 = arith.constant 0 : index
    %76 = vector.load %arg5[%c0_51, %c0_52] : memref<96x96xf32, #tpu.memory_space<vmem>>, vector<96x96xf32>
    %cst_53 = arith.constant dense<0.000000e+00> : vector<128x96xf32>
    %77 = tpu.matmul %75, %76, %cst_53 {dimension_numbers = #tpu.dot_dimension_numbers<[1], [0], [0], [1], [0, 0, 1, 1], [], []>} : vector<128x96xf32>, vector<96x96xf32>, vector<128x96xf32> -> vector<128x96xf32>
    %78 = arith.subf %75, %77 : vector<128x96xf32>
    %79 = arith.mulf %78, %78 : vector<128x96xf32>
    %c0_54 = arith.constant 0 : index
    %c0_55 = arith.constant 0 : index
    %80 = vector.load %arg5[%c0_54, %c0_55] : memref<96x96xf32, #tpu.memory_space<vmem>>, vector<96x96xf32>
    %cst_56 = arith.constant dense<0.000000e+00> : vector<128x96xf32>
    %81 = tpu.matmul %79, %80, %cst_56 {dimension_numbers = #tpu.dot_dimension_numbers<[1], [0], [0], [1], [0, 0, 1, 1], [], []>} : vector<128x96xf32>, vector<96x96xf32>, vector<128x96xf32> -> vector<128x96xf32>
    %cst_57 = arith.constant 9.99999974E-6 : f32
    %82 = vector.broadcast %cst_57 : f32 to vector<128x96xf32>
    %83 = arith.addf %81, %82 : vector<128x96xf32>
    %84 = math.rsqrt %83 : vector<128x96xf32>
    %85 = arith.mulf %78, %84 : vector<128x96xf32>
    %c0_58 = arith.constant 0 : index
    %c0_59 = arith.constant 0 : index
    %86 = vector.load %arg6[%c0_58, %c0_59] : memref<1x96xf32, #tpu.memory_space<vmem>>, vector<1x96xf32>
    %87 = vector.broadcast %86 : vector<1x96xf32> to vector<128x96xf32>
    %88 = arith.mulf %85, %87 : vector<128x96xf32>
    %c0_60 = arith.constant 0 : index
    %c0_61 = arith.constant 0 : index
    %89 = vector.load %arg7[%c0_60, %c0_61] : memref<1x96xf32, #tpu.memory_space<vmem>>, vector<1x96xf32>
    %90 = vector.broadcast %89 : vector<1x96xf32> to vector<128x96xf32>
    %91 = arith.addf %88, %90 : vector<128x96xf32>
    %92 = vector.extract_strided_slice %91 {offsets = [0, 0], sizes = [128, 32], strides = [1, 1]} : vector<128x96xf32> to vector<128x32xf32>
    %93 = vector.extract_strided_slice %91 {offsets = [0, 32], sizes = [128, 32], strides = [1, 1]} : vector<128x96xf32> to vector<128x32xf32>
    %94 = vector.extract_strided_slice %91 {offsets = [0, 64], sizes = [128, 32], strides = [1, 1]} : vector<128x96xf32> to vector<128x32xf32>
    %cst_62 = arith.constant 0.353553385 : f32
    %95 = vector.broadcast %cst_62 : f32 to vector<128x32xf32>
    %96 = arith.mulf %92, %95 : vector<128x32xf32>
    %97 = tpu.iota {dimensions = array<i32: 1>} : vector<1x128xi32>
    %c65_i32 = arith.constant 65 : i32
    %98 = vector.broadcast %c65_i32 : i32 to vector<1x128xi32>
    %99 = arith.cmpi slt, %97, %98 : vector<1x128xi32>
    %cst_63 = arith.constant 1.000000e+00 : f32
    %100 = vector.broadcast %cst_63 : f32 to vector<128x1xf32>
    %101 = arith.subf %100, %72 : vector<128x1xf32>
    %cst_64 = arith.constant 0.000000e+00 : f32
    %102 = vector.broadcast %cst_64 : f32 to vector<128x32xf32>
    %c0_65 = arith.constant 0 : index
    %c0_66 = arith.constant 0 : index
    %103 = vector.load %arg8[%c0_65, %c0_66] : memref<4x32xf32, #tpu.memory_space<vmem>>, vector<1x32xf32>
    %104 = vector.broadcast %103 : vector<1x32xf32> to vector<128x32xf32>
    %105 = arith.mulf %93, %104 : vector<128x32xf32>
    %cst_67 = arith.constant dense<0.000000e+00> : vector<128x128xf32>
    %106 = tpu.matmul %96, %105, %cst_67 {dimension_numbers = #tpu.dot_dimension_numbers<[1], [1], [0], [0], [0, 0, 1, 0], [], []>} : vector<128x32xf32>, vector<128x32xf32>, vector<128x128xf32> -> vector<128x128xf32>
    %c0_68 = arith.constant 0 : index
    %c0_69 = arith.constant 0 : index
    %c0_70 = arith.constant 0 : index
    %c0_71 = arith.constant 0 : index
    %107 = vector.load %arg12[%c0_68, %c0_69, %c0_70, %c0_71] : memref<1x4x128x128xf32, #tpu.memory_space<vmem>>, vector<1x1x128x128xf32>
    %108 = vector.shape_cast %107 : vector<1x1x128x128xf32> to vector<128x128xf32>
    %109 = vector.shape_cast %106 : vector<128x128xf32> to vector<1x1x128x128xf32>
    tpu.vector_store %arg12[%c0_68, %c0_69, %c0_70, %c0_71], %109 {strides = array<i32>} : memref<1x4x128x128xf32, #tpu.memory_space<vmem>>, vector<1x1x128x128xf32>,
    %cst_72 = arith.constant -1.000000e+30 : f32
    %110 = vector.shape_cast %99 : vector<1x128xi1> to vector<1x128xi1>
    %111 = vector.broadcast %110 : vector<1x128xi1> to vector<128x128xi1>
    %112 = vector.broadcast %cst_72 : f32 to vector<128x128xf32>
    %113 = arith.select %111, %106, %112 : vector<128x128xi1>, vector<128x128xf32>
    %cst_73 = arith.constant dense<0xFF800000> : vector<128xf32>
    %114 = vector.multi_reduction <maximumf>, %113, %cst_73 [1] : vector<128x128xf32> to vector<128xf32>
    %115 = vector.shape_cast %114 : vector<128xf32> to vector<128x1xf32>
    %116 = vector.broadcast %115 : vector<128x1xf32> to vector<128x128xf32>
    %117 = arith.subf %113, %116 : vector<128x128xf32>
    %118 = math.exp %117 : vector<128x128xf32>
    %cst_74 = arith.constant dense<0.000000e+00> : vector<128xf32>
    %119 = vector.multi_reduction <add>, %118, %cst_74 [1] : vector<128x128xf32> to vector<128xf32>
    %120 = vector.shape_cast %119 : vector<128xf32> to vector<128x1xf32>
    %121 = tpu.reciprocal %120 {approx = true} : vector<128x1xf32> -> vector<128x1xf32>
    %122 = vector.broadcast %121 : vector<128x1xf32> to vector<128x128xf32>
    %123 = arith.mulf %118, %122 : vector<128x128xf32>
    %124 = arith.truncf %123 : vector<128x128xf32> to vector<128x128xbf16>
    %125 = vector.broadcast %103 : vector<1x32xf32> to vector<128x32xf32>
    %126 = arith.mulf %94, %125 : vector<128x32xf32>
    %127 = arith.truncf %126 : vector<128x32xf32> to vector<128x32xbf16>
    %cst_75 = arith.constant dense<0.000000e+00> : vector<128x32xf32>
    %128 = tpu.matmul %124, %127, %cst_75 {dimension_numbers = #tpu.dot_dimension_numbers<[1], [0], [0], [1], [0, 0, 1, 1], [], []>} : vector<128x128xbf16>, vector<128x32xbf16>, vector<128x32xf32> -> vector<128x32xf32>
    %129 = arith.addf %102, %128 : vector<128x32xf32>
    %c1_76 = arith.constant 1 : index
    %c0_77 = arith.constant 0 : index
    %130 = vector.load %arg8[%c1_76, %c0_77] : memref<4x32xf32, #tpu.memory_space<vmem>>, vector<1x32xf32>
    %131 = vector.broadcast %130 : vector<1x32xf32> to vector<128x32xf32>
    %132 = arith.mulf %93, %131 : vector<128x32xf32>
    %cst_78 = arith.constant dense<0.000000e+00> : vector<128x128xf32>
    %133 = tpu.matmul %96, %132, %cst_78 {dimension_numbers = #tpu.dot_dimension_numbers<[1], [1], [0], [0], [0, 0, 1, 0], [], []>} : vector<128x32xf32>, vector<128x32xf32>, vector<128x128xf32> -> vector<128x128xf32>
    %c0_79 = arith.constant 0 : index
    %c1_80 = arith.constant 1 : index
    %c0_81 = arith.constant 0 : index
    %c0_82 = arith.constant 0 : index
    %134 = vector.load %arg12[%c0_79, %c1_80, %c0_81, %c0_82] : memref<1x4x128x128xf32, #tpu.memory_space<vmem>>, vector<1x1x128x128xf32>
    %135 = vector.shape_cast %134 : vector<1x1x128x128xf32> to vector<128x128xf32>
    %136 = vector.shape_cast %133 : vector<128x128xf32> to vector<1x1x128x128xf32>
    tpu.vector_store %arg12[%c0_79, %c1_80, %c0_81, %c0_82], %136 {strides = array<i32>} : memref<1x4x128x128xf32, #tpu.memory_space<vmem>>, vector<1x1x128x128xf32>,
    %cst_83 = arith.constant -1.000000e+30 : f32
    %137 = vector.shape_cast %99 : vector<1x128xi1> to vector<1x128xi1>
    %138 = vector.broadcast %137 : vector<1x128xi1> to vector<128x128xi1>
    %139 = vector.broadcast %cst_83 : f32 to vector<128x128xf32>
    %140 = arith.select %138, %133, %139 : vector<128x128xi1>, vector<128x128xf32>
    %cst_84 = arith.constant dense<0xFF800000> : vector<128xf32>
    %141 = vector.multi_reduction <maximumf>, %140, %cst_84 [1] : vector<128x128xf32> to vector<128xf32>
    %142 = vector.shape_cast %141 : vector<128xf32> to vector<128x1xf32>
    %143 = vector.broadcast %142 : vector<128x1xf32> to vector<128x128xf32>
    %144 = arith.subf %140, %143 : vector<128x128xf32>
    %145 = math.exp %144 : vector<128x128xf32>
    %cst_85 = arith.constant dense<0.000000e+00> : vector<128xf32>
    %146 = vector.multi_reduction <add>, %145, %cst_85 [1] : vector<128x128xf32> to vector<128xf32>
    %147 = vector.shape_cast %146 : vector<128xf32> to vector<128x1xf32>
    %148 = tpu.reciprocal %147 {approx = true} : vector<128x1xf32> -> vector<128x1xf32>
    %149 = vector.broadcast %148 : vector<128x1xf32> to vector<128x128xf32>
    %150 = arith.mulf %145, %149 : vector<128x128xf32>
    %151 = arith.truncf %150 : vector<128x128xf32> to vector<128x128xbf16>
    %152 = vector.broadcast %130 : vector<1x32xf32> to vector<128x32xf32>
    %153 = arith.mulf %94, %152 : vector<128x32xf32>
    %154 = arith.truncf %153 : vector<128x32xf32> to vector<128x32xbf16>
    %cst_86 = arith.constant dense<0.000000e+00> : vector<128x32xf32>
    %155 = tpu.matmul %151, %154, %cst_86 {dimension_numbers = #tpu.dot_dimension_numbers<[1], [0], [0], [1], [0, 0, 1, 1], [], []>} : vector<128x128xbf16>, vector<128x32xbf16>, vector<128x32xf32> -> vector<128x32xf32>
    %156 = arith.addf %129, %155 : vector<128x32xf32>
    %c2_87 = arith.constant 2 : index
    %c0_88 = arith.constant 0 : index
    %157 = vector.load %arg8[%c2_87, %c0_88] : memref<4x32xf32, #tpu.memory_space<vmem>>, vector<1x32xf32>
    %158 = vector.broadcast %157 : vector<1x32xf32> to vector<128x32xf32>
    %159 = arith.mulf %93, %158 : vector<128x32xf32>
    %cst_89 = arith.constant dense<0.000000e+00> : vector<128x128xf32>
    %160 = tpu.matmul %96, %159, %cst_89 {dimension_numbers = #tpu.dot_dimension_numbers<[1], [1], [0], [0], [0, 0, 1, 0], [], []>} : vector<128x32xf32>, vector<128x32xf32>, vector<128x128xf32> -> vector<128x128xf32>
    %c0_90 = arith.constant 0 : index
    %c2_91 = arith.constant 2 : index
    %c0_92 = arith.constant 0 : index
    %c0_93 = arith.constant 0 : index
    %161 = vector.load %arg12[%c0_90, %c2_91, %c0_92, %c0_93] : memref<1x4x128x128xf32, #tpu.memory_space<vmem>>, vector<1x1x128x128xf32>
    %162 = vector.shape_cast %161 : vector<1x1x128x128xf32> to vector<128x128xf32>
    %163 = vector.shape_cast %160 : vector<128x128xf32> to vector<1x1x128x128xf32>
    tpu.vector_store %arg12[%c0_90, %c2_91, %c0_92, %c0_93], %163 {strides = array<i32>} : memref<1x4x128x128xf32, #tpu.memory_space<vmem>>, vector<1x1x128x128xf32>,
    %cst_94 = arith.constant -1.000000e+30 : f32
    %164 = vector.shape_cast %99 : vector<1x128xi1> to vector<1x128xi1>
    %165 = vector.broadcast %164 : vector<1x128xi1> to vector<128x128xi1>
    %166 = vector.broadcast %cst_94 : f32 to vector<128x128xf32>
    %167 = arith.select %165, %160, %166 : vector<128x128xi1>, vector<128x128xf32>
    %cst_95 = arith.constant dense<0xFF800000> : vector<128xf32>
    %168 = vector.multi_reduction <maximumf>, %167, %cst_95 [1] : vector<128x128xf32> to vector<128xf32>
    %169 = vector.shape_cast %168 : vector<128xf32> to vector<128x1xf32>
    %170 = vector.broadcast %169 : vector<128x1xf32> to vector<128x128xf32>
    %171 = arith.subf %167, %170 : vector<128x128xf32>
    %172 = math.exp %171 : vector<128x128xf32>
    %cst_96 = arith.constant dense<0.000000e+00> : vector<128xf32>
    %173 = vector.multi_reduction <add>, %172, %cst_96 [1] : vector<128x128xf32> to vector<128xf32>
    %174 = vector.shape_cast %173 : vector<128xf32> to vector<128x1xf32>
    %175 = tpu.reciprocal %174 {approx = true} : vector<128x1xf32> -> vector<128x1xf32>
    %176 = vector.broadcast %175 : vector<128x1xf32> to vector<128x128xf32>
    %177 = arith.mulf %172, %176 : vector<128x128xf32>
    %178 = arith.truncf %177 : vector<128x128xf32> to vector<128x128xbf16>
    %179 = vector.broadcast %157 : vector<1x32xf32> to vector<128x32xf32>
    %180 = arith.mulf %94, %179 : vector<128x32xf32>
    %181 = arith.truncf %180 : vector<128x32xf32> to vector<128x32xbf16>
    %cst_97 = arith.constant dense<0.000000e+00> : vector<128x32xf32>
    %182 = tpu.matmul %178, %181, %cst_97 {dimension_numbers = #tpu.dot_dimension_numbers<[1], [0], [0], [1], [0, 0, 1, 1], [], []>} : vector<128x128xbf16>, vector<128x32xbf16>, vector<128x32xf32> -> vector<128x32xf32>
    %183 = arith.addf %156, %182 : vector<128x32xf32>
    %c3_98 = arith.constant 3 : index
    %c0_99 = arith.constant 0 : index
    %184 = vector.load %arg8[%c3_98, %c0_99] : memref<4x32xf32, #tpu.memory_space<vmem>>, vector<1x32xf32>
    %185 = vector.broadcast %184 : vector<1x32xf32> to vector<128x32xf32>
    %186 = arith.mulf %93, %185 : vector<128x32xf32>
    %cst_100 = arith.constant dense<0.000000e+00> : vector<128x128xf32>
    %187 = tpu.matmul %96, %186, %cst_100 {dimension_numbers = #tpu.dot_dimension_numbers<[1], [1], [0], [0], [0, 0, 1, 0], [], []>} : vector<128x32xf32>, vector<128x32xf32>, vector<128x128xf32> -> vector<128x128xf32>
    %c0_101 = arith.constant 0 : index
    %c3_102 = arith.constant 3 : index
    %c0_103 = arith.constant 0 : index
    %c0_104 = arith.constant 0 : index
    %188 = vector.load %arg12[%c0_101, %c3_102, %c0_103, %c0_104] : memref<1x4x128x128xf32, #tpu.memory_space<vmem>>, vector<1x1x128x128xf32>
    %189 = vector.shape_cast %188 : vector<1x1x128x128xf32> to vector<128x128xf32>
    %190 = vector.shape_cast %187 : vector<128x128xf32> to vector<1x1x128x128xf32>
    tpu.vector_store %arg12[%c0_101, %c3_102, %c0_103, %c0_104], %190 {strides = array<i32>} : memref<1x4x128x128xf32, #tpu.memory_space<vmem>>, vector<1x1x128x128xf32>,
    %cst_105 = arith.constant -1.000000e+30 : f32
    %191 = vector.shape_cast %99 : vector<1x128xi1> to vector<1x128xi1>
    %192 = vector.broadcast %191 : vector<1x128xi1> to vector<128x128xi1>
    %193 = vector.broadcast %cst_105 : f32 to vector<128x128xf32>
    %194 = arith.select %192, %187, %193 : vector<128x128xi1>, vector<128x128xf32>
    %cst_106 = arith.constant dense<0xFF800000> : vector<128xf32>
    %195 = vector.multi_reduction <maximumf>, %194, %cst_106 [1] : vector<128x128xf32> to vector<128xf32>
    %196 = vector.shape_cast %195 : vector<128xf32> to vector<128x1xf32>
    %197 = vector.broadcast %196 : vector<128x1xf32> to vector<128x128xf32>
    %198 = arith.subf %194, %197 : vector<128x128xf32>
    %199 = math.exp %198 : vector<128x128xf32>
    %cst_107 = arith.constant dense<0.000000e+00> : vector<128xf32>
    %200 = vector.multi_reduction <add>, %199, %cst_107 [1] : vector<128x128xf32> to vector<128xf32>
    %201 = vector.shape_cast %200 : vector<128xf32> to vector<128x1xf32>
    %202 = tpu.reciprocal %201 {approx = true} : vector<128x1xf32> -> vector<128x1xf32>
    %203 = vector.broadcast %202 : vector<128x1xf32> to vector<128x128xf32>
    %204 = arith.mulf %199, %203 : vector<128x128xf32>
    %205 = arith.truncf %204 : vector<128x128xf32> to vector<128x128xbf16>
    %206 = vector.broadcast %184 : vector<1x32xf32> to vector<128x32xf32>
    %207 = arith.mulf %94, %206 : vector<128x32xf32>
    %208 = arith.truncf %207 : vector<128x32xf32> to vector<128x32xbf16>
    %cst_108 = arith.constant dense<0.000000e+00> : vector<128x32xf32>
    %209 = tpu.matmul %205, %208, %cst_108 {dimension_numbers = #tpu.dot_dimension_numbers<[1], [0], [0], [1], [0, 0, 1, 1], [], []>} : vector<128x128xbf16>, vector<128x32xbf16>, vector<128x32xf32> -> vector<128x32xf32>
    %210 = arith.addf %183, %209 : vector<128x32xf32>
    %211 = vector.broadcast %101 : vector<128x1xf32> to vector<128x32xf32>
    %212 = arith.mulf %92, %211 : vector<128x32xf32>
    %213 = arith.addf %210, %212 : vector<128x32xf32>
    %214 = arith.truncf %213 : vector<128x32xf32> to vector<128x32xbf16>
    %c0_109 = arith.constant 0 : index
    %c0_110 = arith.constant 0 : index
    %215 = vector.load %arg9[%c0_109, %c0_110] : memref<32x32xf32, #tpu.memory_space<vmem>>, vector<32x32xf32>
    %216 = arith.truncf %215 : vector<32x32xf32> to vector<32x32xbf16>
    %cst_111 = arith.constant dense<0.000000e+00> : vector<128x32xf32>
    %217 = tpu.matmul %214, %216, %cst_111 {dimension_numbers = #tpu.dot_dimension_numbers<[1], [0], [0], [1], [0, 0, 1, 1], [], []>} : vector<128x32xbf16>, vector<32x32xbf16>, vector<128x32xf32> -> vector<128x32xf32>
    %c0_112 = arith.constant 0 : index
    %c0_113 = arith.constant 0 : index
    %218 = vector.load %arg10[%c0_112, %c0_113] : memref<1x32xf32, #tpu.memory_space<vmem>>, vector<1x32xf32>
    %219 = vector.broadcast %218 : vector<1x32xf32> to vector<128x32xf32>
    %220 = arith.addf %217, %219 : vector<128x32xf32>
    %c0_114 = arith.constant 0 : index
    %c0_115 = arith.constant 0 : index
    %c0_116 = arith.constant 0 : index
    %221 = vector.load %arg11[%c0_114, %c0_115, %c0_116] : memref<1x128x32xf32, #tpu.memory_space<vmem>>, vector<1x128x32xf32>
    %222 = vector.shape_cast %221 : vector<1x128x32xf32> to vector<128x32xf32>
    %223 = vector.shape_cast %220 : vector<128x32xf32> to vector<1x128x32xf32>
    tpu.vector_store %arg11[%c0_114, %c0_115, %c0_116], %223 {strides = array<i32>} : memref<1x128x32xf32, #tpu.memory_space<vmem>>, vector<1x128x32xf32>,
    return
  }
  func.func @transform_0(%arg0: i32) -> (i32, i32, i32) {
    %c0_i32 = arith.constant 0 : i32
    %c0_i32_0 = arith.constant 0 : i32
    %c0_i32_1 = arith.constant 0 : i32
    return %arg0, %c0_i32, %c0_i32_0 : i32, i32, i32
  }
  func.func @transform_1(%arg0: i32) -> (i32, i32) {
    %c0_i32 = arith.constant 0 : i32
    %c0_i32_0 = arith.constant 0 : i32
    %c0_i32_1 = arith.constant 0 : i32
    return %c0_i32, %c0_i32_0 : i32, i32
  }
  func.func @transform_2(%arg0: i32) -> (i32, i32, i32) {
    %c0_i32 = arith.constant 0 : i32
    %c0_i32_0 = arith.constant 0 : i32
    %c0_i32_1 = arith.constant 0 : i32
    %c0_i32_2 = arith.constant 0 : i32
    return %c0_i32, %c0_i32_0, %c0_i32_1 : i32, i32, i32
  }
  func.func @transform_3(%arg0: i32) -> (i32, i32) {
    %c0_i32 = arith.constant 0 : i32
    %c0_i32_0 = arith.constant 0 : i32
    %c0_i32_1 = arith.constant 0 : i32
    return %c0_i32, %c0_i32_0 : i32, i32
  }
  func.func @transform_4(%arg0: i32) -> (i32, i32) {
    %c0_i32 = arith.constant 0 : i32
    %c0_i32_0 = arith.constant 0 : i32
    %c0_i32_1 = arith.constant 0 : i32
    return %c0_i32, %c0_i32_0 : i32, i32
  }
  func.func @transform_5(%arg0: i32) -> (i32, i32) {
    %c0_i32 = arith.constant 0 : i32
    %c0_i32_0 = arith.constant 0 : i32
    %c0_i32_1 = arith.constant 0 : i32
    return %c0_i32, %c0_i32_0 : i32, i32
  }
  func.func @transform_6(%arg0: i32) -> (i32, i32) {
    %c0_i32 = arith.constant 0 : i32
    %c0_i32_0 = arith.constant 0 : i32
    %c0_i32_1 = arith.constant 0 : i32
    return %c0_i32, %c0_i32_0 : i32, i32
  }
  func.func @transform_7(%arg0: i32) -> (i32, i32) {
    %c0_i32 = arith.constant 0 : i32
    %c0_i32_0 = arith.constant 0 : i32
    %c0_i32_1 = arith.constant 0 : i32
    return %c0_i32, %c0_i32_0 : i32, i32
  }
  func.func @transform_8(%arg0: i32) -> (i32, i32) {
    %c0_i32 = arith.constant 0 : i32
    %c0_i32_0 = arith.constant 0 : i32
    %c0_i32_1 = arith.constant 0 : i32
    return %c0_i32, %c0_i32_0 : i32, i32
  }
  func.func @transform_9(%arg0: i32) -> (i32, i32) {
    %c0_i32 = arith.constant 0 : i32
    %c0_i32_0 = arith.constant 0 : i32
    %c0_i32_1 = arith.constant 0 : i32
    return %c0_i32, %c0_i32_0 : i32, i32
  }
  func.func @transform_10(%arg0: i32) -> (i32, i32, i32) {
    %c0_i32 = arith.constant 0 : i32
    %c0_i32_0 = arith.constant 0 : i32
    %c0_i32_1 = arith.constant 0 : i32
    return %arg0, %c0_i32, %c0_i32_0 : i32, i32, i32
  }
  func.func @transform_11(%arg0: i32) -> (i32, i32, i32, i32) {
    %c0_i32 = arith.constant 0 : i32
    %c0_i32_0 = arith.constant 0 : i32
    %c0_i32_1 = arith.constant 0 : i32
    %c0_i32_2 = arith.constant 0 : i32
    return %arg0, %c0_i32, %c0_i32_0, %c0_i32_1 : i32, i32, i32, i32
  }
}

</mosaic_0001>

<bundles_post_ra>
// kernel: tile.53
= control target key start
LH: loop header
LB: loop body
LE: loop exit
PB: predicated region body
PF: predicated region fallthrough
CT: control target
= control target key end

     0   :  { %vm47_vm0 = vcmask 1047556   ;;  %vm49_vm1 = vcmask 64512   ;;  %s130_s24 = smov 24   ;;  %s131_s29 = smov 8   ;;  %vm64_vm2 = vcmask 261312   ;;  %vm81_vm3 = vcmask 195712   ;;  %s199_s0 = inlined_call_operand.vmem [shape: f32[9,4,8], index: 0, kind: input, shape index: {}]   ;;  %s200_s1 = inlined_call_operand.vmem [shape: f32[9,32], index: 1, kind: output, shape index: {}]  }
   0x1   :  { %v114_v0 = vld [vmem:[%s199_s0 + $0x20] sm:$0xf]  ;;  %v115_v1 = vld [vmem:[%s199_s0 + $0x1c] sm:$0xf]  ;;  %v116_v2 = vld [vmem:[%s199_s0 + $0x18] sm:$0xf] }
   0x2   :  { %8 = vst [vmem:[#allocation0 + $0x40] sm:$0xf] %v114_v0  ;;  %13 = vst [vmem:[#allocation0 + $0x38] sm:$0xf] %v115_v1  ;;  %v117_v3 = vld [vmem:[%s199_s0 + $0x14] sm:$0xf] }
   0x3   :  { %v118_v4 = vld [vmem:[%s199_s0 + $0x10] sm:$0xf]  ;;  %18 = vst [vmem:[#allocation0 + $0x30] sm:$0xf] %v116_v2  ;;  %23 = vst [vmem:[#allocation0 + $0x28] sm:$0xf] %v117_v3 }
   0x4   :  { %28 = vst [vmem:[#allocation0 + $0x20] sm:$0xf] %v118_v4  ;;  %v119_v5 = vld [vmem:[%s199_s0 + $0xc] sm:$0xf]  ;;  %v120_v6 = vld [vmem:[%s199_s0 + $0x8] sm:$0xf] }
   0x5   :  { %v121_v7 = vld [vmem:[%s199_s0 + $0x4] sm:$0xf]  ;;  %33 = vst [vmem:[#allocation0 + $0x18] sm:$0xf] %v119_v5  ;;  %38 = vst [vmem:[#allocation0 + $0x10] sm:$0xf] %v120_v6 }
   0x6   :  { %42 = vst [vmem:[#allocation0 + $0x8] sm:$0xf] %v121_v7  ;;  %v43_v8 = vld [vmem:[%s199_s0] sm:$0xf]  ;;  %s129_s0 = smov 16   ;;  %vm98_vm4 = vcmask 130112  }
   0x7   :  { %44 = vst [vmem:[#allocation0] sm:$0xf] %v43_v8 }
   0x9   :  { %v84_v9 = vld [vmem:[#allocation0 + $0x42] sm:$0x1]   ;;  %v67_v10 = vld [vmem:[#allocation0 + $0x43] sm:$0x1]   ;;  %v52_v14 = vld [vmem:[#allocation0 + $0x40] sm:$0x1]  }
   0xa   :  { %85 = vrot.lane.b32.xlu1 %v84_v9, %s129_s0  ;;  %68 = vrot.lane.b32.xlu0 %v67_v10, %s130_s24  ;;  %122 = vst.msk [vmem:[%s200_s1 + $0x8] sm:$0x1] %vm49_vm1, %v52_v14   ;;  %v101_v22 = vld [vmem:[#allocation0 + $0x41] sm:$0x1]  }
   0xb   :  { %v76_v11 = vld [vmem:[#allocation0 + $0x2] ss:$8 sm:$0xf0]   ;;  %v59_v12 = vld [vmem:[#allocation0 + $0x3] ss:$8 sm:$0xf0]  }
   0xc   :  { %v93_v13 = vld [vmem:[#allocation0 + $0x1] ss:$8 sm:$0xf0]   ;;  %v46_v21 = vld [vmem:[#allocation0] ss:$8 sm:$0xf0]  }
   0xe   :  { %v74_v15 = vld [vmem:[#allocation0 + $0x2] ss:$8 sm:$0xf]   ;;  %v57_v16 = vld [vmem:[#allocation0 + $0x3] ss:$8 sm:$0xf]  }
   0xf   :  { %v78_v17 = vsel %vm47_vm0, %v76_v11, %v74_v15  ;;  %v61_v18 = vsel %vm47_vm0, %v59_v12, %v57_v16  ;;  %v91_v19 = vld [vmem:[#allocation0 + $0x1] ss:$8 sm:$0xf]   ;;  %v45_v20 = vld [vmem:[#allocation0] ss:$8 sm:$0xf]  }
  0x10   :  { %79 = vrot.lane.b32.xlu1 %v78_v17, %s129_s0  ;;  %62 = vrot.lane.b32.xlu0 %v61_v18, %s130_s24  ;;  %v95_v23 = vsel %vm47_vm0, %v93_v13, %v91_v19  ;;  %v48_v24 = vsel %vm47_vm0, %v46_v21, %v45_v20 }
  0x11   :  { %50 = vst.msk [vmem:[%s200_s1] sm:$0xff] %vm49_vm1, %v48_v24  }
  0x14   :  { %102 = vrot.lane.b32.xlu1 %v101_v22, %s131_s29  ;;  %96 = vrot.lane.b32.xlu0 %v95_v23, %s131_s29 }
  0x7c   :  { %v86_v25 = vpop.permute.xlu1 %85   ;;  %v69_v26 = vpop.permute.xlu0 %68  }
  0x7d   :  { %123 = vst.msk [vmem:[%s200_s1 + $0x8] sm:$0x1] %vm64_vm2, %v69_v26  }
  0x7e   :  { %124 = vst.msk [vmem:[%s200_s1 + $0x8] sm:$0x1] %vm81_vm3, %v86_v25  }
  0x82   :  { %v80_v27 = vpop.permute.xlu1 %79   ;;  %v63_v28 = vpop.permute.xlu0 %62  }
  0x83   :  { %65 = vst.msk [vmem:[%s200_s1] sm:$0xff] %vm64_vm2, %v63_v28  }
  0x84   :  { %82 = vst.msk [vmem:[%s200_s1] sm:$0xff] %vm81_vm3, %v80_v27  }
  0x86   :  { %v103_v29 = vpop.permute.xlu1 %102   ;;  %v97_v30 = vpop.permute.xlu0 %96  }
  0x87   :  { %125 = vst.msk [vmem:[%s200_s1 + $0x8] sm:$0x1] %vm98_vm4, %v103_v29   ;;  %99 = vst.msk [vmem:[%s200_s1] sm:$0xff] %vm98_vm4, %v97_v30  }

// kernel: _msa_forward.1
= control target key start
LH: loop header
LB: loop body
LE: loop exit
PB: predicated region body
PF: predicated region fallthrough
CT: control target
= control target key end

     0   :  { %s8946_s17 = smov 0   ;;  %s12093_s0 = inlined_call_operand.vmem [shape: f32[2,128,32], index: 0, kind: input, shape index: {}]   ;;  %s12094_s1 = inlined_call_operand.vmem [shape: f32[32,96], index: 1, kind: input, shape index: {}]   ;;  %s12095_s2 = inlined_call_operand.vmem [shape: f32[9,128,128], index: 2, kind: input, shape index: {}]   ;;  %s12096_s3 = inlined_call_operand.vmem [shape: f32[9,96], index: 3, kind: input, shape index: {}]   ;;  %s12097_s4 = inlined_call_operand.vmem [shape: f32[96,96], index: 4, kind: input, shape index: {}]   ;;  %s12098_s5 = inlined_call_operand.vmem [shape: f32[1,96], index: 5, kind: input, shape index: {}]   ;;  %s12099_s6 = inlined_call_operand.vmem [shape: f32[1,96], index: 6, kind: input, shape index: {}]   ;;  %s12100_s7 = inlined_call_operand.vmem [shape: f32[4,32], index: 7, kind: input, shape index: {}]   ;;  %s12101_s8 = inlined_call_operand.vmem [shape: f32[32,32], index: 8, kind: input, shape index: {}]   ;;  %s12102_s9 = inlined_call_operand.vmem [shape: f32[1,32], index: 9, kind: input, shape index: {}]   ;;  %s12103_s10 = inlined_call_operand.vmem [shape: f32[2,128,32], index: 10, kind: output, shape index: {0}]   ;;  %s12104_s11 = inlined_call_operand.vmem [shape: f32[2,4,128,128], index: 11, kind: output, shape index: {1}]  }
   0x1 LB: > { %s5737_s18 = sadd.s32 4294967295, %s8880_s17   ;;  %p5741_p0 = scmp.ge.s32.totalorder %s8880_s17, 1  ;;  %s8880_s17 = sphi %s8946_s17, %s22_s17  }
   0x2   : > { %p340_p1 = scmp.lt.s32.totalorder %s8880_s17, 3 }
   0x4   : > { %p341_p2 = pnand %p5741_p0, %p340_p1 }
   0x6   : > { %344 = sbr.rel (%p341_p2) target bundleno = 3540 (0xdd4), region = 60 }
   0xd   : > { %v417_v0 = vld [vmem:[%s12094_s1] sm:$0xff]  ;;  %v418_v1 = vld [vmem:[%s12094_s1 + $0x8] sm:$0xff]  ;;  %v419_v2 = vld [vmem:[%s12094_s1 + $0x10] sm:$0xff]  ;;  %p385_p3 = scmp.lt.s32.totalorder %s5737_s18, 1  ;;  %vm421_vm0 = vcmask 261120   ;;  %vm2482_vm2 = vcmask 785408  }
   0xe   : > { %v7700_v3 = vpack.c.bf16 %v418_v1, %v417_v0  ;;  %v420_v4 = vld [vmem:[%s12094_s1 + $0x18] sm:$0xff]  ;;  %v5765_v22 = vld [vmem:[%s12095_s2 + $0x80] sm:$0xff]  ;;  %s8883_s29 = smov 32   ;;  %s8884_s15 = smov 96   ;;  %vm10442_vm3 = vmpackc.low %vm421_vm0, %vm421_vm0 }
   0xf   : > { %v7704_v5 = vpack.c.bf16 %v420_v4, %v419_v2  ;;  %s12358_s18 = smov (!%p385_p3, %s5737_s18), 1  ;;  %6760 = vmatprep.mubr.f32.mxu1 %v5765_v22  ;;  %v9014_v23 = vld [vmem:[%s12096_s3 + $0x1] ss:$0 sm:$0xff]  ;;  %v9019_v24 = vld [vmem:[%s12096_s3] ss:$0 sm:$0xff]  ;;  %s8885_s16 = smov 64  }
  0x10   : > { %7701 = vmatprep.subr.bf16.mxu0 %v7700_v3  ;;  %s6127_s27 = sshll.u32 %s12358_s18, 7  ;;  %v9024_v25 = vld [vmem:[%s12096_s3 + $0x2] ss:$0 sm:$0xff]  ;;  %v9029_v26 = vld [vmem:[%s12096_s3 + $0x3] ss:$0 sm:$0xff]  ;;  %s6129_s23 = sshll.u32 %s12358_s18, 9 }
  0x11   : > { %7703 = vmatpush3.bf16.msra.mxu0 %v7700_v3  ;;  %s8974_s30 = scalar_lea.vmem %s12093_s0, %s6127_s27  ;;  %v9036_v28 = vld [vmem:[%s12096_s3 + $0x4] ss:$0 sm:$0xff]  ;;  %v9041_v29 = vld [vmem:[%s12096_s3 + $0x5] ss:$0 sm:$0xff]  ;;  %s10753_s26 = scalar_lea.vmem %s12104_s11, %s6129_s23 }
  0x12   : > { %7705 = vmatprep.subr.bf16.mxu0 %v7704_v5  ;;  %v401_v6 = vld [vmem:[%s8974_s30] sm:$0xff]  ;;  %v402_v7 = vld [vmem:[%s8974_s30 + $0x8] sm:$0xff]  ;;  %v403_v8 = vld [vmem:[%s8974_s30 + $0x10] sm:$0xff]  ;;  %s12056_s28 = scalar_lea.vmem %s12103_s10, %s6127_s27 }
  0x13   : > { %6704 = vmatprep.mubr.msk.f32.mxu0 %vm421_vm0, %v401_v6  ;;  %v404_v9 = vld [vmem:[%s8974_s30 + $0x18] sm:$0xff]  ;;  %v405_v10 = vld [vmem:[%s8974_s30 + $0x20] sm:$0xff]  ;;  %v406_v11 = vld [vmem:[%s8974_s30 + $0x28] sm:$0xff] }
  0x14   : > { %v407_v12 = vld [vmem:[%s8974_s30 + $0x30] sm:$0xff]  ;;  %v408_v13 = vld [vmem:[%s8974_s30 + $0x38] sm:$0xff]  ;;  %v409_v14 = vld [vmem:[%s8974_s30 + $0x40] sm:$0xff] }
  0x15   : > { %7707 = vmatpush3.bf16.msra.mxu0 %v7704_v5  ;;  %v410_v15 = vld [vmem:[%s8974_s30 + $0x48] sm:$0xff]  ;;  %v411_v16 = vld [vmem:[%s8974_s30 + $0x50] sm:$0xff]  ;;  %v412_v17 = vld [vmem:[%s8974_s30 + $0x58] sm:$0xff] }
  0x16   : > { %v413_v18 = vld [vmem:[%s8974_s30 + $0x60] sm:$0xff]  ;;  %v414_v19 = vld [vmem:[%s8974_s30 + $0x68] sm:$0xff]  ;;  %v415_v20 = vld [vmem:[%s8974_s30 + $0x70] sm:$0xff] }
  0x17   : > { %v416_v21 = vld [vmem:[%s8974_s30 + $0x78] sm:$0xff] }
  0x18   : > { %6705 = vmatmul.mubr.msk.f32.vlgmr.msra.gmra.mrb[0].mxu0 %vm421_vm0, %v402_v7 }
  0x19   : > { %6707 = vmatprep.mubr.msk.f32.mxu0 %vm421_vm0, %v403_v8 }
  0x1c   : > { %6708 = vmatmul.mubr.msk.f32.gmra.mrb[2].mxu0 %vm421_vm0, %v404_v9 }
  0x1d   : > { %6710 = vmatprep.mubr.msk.f32.mxu0 %vm421_vm0, %v405_v10 }
  0x20   : > { %6711 = vmatmul.mubr.msk.f32.gmra.mrb[4].mxu0 %vm421_vm0, %v406_v11 }
  0x21   : > { %6713 = vmatprep.mubr.msk.f32.mxu0 %vm421_vm0, %v407_v12 }
  0x24   : > { %6714 = vmatmul.mubr.msk.f32.gmra.mrb[6].mxu0 %vm421_vm0, %v408_v13 }
  0x25   : > { %6716 = vmatprep.mubr.msk.f32.mxu0 %vm421_vm0, %v409_v14 }
  0x28   : > { %6717 = vmatmul.mubr.msk.f32.gmra.mrb[8].mxu0 %vm421_vm0, %v410_v15 }
  0x29   : > { %6719 = vmatprep.mubr.msk.f32.mxu0 %vm421_vm0, %v411_v16 }
  0x2c   : > { %6720 = vmatmul.mubr.msk.f32.gmra.mrb[10].mxu0 %vm421_vm0, %v412_v17 }
  0x2d   : > { %6722 = vmatprep.mubr.msk.f32.mxu0 %vm421_vm0, %v413_v18 }
  0x30   : > { %6723 = vmatmul.mubr.msk.f32.gmra.mrb[12].mxu0 %vm421_vm0, %v414_v19 }
  0x31   : > { %6725 = vmatprep.mubr.msk.f32.mxu0 %vm421_vm0, %v415_v20 }
  0x34   : > { %6726 = vmatmul.mubr.msk.f32.gmra.mrb[14].mxu0 %vm421_vm0, %v416_v21 }
  0xeb   : > { %v9031_v27 = vpop.f32.mrb[0].mxu0 }
  0xec   : > { %v9043_v30 = vpop.f32.mrb[1].mxu0  ;;  %v675_v31 = vmul.f32 %v9031_v27, %v9014_v23  ;;  %v637_v32 = vmul.f32 %v9031_v27, %v9019_v24  ;;  %v1003_v33 = vmul.f32 %v9031_v27, %v9024_v25  ;;  %v1202_v34 = vmul.f32 %v9031_v27, %v9029_v26 }
  0xed   : > { %v674_v35 = vmul.f32 %v9014_v23, %v9043_v30  ;;  %v636_v36 = vmul.f32 %v9019_v24, %v9043_v30  ;;  %v1002_v37 = vmul.f32 %v9024_v25, %v9043_v30  ;;  %v1201_v38 = vmul.f32 %v9029_v26, %v9043_v30 }
  0xee   : > { %v1400_v39 = vmul.f32 %v9036_v28, %v9043_v30  ;;  %v1401_v40 = vmul.f32 %v9031_v27, %v9036_v28  ;;  %v1599_v41 = vmul.f32 %v9041_v29, %v9043_v30  ;;  %v1600_v42 = vmul.f32 %v9031_v27, %v9041_v29 }
  0xef   : > { %v9069_v43 = vpop.f32.mrb[2].mxu0  ;;  %v7708_v44 = vpack.c.bf16 %v675_v31, %v674_v35  ;;  %v9071_v45 = vpack.c.bf16 %v637_v32, %v636_v36  ;;  %v9073_v46 = vpack.c.bf16 %v1003_v33, %v1002_v37  ;;  %v9075_v47 = vpack.c.bf16 %v1202_v34, %v1201_v38 }
  0xf0   : > { %v9077_v48 = vpop.f32.mrb[3].mxu0  ;;  %v677_v49 = vmul.f32 %v9069_v43, %v9014_v23  ;;  %v639_v50 = vmul.f32 %v9069_v43, %v9019_v24  ;;  %v1005_v51 = vmul.f32 %v9069_v43, %v9024_v25  ;;  %v1204_v52 = vmul.f32 %v9069_v43, %v9029_v26 }
  0xf1   : > { %7709 = vmatprep.subr.bf16.mxu1 %v7708_v44  ;;  %v676_v53 = vmul.f32 %v9014_v23, %v9077_v48  ;;  %v638_v54 = vmul.f32 %v9019_v24, %v9077_v48  ;;  %v1004_v55 = vmul.f32 %v9024_v25, %v9077_v48  ;;  %v1203_v56 = vmul.f32 %v9029_v26, %v9077_v48 }
  0xf2   : > { %7711 = vmatpush3.bf16.msra.mxu1 %v7708_v44  ;;  %v9095_v57 = vpack.c.bf16 %v1401_v40, %v1400_v39  ;;  %v1402_v58 = vmul.f32 %v9036_v28, %v9077_v48  ;;  %v1403_v59 = vmul.f32 %v9069_v43, %v9036_v28  ;;  %v9101_v60 = vpack.c.bf16 %v1600_v42, %v1599_v41 }
  0xf3   : > { %v9103_v61 = vpop.f32.mrb[4].mxu0  ;;  %v7712_v62 = vpack.c.bf16 %v677_v49, %v676_v53  ;;  %v9105_v63 = vpack.c.bf16 %v639_v50, %v638_v54  ;;  %v9107_v0 = vpack.c.bf16 %v1005_v51, %v1004_v55  ;;  %v9109_v1 = vpack.c.bf16 %v1204_v52, %v1203_v56 }
  0xf4   : > { %12203 = vst [vmem:[#allocation2_spill] sm:$0xff] %v9101_v60  ;;  %12204 = vst [vmem:[#allocation3_spill] sm:$0xff] %v9103_v61  ;;  %v9111_v2 = vpop.f32.mrb[5].mxu0  ;;  %v679_v3 = vmul.f32 %v9103_v61, %v9014_v23  ;;  %v641_v4 = vmul.f32 %v9103_v61, %v9019_v24  ;;  %v1007_v5 = vmul.f32 %v9103_v61, %v9024_v25 }
  0xf5   : > { %12205 = vst [vmem:[#allocation4_spill] sm:$0xff] %v9111_v2  ;;  %v1206_v6 = vmul.f32 %v9103_v61, %v9029_v26  ;;  %7713 = vmatprep.subr.bf16.mxu1 %v7712_v62  ;;  %v678_v7 = vmul.f32 %v9014_v23, %v9111_v2  ;;  %v640_v8 = vmul.f32 %v9019_v24, %v9111_v2 }
  0xf6   : > { %v1006_v9 = vmul.f32 %v9024_v25, %v9111_v2  ;;  %v1205_v10 = vmul.f32 %v9029_v26, %v9111_v2  ;;  %7715 = vmatpush3.bf16.msra.mxu1 %v7712_v62  ;;  %v9129_v11 = vpack.c.bf16 %v1403_v59, %v1402_v58  ;;  %v1404_v12 = vmul.f32 %v9036_v28, %v9111_v2 }
  0xf7   : > { %v1405_v13 = vmul.f32 %v9103_v61, %v9036_v28  ;;  %v1601_v14 = vmul.f32 %v9041_v29, %v9077_v48  ;;  %v9137_v15 = vpop.f32.mrb[6].mxu0  ;;  %v7716_v16 = vpack.c.bf16 %v679_v3, %v678_v7  ;;  %v9139_v17 = vpack.c.bf16 %v641_v4, %v640_v8 }
  0xf8   : > { %v9141_v18 = vpack.c.bf16 %v1007_v5, %v1006_v9  ;;  %v9143_v19 = vpack.c.bf16 %v1206_v6, %v1205_v10  ;;  %v9145_v20 = vpop.f32.mrb[7].mxu0  ;;  %v681_v21 = vmul.f32 %v9137_v15, %v9014_v23  ;;  %v643_v22 = vmul.f32 %v9137_v15, %v9019_v24 }
  0xf9   : > { %12206 = vst [vmem:[#allocation5_spill] sm:$0xff] %v9145_v20  ;;  %v1009_v31 = vmul.f32 %v9137_v15, %v9024_v25  ;;  %v1208_v32 = vmul.f32 %v9137_v15, %v9029_v26  ;;  %7717 = vmatprep.subr.bf16.mxu1 %v7716_v16  ;;  %v680_v33 = vmul.f32 %v9014_v23, %v9145_v20 }
  0xfa   : > { %v642_v34 = vmul.f32 %v9019_v24, %v9145_v20  ;;  %v1008_v35 = vmul.f32 %v9024_v25, %v9145_v20  ;;  %v1207_v36 = vmul.f32 %v9029_v26, %v9145_v20  ;;  %7719 = vmatpush3.bf16.msra.mxu1 %v7716_v16  ;;  %v9163_v37 = vpack.c.bf16 %v1405_v13, %v1404_v12 }
  0xfb   : > { %v1406_v38 = vmul.f32 %v9036_v28, %v9145_v20  ;;  %v1407_v39 = vmul.f32 %v9137_v15, %v9036_v28  ;;  %v1602_v40 = vmul.f32 %v9069_v43, %v9041_v29  ;;  %v9171_v41 = vpop.f32.mrb[8].mxu0  ;;  %v7720_v42 = vpack.c.bf16 %v681_v21, %v680_v33 }
  0xfc   : > { %12207 = vst [vmem:[#allocation6_spill] sm:$0xff] %v9163_v37  ;;  %v9173_v44 = vpack.c.bf16 %v643_v22, %v642_v34  ;;  %v9175_v49 = vpack.c.bf16 %v1009_v31, %v1008_v35  ;;  %v9177_v50 = vpack.c.bf16 %v1208_v32, %v1207_v36  ;;  %v9179_v51 = vpop.f32.mrb[9].mxu0  ;;  %v683_v52 = vmul.f32 %v9171_v41, %v9014_v23 }
  0xfd   : > { %v645_v53 = vmul.f32 %v9171_v41, %v9019_v24  ;;  %v1011_v54 = vmul.f32 %v9171_v41, %v9024_v25  ;;  %v1210_v55 = vmul.f32 %v9171_v41, %v9029_v26  ;;  %7721 = vmatprep.subr.bf16.mxu1 %v7720_v42  ;;  %v682_v56 = vmul.f32 %v9014_v23, %v9179_v51 }
  0xfe   : > { %v644_v58 = vmul.f32 %v9019_v24, %v9179_v51  ;;  %v1010_v59 = vmul.f32 %v9024_v25, %v9179_v51  ;;  %v1209_v62 = vmul.f32 %v9029_v26, %v9179_v51  ;;  %7723 = vmatpush3.bf16.msra.mxu1 %v7720_v42  ;;  %v9197_v3 = vpack.c.bf16 %v1407_v39, %v1406_v38 }
  0xff   : > { %v1408_v4 = vmul.f32 %v9036_v28, %v9179_v51  ;;  %v1409_v5 = vmul.f32 %v9171_v41, %v9036_v28  ;;  %v9203_v6 = vpack.c.bf16 %v1602_v40, %v1601_v14  ;;  %v9205_v7 = vpop.f32.mrb[10].mxu0  ;;  %v7724_v8 = vpack.c.bf16 %v683_v52, %v682_v56 }
 0x100   : > { %12208 = vst [vmem:[#allocation7_spill] sm:$0xff] %v9197_v3  ;;  %v9207_v9 = vpack.c.bf16 %v645_v53, %v644_v58  ;;  %v9209_v10 = vpack.c.bf16 %v1011_v54, %v1010_v59  ;;  %v9211_v12 = vpack.c.bf16 %v1210_v55, %v1209_v62  ;;  %v9213_v13 = vpop.f32.mrb[11].mxu0  ;;  %v685_v16 = vmul.f32 %v9205_v7, %v9014_v23 }
 0x101   : > { %12209 = vst [vmem:[#allocation8_spill] sm:$0xff] %v9203_v6  ;;  %v647_v21 = vmul.f32 %v9205_v7, %v9019_v24  ;;  %v1013_v14 = vmul.f32 %v9205_v7, %v9024_v25  ;;  %v1212_v22 = vmul.f32 %v9205_v7, %v9029_v26  ;;  %7725 = vmatprep.subr.bf16.mxu1 %v7724_v8 }
 0x102   : > { %v684_v31 = vmul.f32 %v9014_v23, %v9213_v13  ;;  %v646_v32 = vmul.f32 %v9019_v24, %v9213_v13  ;;  %v1012_v33 = vmul.f32 %v9024_v25, %v9213_v13  ;;  %v1211_v34 = vmul.f32 %v9029_v26, %v9213_v13  ;;  %7727 = vmatpush3.bf16.msra.mxu1 %v7724_v8 }
 0x103   : > { %v9231_v35 = vpack.c.bf16 %v1409_v5, %v1408_v4  ;;  %v1410_v36 = vmul.f32 %v9036_v28, %v9213_v13  ;;  %v1411_v38 = vmul.f32 %v9205_v7, %v9036_v28  ;;  %v1603_v39 = vmul.f32 %v9041_v29, %v9111_v2  ;;  %v9239_v40 = vpop.f32.mrb[12].mxu0 }
 0x104   : > { %v7728_v42 = vpack.c.bf16 %v685_v16, %v684_v31  ;;  %v9241_v52 = vpack.c.bf16 %v647_v21, %v646_v32  ;;  %v9243_v53 = vpack.c.bf16 %v1013_v14, %v1012_v33  ;;  %v9245_v54 = vpack.c.bf16 %v1212_v22, %v1211_v34  ;;  %v9247_v55 = vpop.f32.mrb[13].mxu0 }
 0x105   : > { %12210 = vst [vmem:[#allocation9_spill] sm:$0xff] %v9231_v35  ;;  %12211 = vst [vmem:[#allocation10_spill] sm:$0xff] %v9247_v55  ;;  %v687_v56 = vmul.f32 %v9239_v40, %v9014_v23  ;;  %v649_v58 = vmul.f32 %v9239_v40, %v9019_v24  ;;  %v1015_v59 = vmul.f32 %v9239_v40, %v9024_v25 }
 0x106   : > { %v1214_v62 = vmul.f32 %v9239_v40, %v9029_v26  ;;  %7729 = vmatprep.subr.bf16.mxu1 %v7728_v42  ;;  %v686_v4 = vmul.f32 %v9014_v23, %v9247_v55  ;;  %v648_v5 = vmul.f32 %v9019_v24, %v9247_v55  ;;  %v1014_v8 = vmul.f32 %v9024_v25, %v9247_v55 }
 0x107   : > { %v1213_v16 = vmul.f32 %v9029_v26, %v9247_v55  ;;  %7731 = vmatpush3.bf16.msra.mxu1 %v7728_v42  ;;  %v9265_v21 = vpack.c.bf16 %v1411_v38, %v1410_v36  ;;  %v1412_v14 = vmul.f32 %v9036_v28, %v9247_v55  ;;  %v1413_v22 = vmul.f32 %v9239_v40, %v9036_v28  ;;  %v9273_v32 = vpop.f32.mrb[14].mxu0 }
 0x108   : > { %v1604_v31 = vmul.f32 %v9103_v61, %v9041_v29  ;;  %v7732_v33 = vpack.c.bf16 %v687_v56, %v686_v4  ;;  %v9275_v34 = vpack.c.bf16 %v649_v58, %v648_v5  ;;  %v9277_v6 = vpack.c.bf16 %v1015_v59, %v1014_v8  ;;  %v9281_v36 = vpop.f32.mrb[15].mxu0 }
 0x109   : > { %12212 = vst [vmem:[#allocation11_spill] sm:$0xff] %v9265_v21  ;;  %v9279_v60 = vpack.c.bf16 %v1214_v62, %v1213_v16  ;;  %v689_v38 = vmul.f32 %v9273_v32, %v9014_v23  ;;  %v651_v42 = vmul.f32 %v9273_v32, %v9019_v24  ;;  %v1017_v21 = vmul.f32 %v9273_v32, %v9024_v25 }
 0x10a   : > { %v1216_v56 = vmul.f32 %v9273_v32, %v9029_v26  ;;  %7733 = vmatprep.subr.bf16.mxu1 %v7732_v33  ;;  %v688_v58 = vmul.f32 %v9014_v23, %v9281_v36  ;;  %v650_v59 = vmul.f32 %v9019_v24, %v9281_v36  ;;  %v1016_v62 = vmul.f32 %v9024_v25, %v9281_v36 }
 0x10b   : > { %v1215_v4 = vmul.f32 %v9029_v26, %v9281_v36  ;;  %7735 = vmatpush3.bf16.msra.mxu1 %v7732_v33  ;;  %v9299_v5 = vpack.c.bf16 %v1413_v22, %v1412_v14  ;;  %v1414_v8 = vmul.f32 %v9036_v28, %v9281_v36  ;;  %v1415_v16 = vmul.f32 %v9273_v32, %v9036_v28 }
 0x10c   : > { %v9305_v35 = vpack.c.bf16 %v1604_v31, %v1603_v39  ;;  %v7736_v23 = vpack.c.bf16 %v689_v38, %v688_v58  ;;  %v9307_v3 = vpack.c.bf16 %v651_v42, %v650_v59  ;;  %v9309_v24 = vpack.c.bf16 %v1017_v21, %v1016_v62  ;;  %v5866_v39 = vld [vmem:[%s12096_s3 + $0x6] ss:$0 sm:$0xff]  ;;  %v5766_v38 = vld [vmem:[%s12095_s2 + $0x88] sm:$0xff]  ;;  %v5767_v62 = vld [vmem:[%s12095_s2 + $0x90] sm:$0xff] }
 0x10d   : > { %v9311_v25 = vpack.c.bf16 %v1216_v56, %v1215_v4  ;;  %v9313_v37 = vpack.c.bf16 %v1415_v16, %v1414_v8  ;;  %v1605_v26 = vmul.f32 %v9041_v29, %v9145_v20  ;;  %v1606_v14 = vmul.f32 %v9137_v15, %v9041_v29 }
 0x10e   : > { %12213 = vst [vmem:[#allocation12_spill] sm:$0xff] %v9305_v35  ;;  %v1607_v28 = vmul.f32 %v9041_v29, %v9179_v51  ;;  %7737 = vmatprep.subr.bf16.mxu1 %v7736_v23  ;;  %v1608_v21 = vmul.f32 %v9171_v41, %v9041_v29  ;;  %v1609_v22 = vmul.f32 %v9041_v29, %v9213_v13 }
 0x10f   : > { %v1610_v31 = vmul.f32 %v9205_v7, %v9041_v29  ;;  %v1611_v33 = vmul.f32 %v9041_v29, %v9247_v55  ;;  %7739 = vmatpush3.bf16.msra.mxu1 %v7736_v23  ;;  %v9335_v42 = vpack.c.bf16 %v1606_v14, %v1605_v26  ;;  %v1612_v56 = vmul.f32 %v9239_v40, %v9041_v29 }
 0x110   : > { %v1613_v58 = vmul.f32 %v9041_v29, %v9281_v36  ;;  %v1614_v59 = vmul.f32 %v9273_v32, %v9041_v29  ;;  %7741 = vmatprep.subr.bf16.mxu1 %v9071_v45  ;;  %v9347_v4 = vpack.c.bf16 %v1608_v21, %v1607_v28  ;;  %v1798_v16 = vmul.f32 %v5866_v39, %v9043_v30 }
 0x111   : > { %12214 = vst [vmem:[#allocation13_spill] sm:$0xff] %v9335_v42  ;;  %v9349_v8 = vpack.c.bf16 %v1610_v31, %v1609_v22  ;;  %v1799_v23 = vmul.f32 %v9031_v27, %v5866_v39  ;;  %v9353_v26 = vpack.c.bf16 %v1612_v56, %v1611_v33  ;;  %v1800_v29 = vmul.f32 %v5866_v39, %v9077_v48  ;;  %v5768_v31 = vld [vmem:[%s12095_s2 + $0x98] sm:$0xff] }
 0x112   : > { %v9355_v14 = vpack.c.bf16 %v1614_v59, %v1613_v58  ;;  %v1801_v42 = vmul.f32 %v9069_v43, %v5866_v39  ;;  %6761 = vmatmul.mubr.f32.vlgmr.msra.gmra.mrb[0].mxu1 %v5766_v38  ;;  %v1802_v28 = vmul.f32 %v5866_v39, %v9111_v2  ;;  %v1803_v21 = vmul.f32 %v9103_v61, %v5866_v39  ;;  %v5883_v58 = vld [vmem:[%s12096_s3 + $0x7] ss:$0 sm:$0xff] }
 0x113   : > { %12215 = vst [vmem:[#allocation14_spill] sm:$0xff] %v9353_v26  ;;  %v9359_v35 = vpack.c.bf16 %v1799_v23, %v1798_v16  ;;  %v1804_v22 = vmul.f32 %v5866_v39, %v9145_v20  ;;  %7743 = vmatpush3.bf16.msra.mxu1 %v9071_v45  ;;  %6763 = vmatprep.mubr.f32.mxu1 %v5767_v62  ;;  %v5769_v45 = vld [vmem:[%s12095_s2 + $0xa0] sm:$0xff] }
 0x114   : > { %12216 = vst [vmem:[#allocation15_spill] sm:$0xff] %v9355_v14  ;;  %v9368_v33 = vpack.c.bf16 %v1801_v42, %v1800_v29  ;;  %v1805_v56 = vmul.f32 %v9137_v15, %v5866_v39  ;;  %v1806_v38 = vmul.f32 %v5866_v39, %v9179_v51  ;;  %7745 = vmatprep.subr.bf16.mxu1 %v9105_v63 }
 0x115   : > { %12217 = vst [vmem:[#allocation16_spill] sm:$0xff] %v9359_v35  ;;  %v9379_v59 = vpack.c.bf16 %v1803_v21, %v1802_v28  ;;  %v1807_v62 = vmul.f32 %v9171_v41, %v5866_v39  ;;  %v1808_v42 = vmul.f32 %v5866_v39, %v9213_v13  ;;  %v1809_v16 = vmul.f32 %v9205_v7, %v5866_v39 }
 0x116   : > { %12218 = vst [vmem:[#allocation17_spill] sm:$0xff] %v9368_v33  ;;  %v9384_v23 = vpack.c.bf16 %v1805_v56, %v1804_v22  ;;  %v1810_v29 = vmul.f32 %v5866_v39, %v9247_v55  ;;  %v1811_v33 = vmul.f32 %v9239_v40, %v5866_v39  ;;  %v1812_v35 = vmul.f32 %v5866_v39, %v9281_v36  ;;  %v5770_v22 = vld [vmem:[%s12095_s2 + $0xa8] sm:$0xff] }
 0x117   : > { %6764 = vmatmul.mubr.f32.gmra.mrb[2].mxu1 %v5768_v31  ;;  %v9389_v14 = vpack.c.bf16 %v1807_v62, %v1806_v38  ;;  %v9391_v26 = vpack.c.bf16 %v1809_v16, %v1808_v42  ;;  %v1813_v28 = vmul.f32 %v9273_v32, %v5866_v39  ;;  %v1997_v21 = vmul.f32 %v5883_v58, %v9043_v30  ;;  %v5771_v39 = vld [vmem:[%s12095_s2 + $0xb0] sm:$0xff] }
 0x118   : > { %12219 = vst [vmem:[#allocation18_spill] sm:$0xff] %v9384_v23  ;;  %7747 = vmatpush3.bf16.msra.mxu1 %v9105_v63  ;;  %6766 = vmatprep.mubr.f32.mxu1 %v5769_v45  ;;  %v9399_v56 = vpack.c.bf16 %v1811_v33, %v1810_v29  ;;  %v1998_v23 = vmul.f32 %v9031_v27, %v5883_v58 }
 0x119   : > { %12220 = vst [vmem:[#allocation19_spill] sm:$0xff] %v9391_v26  ;;  %v1999_v31 = vmul.f32 %v5883_v58, %v9077_v48  ;;  %7749 = vmatprep.subr.bf16.mxu1 %v9139_v17  ;;  %v9407_v38 = vpack.c.bf16 %v1813_v28, %v1812_v35  ;;  %v2000_v63 = vmul.f32 %v9069_v43, %v5883_v58 }
 0x11a   : > { %12221 = vst [vmem:[#allocation20_spill] sm:$0xff] %v9399_v56  ;;  %v2001_v45 = vmul.f32 %v5883_v58, %v9111_v2  ;;  %v2002_v62 = vmul.f32 %v9103_v61, %v5883_v58  ;;  %v9412_v33 = vpack.c.bf16 %v1998_v23, %v1997_v21  ;;  %v2003_v42 = vmul.f32 %v5883_v58, %v9145_v20  ;;  %v5900_v23 = vld [vmem:[%s12096_s3 + $0x8] ss:$0 sm:$0xff]  ;;  %v5772_v21 = vld [vmem:[%s12095_s2 + $0xb8] sm:$0xff] }
 0x11b   : > { %12222 = vst [vmem:[#allocation21_spill] sm:$0xff] %v9407_v38  ;;  %v2004_v16 = vmul.f32 %v9137_v15, %v5883_v58  ;;  %v2005_v29 = vmul.f32 %v5883_v58, %v9179_v51  ;;  %6767 = vmatmul.mubr.f32.gmra.mrb[4].mxu1 %v5770_v22  ;;  %v9417_v56 = vpack.c.bf16 %v2000_v63, %v1999_v31 }
 0x11c   : > { %12223 = vst [vmem:[#allocation22_spill] sm:$0xff] %v9412_v33  ;;  %v9419_v26 = vpack.c.bf16 %v2002_v62, %v2001_v45  ;;  %v2006_v35 = vmul.f32 %v9171_v41, %v5883_v58  ;;  %v2007_v28 = vmul.f32 %v5883_v58, %v9213_v13  ;;  %7751 = vmatpush3.bf16.msra.mxu1 %v9139_v17  ;;  %v5773_v45 = vld [vmem:[%s12095_s2 + $0xc0] sm:$0xff] }
 0x11d   : > { %12224 = vst [vmem:[#allocation23_spill] sm:$0xff] %v9417_v56  ;;  %6769 = vmatprep.mubr.f32.mxu1 %v5771_v39  ;;  %v9430_v22 = vpack.c.bf16 %v2004_v16, %v2003_v42  ;;  %v2008_v31 = vmul.f32 %v9205_v7, %v5883_v58  ;;  %v2009_v63 = vmul.f32 %v5883_v58, %v9247_v55 }
 0x11e   : > { %12225 = vst [vmem:[#allocation24_spill] sm:$0xff] %v9419_v26  ;;  %7753 = vmatprep.subr.bf16.mxu1 %v9173_v44  ;;  %v9438_v62 = vpack.c.bf16 %v2006_v35, %v2005_v29  ;;  %v2010_v17 = vmul.f32 %v9239_v40, %v5883_v58  ;;  %v2011_v39 = vmul.f32 %v5883_v58, %v9281_v36 }
 0x11f   : > { %12226 = vst [vmem:[#allocation25_spill] sm:$0xff] %v9430_v22  ;;  %v2012_v26 = vmul.f32 %v9273_v32, %v5883_v58  ;;  %v9443_v42 = vpack.c.bf16 %v2008_v31, %v2007_v28  ;;  %v2196_v16 = vmul.f32 %v5900_v23, %v9043_v30  ;;  %v2197_v22 = vmul.f32 %v9031_v27, %v5900_v23  ;;  %v5774_v58 = vld [vmem:[%s12095_s2 + $0xc8] sm:$0xff] }
 0x120   : > { %v2198_v56 = vmul.f32 %v5900_v23, %v9077_v48  ;;  %6770 = vmatmul.mubr.f32.gmra.mrb[6].mxu1 %v5772_v21  ;;  %v9448_v33 = vpack.c.bf16 %v2010_v17, %v2009_v63  ;;  %v2199_v29 = vmul.f32 %v9069_v43, %v5900_v23  ;;  %v2200_v35 = vmul.f32 %v5900_v23, %v9111_v2 }
 0x121   : > { %v9450_v38 = vpack.c.bf16 %v2012_v26, %v2011_v39  ;;  %7755 = vmatpush3.bf16.msra.mxu1 %v9173_v44  ;;  %6772 = vmatprep.mubr.f32.mxu1 %v5773_v45  ;;  %v9458_v28 = vpack.c.bf16 %v2197_v22, %v2196_v16  ;;  %v2201_v31 = vmul.f32 %v9103_v61, %v5900_v23  ;;  %v5775_v26 = vld [vmem:[%s12095_s2 + $0xd0] sm:$0xff] }
 0x122   : > { %v2202_v21 = vmul.f32 %v5900_v23, %v9145_v20  ;;  %7757 = vmatprep.subr.bf16.mxu1 %v9207_v9  ;;  %v9466_v63 = vpack.c.bf16 %v2199_v29, %v2198_v56  ;;  %v2203_v44 = vmul.f32 %v9137_v15, %v5900_v23  ;;  %v2204_v45 = vmul.f32 %v5900_v23, %v9179_v51 }
 0x123   : > { %v2205_v17 = vmul.f32 %v9171_v41, %v5900_v23  ;;  %v9471_v22 = vpack.c.bf16 %v2201_v31, %v2200_v35  ;;  %v2206_v39 = vmul.f32 %v5900_v23, %v9213_v13  ;;  %v2207_v16 = vmul.f32 %v9205_v7, %v5900_v23  ;;  %v5776_v35 = vld [vmem:[%s12095_s2 + $0xd8] sm:$0xff] }
 0x124   : > { %v2208_v20 = vmul.f32 %v5900_v23, %v9247_v55  ;;  %6773 = vmatmul.mubr.f32.gmra.mrb[8].mxu1 %v5774_v58  ;;  %v9476_v2 = vpack.c.bf16 %v2203_v44, %v2202_v21  ;;  %v2209_v56 = vmul.f32 %v9239_v40, %v5900_v23  ;;  %v2210_v29 = vmul.f32 %v5900_v23, %v9281_v36  ;;  %v5777_v58 = vld [vmem:[%s12095_s2 + $0xe0] sm:$0xff] }
 0x125   : > { %v9478_v61 = vpack.c.bf16 %v2205_v17, %v2204_v45  ;;  %7759 = vmatpush3.bf16.msra.mxu1 %v9207_v9  ;;  %6775 = vmatprep.mubr.f32.mxu1 %v5775_v26  ;;  %v9486_v31 = vpack.c.bf16 %v2207_v16, %v2206_v39  ;;  %v2211_v55 = vmul.f32 %v9273_v32, %v5900_v23  ;;  %v5778_v9 = vld [vmem:[%s12095_s2 + $0xe8] sm:$0xff]  ;;  %v5779_v23 = vld [vmem:[%s12095_s2 + $0xf0] sm:$0xff]  ;;  %v618_v26 = vld [vmem:[%s12095_s2 + $0x18] sm:$0xff] }
 0x126   : > { %7761 = vmatprep.subr.bf16.mxu1 %v9241_v52  ;;  %v9493_v21 = vpack.c.bf16 %v2209_v56, %v2208_v20  ;;  %v5780_v20 = vld [vmem:[%s12095_s2 + $0xf8] sm:$0xff]  ;;  %v620_v45 = vld [vmem:[%s12095_s2 + $0x28] sm:$0xff] }
 0x127   : > { %v9495_v44 = vpack.c.bf16 %v2211_v55, %v2210_v29  ;;  %v616_v55 = vld [vmem:[%s12095_s2 + $0x8] sm:$0xff]  ;;  %v622_v17 = vld [vmem:[%s12095_s2 + $0x38] sm:$0xff] }
 0x128   : > { %6776 = vmatmul.mubr.f32.gmra.mrb[10].mxu1 %v5776_v35  ;;  %v624_v39 = vld [vmem:[%s12095_s2 + $0x48] sm:$0xff]  ;;  %v626_v16 = vld [vmem:[%s12095_s2 + $0x58] sm:$0xff] }
 0x129   : > { %7763 = vmatpush3.bf16.msra.mxu1 %v9241_v52  ;;  %6778 = vmatprep.mubr.f32.mxu1 %v5777_v58  ;;  %v615_v52 = vld [vmem:[%s12095_s2] sm:$0xff]  ;;  %v628_v56 = vld [vmem:[%s12095_s2 + $0x68] sm:$0xff]  ;;  %v630_v29 = vld [vmem:[%s12095_s2 + $0x78] sm:$0xff] }
 0x12a   : > { %7765 = vmatprep.subr.bf16.mxu1 %v9275_v34  ;;  %v5783_v35 = vld [vmem:[%s12095_s2 + $0x108] sm:$0xff]  ;;  %v5785_v58 = vld [vmem:[%s12095_s2 + $0x118] sm:$0xff] }
 0x12c   : > { %6779 = vmatmul.mubr.f32.gmra.mrb[12].mxu1 %v5778_v9  ;;  %v5787_v9 = vld [vmem:[%s12095_s2 + $0x128] sm:$0xff] }
 0x12d   : > { %7767 = vmatpush3.bf16.msra.mxu1 %v9275_v34  ;;  %6781 = vmatprep.mubr.f32.mxu1 %v5779_v23  ;;  %v617_v34 = vld [vmem:[%s12095_s2 + $0x10] sm:$0xff]  ;;  %v5789_v23 = vld [vmem:[%s12095_s2 + $0x138] sm:$0xff] }
 0x12e   : > { %7769 = vmatprep.subr.bf16.mxu1 %v9307_v3 }
 0x130   : > { %6782 = vmatmul.mubr.f32.gmra.mrb[14].mxu1 %v5780_v20  ;;  %v5791_v20 = vld [vmem:[%s12095_s2 + $0x148] sm:$0xff] }
 0x131   : > { %7771 = vmatpush3.bf16.msra.mxu1 %v9307_v3  ;;  %6816 = vmatprep.mubr.f32.mxu1 %v615_v52  ;;  %v619_v3 = vld [vmem:[%s12095_s2 + $0x20] sm:$0xff]  ;;  %v5793_v52 = vld [vmem:[%s12095_s2 + $0x158] sm:$0xff] }
 0x132   : > { %7773 = vmatprep.subr.bf16.mxu1 %v9073_v46 }
 0x134   : > { %6817 = vmatmul.mubr.f32.vlgmr.msra.gmra.mrb[0].mxu1 %v616_v55  ;;  %v5795_v55 = vld [vmem:[%s12095_s2 + $0x168] sm:$0xff] }
 0x135   : > { %7775 = vmatpush3.bf16.msra.mxu1 %v9073_v46  ;;  %6819 = vmatprep.mubr.f32.mxu1 %v617_v34  ;;  %v621_v46 = vld [vmem:[%s12095_s2 + $0x30] sm:$0xff]  ;;  %v5797_v34 = vld [vmem:[%s12095_s2 + $0x178] sm:$0xff] }
 0x136   : > { %7777 = vmatprep.subr.bf16.mxu1 %v9107_v0 }
 0x138   : > { %6820 = vmatmul.mubr.f32.gmra.mrb[2].mxu1 %v618_v26  ;;  %v5800_v26 = vld [vmem:[%s12095_s2 + $0x188] sm:$0xff] }
 0x139   : > { %7779 = vmatpush3.bf16.msra.mxu1 %v9107_v0  ;;  %6822 = vmatprep.mubr.f32.mxu1 %v619_v3  ;;  %v623_v0 = vld [vmem:[%s12095_s2 + $0x40] sm:$0xff]  ;;  %v5802_v3 = vld [vmem:[%s12095_s2 + $0x198] sm:$0xff] }
 0x13a   : > { %7781 = vmatprep.subr.bf16.mxu1 %v9141_v18 }
 0x13c   : > { %6823 = vmatmul.mubr.f32.gmra.mrb[4].mxu1 %v620_v45  ;;  %v5804_v45 = vld [vmem:[%s12095_s2 + $0x1a8] sm:$0xff] }
 0x13d   : > { %7783 = vmatpush3.bf16.msra.mxu1 %v9141_v18  ;;  %6825 = vmatprep.mubr.f32.mxu1 %v621_v46  ;;  %v625_v18 = vld [vmem:[%s12095_s2 + $0x50] sm:$0xff] }
 0x13e   : > { %7785 = vmatprep.subr.bf16.mxu1 %v9175_v49  ;;  %v5805_v46 = vld [vmem:[%s12095_s2 + $0x1b0] sm:$0xff] }
 0x140   : > { %6826 = vmatmul.mubr.f32.gmra.mrb[6].mxu1 %v622_v17  ;;  %v5806_v17 = vld [vmem:[%s12095_s2 + $0x1b8] sm:$0xff] }
 0x141   : > { %7787 = vmatpush3.bf16.msra.mxu1 %v9175_v49  ;;  %6828 = vmatprep.mubr.f32.mxu1 %v623_v0  ;;  %v627_v49 = vld [vmem:[%s12095_s2 + $0x60] sm:$0xff] }
 0x142   : > { %7789 = vmatprep.subr.bf16.mxu1 %v9209_v10  ;;  %v5807_v0 = vld [vmem:[%s12095_s2 + $0x1c0] sm:$0xff] }
 0x144   : > { %6829 = vmatmul.mubr.f32.gmra.mrb[8].mxu1 %v624_v39  ;;  %v5808_v39 = vld [vmem:[%s12095_s2 + $0x1c8] sm:$0xff] }
 0x145   : > { %7791 = vmatpush3.bf16.msra.mxu1 %v9209_v10  ;;  %6831 = vmatprep.mubr.f32.mxu1 %v625_v18  ;;  %v629_v10 = vld [vmem:[%s12095_s2 + $0x70] sm:$0xff]  ;;  %v12229_v18 = vld [vmem:[#allocation9_spill] sm:$0xff] }
 0x146   : > { %7793 = vmatprep.subr.bf16.mxu1 %v9243_v53 }
 0x148   : > { %6832 = vmatmul.mubr.f32.gmra.mrb[10].mxu1 %v626_v16  ;;  %v5809_v16 = vld [vmem:[%s12095_s2 + $0x1d0] sm:$0xff] }
 0x149   : > { %7795 = vmatpush3.bf16.msra.mxu1 %v9243_v53  ;;  %6834 = vmatprep.mubr.f32.mxu1 %v627_v49  ;;  %v5782_v53 = vld [vmem:[%s12095_s2 + $0x100] sm:$0xff]  ;;  %v5810_v49 = vld [vmem:[%s12095_s2 + $0x1d8] sm:$0xff] }
 0x14a   : > { %7797 = vmatprep.subr.bf16.mxu1 %v9277_v6 }
 0x14c   : > { %6835 = vmatmul.mubr.f32.gmra.mrb[12].mxu1 %v628_v56  ;;  %v12230_v56 = vld [vmem:[#allocation11_spill] sm:$0xff] }
 0x14d   : > { %7799 = vmatpush3.bf16.msra.mxu1 %v9277_v6  ;;  %6837 = vmatprep.mubr.f32.mxu1 %v629_v10  ;;  %v5784_v6 = vld [vmem:[%s12095_s2 + $0x110] sm:$0xff]  ;;  %v5811_v10 = vld [vmem:[%s12095_s2 + $0x1e0] sm:$0xff] }
 0x14e   : > { %7801 = vmatprep.subr.bf16.mxu1 %v9309_v24 }
 0x150   : > { %6838 = vmatmul.mubr.f32.gmra.mrb[14].mxu1 %v630_v29  ;;  %v5812_v29 = vld [vmem:[%s12095_s2 + $0x1e8] sm:$0xff] }
 0x151   : > { %7803 = vmatpush3.bf16.msra.mxu1 %v9309_v24  ;;  %6872 = vmatprep.mubr.f32.mxu1 %v5782_v53  ;;  %v5786_v24 = vld [vmem:[%s12095_s2 + $0x120] sm:$0xff]  ;;  %v5813_v53 = vld [vmem:[%s12095_s2 + $0x1f0] sm:$0xff] }
 0x152   : > { %7805 = vmatprep.subr.bf16.mxu1 %v9075_v47 }
 0x154   : > { %6873 = vmatmul.mubr.f32.vlgmr.msra.gmra.mrb[0].mxu1 %v5783_v35  ;;  %v5814_v35 = vld [vmem:[%s12095_s2 + $0x1f8] sm:$0xff] }
 0x155   : > { %7807 = vmatpush3.bf16.msra.mxu1 %v9075_v47  ;;  %6875 = vmatprep.mubr.f32.mxu1 %v5784_v6  ;;  %v5788_v47 = vld [vmem:[%s12095_s2 + $0x130] sm:$0xff]  ;;  %v5816_v6 = vld [vmem:[%s12095_s2 + $0x200] sm:$0xff] }
 0x156   : > { %7809 = vmatprep.subr.bf16.mxu1 %v9109_v1 }
 0x158   : > { %6876 = vmatmul.mubr.f32.gmra.mrb[2].mxu1 %v5785_v58  ;;  %v5817_v58 = vld [vmem:[%s12095_s2 + $0x208] sm:$0xff] }
 0x159   : > { %7811 = vmatpush3.bf16.msra.mxu1 %v9109_v1  ;;  %6878 = vmatprep.mubr.f32.mxu1 %v5786_v24  ;;  %v5790_v1 = vld [vmem:[%s12095_s2 + $0x140] sm:$0xff]  ;;  %v5818_v24 = vld [vmem:[%s12095_s2 + $0x210] sm:$0xff] }
 0x15a   : > { %7813 = vmatprep.subr.bf16.mxu1 %v9143_v19 }
 0x15c   : > { %6879 = vmatmul.mubr.f32.gmra.mrb[4].mxu1 %v5787_v9  ;;  %v5819_v9 = vld [vmem:[%s12095_s2 + $0x218] sm:$0xff] }
 0x15d   : > { %7815 = vmatpush3.bf16.msra.mxu1 %v9143_v19  ;;  %6881 = vmatprep.mubr.f32.mxu1 %v5788_v47  ;;  %v5792_v19 = vld [vmem:[%s12095_s2 + $0x150] sm:$0xff]  ;;  %v5820_v47 = vld [vmem:[%s12095_s2 + $0x220] sm:$0xff] }
 0x15e   : > { %7817 = vmatprep.subr.bf16.mxu1 %v9177_v50 }
 0x160   : > { %6882 = vmatmul.mubr.f32.gmra.mrb[6].mxu1 %v5789_v23  ;;  %v5821_v23 = vld [vmem:[%s12095_s2 + $0x228] sm:$0xff] }
 0x161   : > { %7819 = vmatpush3.bf16.msra.mxu1 %v9177_v50  ;;  %6884 = vmatprep.mubr.f32.mxu1 %v5790_v1  ;;  %v5794_v50 = vld [vmem:[%s12095_s2 + $0x160] sm:$0xff]  ;;  %v12233_v1 = vld [vmem:[#allocation12_spill] sm:$0xff] }
 0x162   : > { %7821 = vmatprep.subr.bf16.mxu1 %v9211_v12 }
 0x164   : > { %6885 = vmatmul.mubr.f32.gmra.mrb[8].mxu1 %v5791_v20  ;;  %v5822_v20 = vld [vmem:[%s12095_s2 + $0x230] sm:$0xff] }
 0x165   : > { %7823 = vmatpush3.bf16.msra.mxu1 %v9211_v12  ;;  %6887 = vmatprep.mubr.f32.mxu1 %v5792_v19  ;;  %v5796_v12 = vld [vmem:[%s12095_s2 + $0x170] sm:$0xff]  ;;  %v5823_v19 = vld [vmem:[%s12095_s2 + $0x238] sm:$0xff] }
 0x166   : > { %7825 = vmatprep.subr.bf16.mxu1 %v9245_v54 }
 0x168   : > { %6888 = vmatmul.mubr.f32.gmra.mrb[10].mxu1 %v5793_v52  ;;  %v12234_v52 = vld [vmem:[#allocation13_spill] sm:$0xff] }
 0x169   : > { %7827 = vmatpush3.bf16.msra.mxu1 %v9245_v54  ;;  %6890 = vmatprep.mubr.f32.mxu1 %v5794_v50  ;;  %v5799_v54 = vld [vmem:[%s12095_s2 + $0x180] sm:$0xff] }
 0x16a   : > { %7829 = vmatprep.subr.bf16.mxu1 %v9279_v60  ;;  %v5824_v50 = vld [vmem:[%s12095_s2 + $0x240] sm:$0xff] }
 0x16c   : > { %6891 = vmatmul.mubr.f32.gmra.mrb[12].mxu1 %v5795_v55  ;;  %v5825_v55 = vld [vmem:[%s12095_s2 + $0x248] sm:$0xff] }
 0x16d   : > { %7831 = vmatpush3.bf16.msra.mxu1 %v9279_v60  ;;  %6893 = vmatprep.mubr.f32.mxu1 %v5796_v12  ;;  %v5801_v60 = vld [vmem:[%s12095_s2 + $0x190] sm:$0xff] }
 0x16e   : > { %7833 = vmatprep.subr.bf16.mxu1 %v9311_v25  ;;  %v5826_v12 = vld [vmem:[%s12095_s2 + $0x250] sm:$0xff] }
 0x170   : > { %6894 = vmatmul.mubr.f32.gmra.mrb[14].mxu1 %v5797_v34  ;;  %v5827_v34 = vld [vmem:[%s12095_s2 + $0x258] sm:$0xff] }
 0x171   : > { %7835 = vmatpush3.bf16.msra.mxu1 %v9311_v25  ;;  %6928 = vmatprep.mubr.f32.mxu1 %v5799_v54  ;;  %v5803_v25 = vld [vmem:[%s12095_s2 + $0x1a0] sm:$0xff] }
 0x172   : > { %7837 = vmatprep.subr.bf16.mxu1 %v9095_v57  ;;  %v5828_v54 = vld [vmem:[%s12095_s2 + $0x260] sm:$0xff] }
 0x174   : > { %6929 = vmatmul.mubr.f32.vlgmr.msra.gmra.mrb[0].mxu1 %v5800_v26  ;;  %v5829_v26 = vld [vmem:[%s12095_s2 + $0x268] sm:$0xff] }
 0x175   : > { %7839 = vmatpush3.bf16.msra.mxu1 %v9095_v57  ;;  %6931 = vmatprep.mubr.f32.mxu1 %v5801_v60  ;;  %v12227_v57 = vld [vmem:[#allocation6_spill] sm:$0xff]  ;;  %v5830_v60 = vld [vmem:[%s12095_s2 + $0x270] sm:$0xff] }
 0x176   : > { %7841 = vmatprep.subr.bf16.mxu1 %v9129_v11 }
 0x178   : > { %6932 = vmatmul.mubr.f32.gmra.mrb[2].mxu1 %v5802_v3  ;;  %v5831_v3 = vld [vmem:[%s12095_s2 + $0x278] sm:$0xff] }
 0x179   : > { %7843 = vmatpush3.bf16.msra.mxu1 %v9129_v11  ;;  %6934 = vmatprep.mubr.f32.mxu1 %v5803_v25  ;;  %v12228_v11 = vld [vmem:[#allocation7_spill] sm:$0xff]  ;;  %v5833_v25 = vld [vmem:[%s12095_s2 + $0x280] sm:$0xff] }
 0x17a   : > { %7845 = vmatprep.subr.bf16.mxu1 %v12227_v57 }
 0x17c   : > { %6935 = vmatmul.mubr.f32.gmra.mrb[4].mxu1 %v5804_v45  ;;  %v2470_v45 = vld [vmem:[%s12097_s4] sm:$0xff] }
 0x17d   : > { %7847 = vmatpush3.bf16.msra.mxu1 %v12227_v57  ;;  %6937 = vmatprep.mubr.f32.mxu1 %v5805_v46  ;;  %v2471_v57 = vld [vmem:[%s12097_s4 + $0x8] sm:$0xff]  ;;  %v2472_v46 = vld [vmem:[%s12097_s4 + $0x10] sm:$0xff] }
 0x17e   : > { %7849 = vmatprep.subr.bf16.mxu1 %v12228_v11 }
 0x180   : > { %6938 = vmatmul.mubr.f32.gmra.mrb[6].mxu1 %v5806_v17  ;;  %v5834_v17 = vld [vmem:[%s12095_s2 + $0x288] sm:$0xff] }
 0x181   : > { %7851 = vmatpush3.bf16.msra.mxu1 %v12228_v11  ;;  %6940 = vmatprep.mubr.f32.mxu1 %v5807_v0  ;;  %v9782_v11 = vpack.c.bf16 %v2471_v57, %v2470_v45  ;;  %v2473_v0 = vld [vmem:[%s12097_s4 + $0x18] sm:$0xff]  ;;  %v12244_v57 = vld [vmem:[#allocation23_spill] sm:$0xff] }
 0x182   : > { %7853 = vmatprep.subr.bf16.mxu1 %v12229_v18  ;;  %v5853_v45 = vld [vmem:[%s12095_s2 + $0x318] sm:$0xff] }
 0x183   : > { %7997 = vmatprep.subr.bf16.mxu0 %v9782_v11 }
 0x184   : > { %6941 = vmatmul.mubr.f32.gmra.mrb[8].mxu1 %v5808_v39  ;;  %v12237_v39 = vld [vmem:[#allocation16_spill] sm:$0xff]  ;;  %7999 = vmatpush3.bf16.msra.mxu0 %v9782_v11 }
 0x185   : > { %7855 = vmatpush3.bf16.msra.mxu1 %v12229_v18  ;;  %6943 = vmatprep.mubr.f32.mxu1 %v5809_v16  ;;  %v5835_v18 = vld [vmem:[%s12095_s2 + $0x290] sm:$0xff]  ;;  %v9791_v16 = vpack.c.bf16 %v2473_v0, %v2472_v46  ;;  %v5854_v46 = vld [vmem:[%s12095_s2 + $0x320] sm:$0xff] }
 0x186   : > { %7857 = vmatprep.subr.bf16.mxu1 %v12230_v56  ;;  %v12245_v0 = vld [vmem:[#allocation24_spill] sm:$0xff] }
 0x187   : > { %8001 = vmatprep.subr.bf16.mxu0 %v9791_v16 }
 0x188   : > { %6944 = vmatmul.mubr.f32.gmra.mrb[10].mxu1 %v5810_v49  ;;  %v2474_v49 = vld [vmem:[%s12097_s4 + $0x20] sm:$0xff]  ;;  %8003 = vmatpush3.bf16.msra.mxu0 %v9791_v16 }
 0x189   : > { %7859 = vmatpush3.bf16.msra.mxu1 %v12230_v56  ;;  %6946 = vmatprep.mubr.f32.mxu1 %v5811_v10  ;;  %v2475_v56 = vld [vmem:[%s12097_s4 + $0x28] sm:$0xff]  ;;  %v5836_v10 = vld [vmem:[%s12095_s2 + $0x298] sm:$0xff] }
 0x18a   : > { %7861 = vmatprep.subr.bf16.mxu1 %v9299_v5 }
 0x18c   : > { %6947 = vmatmul.mubr.f32.gmra.mrb[12].mxu1 %v5812_v29  ;;  %v12238_v29 = vld [vmem:[#allocation17_spill] sm:$0xff] }
 0x18d   : > { %7863 = vmatpush3.bf16.msra.mxu1 %v9299_v5  ;;  %6949 = vmatprep.mubr.f32.mxu1 %v5813_v53  ;;  %v12231_v5 = vld [vmem:[#allocation2_spill] sm:$0xff] }
 0x18e   : > { %7865 = vmatprep.subr.bf16.mxu1 %v9313_v37  ;;  %v5837_v53 = vld [vmem:[%s12095_s2 + $0x2a0] sm:$0xff] }
 0x190   : > { %6950 = vmatmul.mubr.f32.gmra.mrb[14].mxu1 %v5814_v35  ;;  %v9810_v35 = vpack.c.bf16 %v2475_v56, %v2474_v49  ;;  %v12246_v49 = vld [vmem:[#allocation25_spill] sm:$0xff]  ;;  %v5858_v56 = vld [vmem:[%s12095_s2 + $0x340] sm:$0xff] }
 0x191   : > { %7867 = vmatpush3.bf16.msra.mxu1 %v9313_v37  ;;  %6984 = vmatprep.mubr.f32.mxu1 %v5816_v6  ;;  %v12232_v37 = vld [vmem:[#allocation8_spill] sm:$0xff] }
 0x192   : > { %7869 = vmatprep.subr.bf16.mxu1 %v12231_v5  ;;  %v2476_v6 = vld [vmem:[%s12097_s4 + $0x30] sm:$0xff]  ;;  %8005 = vmatprep.subr.bf16.mxu0 %v9810_v35 }
 0x193   : > { %8007 = vmatpush3.bf16.msra.mxu0 %v9810_v35 }
 0x194   : > { %6985 = vmatmul.mubr.f32.vlgmr.msra.gmra.mrb[0].mxu1 %v5817_v58  ;;  %v2477_v58 = vld [vmem:[%s12097_s4 + $0x38] sm:$0xff] }
 0x195   : > { %7871 = vmatpush3.bf16.msra.mxu1 %v12231_v5  ;;  %6987 = vmatprep.mubr.f32.mxu1 %v5818_v24  ;;  %v5838_v5 = vld [vmem:[%s12095_s2 + $0x2a8] sm:$0xff]  ;;  %v5839_v24 = vld [vmem:[%s12095_s2 + $0x2b0] sm:$0xff] }
 0x196   : > { %7873 = vmatprep.subr.bf16.mxu1 %v12232_v37 }
 0x198   : > { %6988 = vmatmul.mubr.f32.gmra.mrb[2].mxu1 %v5819_v9  ;;  %v9828_v9 = vpack.c.bf16 %v2477_v58, %v2476_v6  ;;  %v5862_v6 = vld [vmem:[%s12095_s2 + $0x360] sm:$0xff]  ;;  %v5863_v58 = vld [vmem:[%s12095_s2 + $0x368] sm:$0xff] }
 0x199   : > { %7875 = vmatpush3.bf16.msra.mxu1 %v12232_v37  ;;  %6990 = vmatprep.mubr.f32.mxu1 %v5820_v47  ;;  %v2478_v37 = vld [vmem:[%s12097_s4 + $0x40] sm:$0xff]  ;;  %v2479_v47 = vld [vmem:[%s12097_s4 + $0x48] sm:$0xff] }
 0x19a   : > { %7877 = vmatprep.subr.bf16.mxu1 %v12233_v1  ;;  %8009 = vmatprep.subr.bf16.mxu0 %v9828_v9 }
 0x19b   : > { %8011 = vmatpush3.bf16.msra.mxu0 %v9828_v9 }
 0x19c   : > { %6991 = vmatmul.mubr.f32.gmra.mrb[4].mxu1 %v5821_v23  ;;  %v5840_v23 = vld [vmem:[%s12095_s2 + $0x2b8] sm:$0xff] }
 0x19d   : > { %7879 = vmatpush3.bf16.msra.mxu1 %v12233_v1  ;;  %6993 = vmatprep.mubr.f32.mxu1 %v5822_v20  ;;  %v12239_v1 = vld [vmem:[#allocation18_spill] sm:$0xff] }
 0x19e   : > { %7881 = vmatprep.subr.bf16.mxu1 %v12234_v52  ;;  %v5841_v20 = vld [vmem:[%s12095_s2 + $0x2c0] sm:$0xff] }
 0x1a0   : > { %6994 = vmatmul.mubr.f32.gmra.mrb[6].mxu1 %v5823_v19  ;;  %v9846_v19 = vpack.c.bf16 %v2479_v47, %v2478_v37  ;;  %v5870_v37 = vld [vmem:[%s12095_s2 + $0x398] sm:$0xff]  ;;  %v5872_v47 = vld [vmem:[%s12095_s2 + $0x3a8] sm:$0xff] }
 0x1a1   : > { %7883 = vmatpush3.bf16.msra.mxu1 %v12234_v52  ;;  %6996 = vmatprep.mubr.f32.mxu1 %v5824_v50  ;;  %v5843_v52 = vld [vmem:[%s12095_s2 + $0x2d0] sm:$0xff]  ;;  %v5844_v50 = vld [vmem:[%s12095_s2 + $0x2d8] sm:$0xff] }
 0x1a2   : > { %7885 = vmatprep.subr.bf16.mxu1 %v9347_v4  ;;  %8013 = vmatprep.subr.bf16.mxu0 %v9846_v19 }
 0x1a3   : > { %8015 = vmatpush3.bf16.msra.mxu0 %v9846_v19 }
 0x1a4   : > { %6997 = vmatmul.mubr.f32.gmra.mrb[8].mxu1 %v5825_v55  ;;  %v12240_v55 = vld [vmem:[#allocation19_spill] sm:$0xff] }
 0x1a5   : > { %7887 = vmatpush3.bf16.msra.mxu1 %v9347_v4  ;;  %6999 = vmatprep.mubr.f32.mxu1 %v5826_v12  ;;  %v12235_v4 = vld [vmem:[#allocation14_spill] sm:$0xff] }
 0x1a6   : > { %7889 = vmatprep.subr.bf16.mxu1 %v9349_v8  ;;  %v5845_v12 = vld [vmem:[%s12095_s2 + $0x2e0] sm:$0xff] }
 0x1a8   : > { %7000 = vmatmul.mubr.f32.gmra.mrb[10].mxu1 %v5827_v34  ;;  %v5846_v34 = vld [vmem:[%s12095_s2 + $0x2e8] sm:$0xff] }
 0x1a9   : > { %7891 = vmatpush3.bf16.msra.mxu1 %v9349_v8  ;;  %7002 = vmatprep.mubr.f32.mxu1 %v5828_v54  ;;  %v12236_v8 = vld [vmem:[#allocation15_spill] sm:$0xff]  ;;  %v5847_v54 = vld [vmem:[%s12095_s2 + $0x2f0] sm:$0xff] }
 0x1aa   : > { %7893 = vmatprep.subr.bf16.mxu1 %v12235_v4 }
 0x1ac   : > { %7003 = vmatmul.mubr.f32.gmra.mrb[12].mxu1 %v5829_v26  ;;  %v5848_v26 = vld [vmem:[%s12095_s2 + $0x2f8] sm:$0xff] }
 0x1ad   : > { %7895 = vmatpush3.bf16.msra.mxu1 %v12235_v4  ;;  %7005 = vmatprep.mubr.f32.mxu1 %v5830_v60  ;;  %v12242_v4 = vld [vmem:[#allocation21_spill] sm:$0xff]  ;;  %v5850_v60 = vld [vmem:[%s12095_s2 + $0x300] sm:$0xff] }
 0x1ae   : > { %7897 = vmatprep.subr.bf16.mxu1 %v12236_v8 }
 0x1b0   : > { %7006 = vmatmul.mubr.f32.gmra.mrb[14].mxu1 %v5831_v3  ;;  %v5851_v3 = vld [vmem:[%s12095_s2 + $0x308] sm:$0xff] }
 0x1b1   : > { %7899 = vmatpush3.bf16.msra.mxu1 %v12236_v8  ;;  %7040 = vmatprep.mubr.f32.mxu1 %v5833_v25  ;;  %v12243_v8 = vld [vmem:[#allocation22_spill] sm:$0xff]  ;;  %v5852_v25 = vld [vmem:[%s12095_s2 + $0x310] sm:$0xff] }
 0x1b2   : > { %7901 = vmatprep.subr.bf16.mxu1 %v12237_v39 }
 0x1b4   : > { %7041 = vmatmul.mubr.f32.vlgmr.msra.gmra.mrb[0].mxu1 %v5834_v17  ;;  %v5855_v17 = vld [vmem:[%s12095_s2 + $0x328] sm:$0xff] }
 0x1b5   : > { %7903 = vmatpush3.bf16.msra.mxu1 %v12237_v39  ;;  %7043 = vmatprep.mubr.f32.mxu1 %v5835_v18  ;;  %v5856_v39 = vld [vmem:[%s12095_s2 + $0x330] sm:$0xff]  ;;  %v5857_v18 = vld [vmem:[%s12095_s2 + $0x338] sm:$0xff] }
 0x1b6   : > { %7905 = vmatprep.subr.bf16.mxu1 %v12238_v29 }
 0x1b8   : > { %7044 = vmatmul.mubr.f32.gmra.mrb[2].mxu1 %v5836_v10  ;;  %v5859_v10 = vld [vmem:[%s12095_s2 + $0x348] sm:$0xff] }
 0x1b9   : > { %7907 = vmatpush3.bf16.msra.mxu1 %v12238_v29  ;;  %7046 = vmatprep.mubr.f32.mxu1 %v5837_v53  ;;  %v5860_v29 = vld [vmem:[%s12095_s2 + $0x350] sm:$0xff]  ;;  %v5861_v53 = vld [vmem:[%s12095_s2 + $0x358] sm:$0xff] }
 0x1ba   : > { %7909 = vmatprep.subr.bf16.mxu1 %v9379_v59 }
 0x1bc   : > { %7047 = vmatmul.mubr.f32.gmra.mrb[4].mxu1 %v5838_v5  ;;  %v5865_v5 = vld [vmem:[%s12095_s2 + $0x378] sm:$0xff] }
 0x1bd   : > { %7911 = vmatpush3.bf16.msra.mxu1 %v9379_v59  ;;  %7049 = vmatprep.mubr.f32.mxu1 %v5839_v24  ;;  %v5842_v59 = vld [vmem:[%s12095_s2 + $0x2c8] sm:$0xff] }
 0x1be   : > { %7913 = vmatprep.subr.bf16.mxu1 %v12239_v1  ;;  %v5868_v24 = vld [vmem:[%s12095_s2 + $0x388] sm:$0xff] }
 0x1c0   : > { %7050 = vmatmul.mubr.f32.gmra.mrb[6].mxu1 %v5840_v23  ;;  %v5874_v23 = vld [vmem:[%s12095_s2 + $0x3b8] sm:$0xff] }
 0x1c1   : > { %7915 = vmatpush3.bf16.msra.mxu1 %v12239_v1  ;;  %7052 = vmatprep.mubr.f32.mxu1 %v5841_v20  ;;  %v5876_v1 = vld [vmem:[%s12095_s2 + $0x3c8] sm:$0xff]  ;;  %v5878_v20 = vld [vmem:[%s12095_s2 + $0x3d8] sm:$0xff] }
 0x1c2   : > { %7917 = vmatprep.subr.bf16.mxu1 %v9389_v14 }
 0x1c4   : > { %7053 = vmatmul.mubr.f32.gmra.mrb[8].mxu1 %v5842_v59  ;;  %v5880_v59 = vld [vmem:[%s12095_s2 + $0x3e8] sm:$0xff] }
 0x1c5   : > { %7919 = vmatpush3.bf16.msra.mxu1 %v9389_v14  ;;  %7055 = vmatprep.mubr.f32.mxu1 %v5843_v52  ;;  %v12241_v14 = vld [vmem:[#allocation20_spill] sm:$0xff]  ;;  %v5882_v52 = vld [vmem:[%s12095_s2 + $0x3f8] sm:$0xff] }
 0x1c6   : > { %7921 = vmatprep.subr.bf16.mxu1 %v12240_v55 }
 0x1c8   : > { %7056 = vmatmul.mubr.f32.gmra.mrb[10].mxu1 %v5844_v50  ;;  %v5885_v50 = vld [vmem:[%s12095_s2 + $0x408] sm:$0xff] }
 0x1c9   : > { %7923 = vmatpush3.bf16.msra.mxu1 %v12240_v55  ;;  %7058 = vmatprep.mubr.f32.mxu1 %v5845_v12  ;;  %v5887_v55 = vld [vmem:[%s12095_s2 + $0x418] sm:$0xff]  ;;  %v5888_v12 = vld [vmem:[%s12095_s2 + $0x420] sm:$0xff] }
 0x1ca   : > { %7925 = vmatprep.subr.bf16.mxu1 %v12241_v14 }
 0x1cc   : > { %7059 = vmatmul.mubr.f32.gmra.mrb[12].mxu1 %v5846_v34  ;;  %v5890_v34 = vld [vmem:[%s12095_s2 + $0x430] sm:$0xff] }
 0x1cd   : > { %7927 = vmatpush3.bf16.msra.mxu1 %v12241_v14  ;;  %7061 = vmatprep.mubr.f32.mxu1 %v5847_v54  ;;  %v5891_v14 = vld [vmem:[%s12095_s2 + $0x438] sm:$0xff]  ;;  %v5892_v54 = vld [vmem:[%s12095_s2 + $0x440] sm:$0xff] }
 0x1ce   : > { %7929 = vmatprep.subr.bf16.mxu1 %v12242_v4 }
 0x1d0   : > { %7062 = vmatmul.mubr.f32.gmra.mrb[14].mxu1 %v5848_v26  ;;  %v5893_v26 = vld [vmem:[%s12095_s2 + $0x448] sm:$0xff] }
 0x1d1   : > { %7931 = vmatpush3.bf16.msra.mxu1 %v12242_v4  ;;  %7096 = vmatprep.mubr.f32.mxu1 %v5850_v60  ;;  %v5894_v4 = vld [vmem:[%s12095_s2 + $0x450] sm:$0xff]  ;;  %v5895_v60 = vld [vmem:[%s12095_s2 + $0x458] sm:$0xff] }
 0x1d2   : > { %7933 = vmatprep.subr.bf16.mxu1 %v12243_v8 }
 0x1d4   : > { %7097 = vmatmul.mubr.f32.vlgmr.msra.gmra.mrb[0].mxu1 %v5851_v3  ;;  %v5896_v3 = vld [vmem:[%s12095_s2 + $0x460] sm:$0xff] }
 0x1d5   : > { %7935 = vmatpush3.bf16.msra.mxu1 %v12243_v8  ;;  %7099 = vmatprep.mubr.f32.mxu1 %v5852_v25  ;;  %v5897_v8 = vld [vmem:[%s12095_s2 + $0x468] sm:$0xff]  ;;  %v5898_v25 = vld [vmem:[%s12095_s2 + $0x470] sm:$0xff] }
 0x1d6   : > { %7937 = vmatprep.subr.bf16.mxu1 %v12244_v57 }
 0x1d8   : > { %7100 = vmatmul.mubr.f32.gmra.mrb[2].mxu1 %v5853_v45  ;;  %v5899_v45 = vld [vmem:[%s12095_s2 + $0x478] sm:$0xff] }
 0x1d9   : > { %7939 = vmatpush3.bf16.msra.mxu1 %v12244_v57  ;;  %7102 = vmatprep.mubr.f32.mxu1 %v5854_v46  ;;  %v2480_v57 = vld [vmem:[%s12097_s4 + $0x50] sm:$0xff]  ;;  %v2481_v46 = vld [vmem:[%s12097_s4 + $0x58] sm:$0xff] }
 0x1da   : > { %7941 = vmatprep.subr.bf16.mxu1 %v12245_v0 }
 0x1dc   : > { %7103 = vmatmul.mubr.f32.gmra.mrb[4].mxu1 %v5855_v17  ;;  %v10063_v17 = vpack.c.bf16 %v2481_v46, %v2480_v57 }
 0x1dd   : > { %7943 = vmatpush3.bf16.msra.mxu1 %v12245_v0  ;;  %7105 = vmatprep.mubr.f32.mxu1 %v5856_v39  ;;  %v2373_v0 = vlaneseq }
 0x1de   : > { %7945 = vmatprep.subr.bf16.mxu1 %v12246_v49  ;;  %8017 = vmatprep.subr.bf16.mxu0 %v10063_v17 }
 0x1df   : > { %8019 = vmatpush3.bf16.msra.mxu0 %v10063_v17  ;;  %v2374_v39 = vshrl.u32 %v2373_v0, 7 }
 0x1e0   : > { %7106 = vmatmul.mubr.f32.gmra.mrb[6].mxu1 %v5857_v18  ;;  %8021 = vmatprep.subr.bf16.mxu0 %v9782_v11  ;;  %v8882_v18 = vmov 0.0  }
 0x1e1   : > { %7947 = vmatpush3.bf16.msra.mxu1 %v12246_v49  ;;  %7108 = vmatprep.mubr.f32.mxu1 %v5858_v56  ;;  %vm2390_vm1 = vcmp.eq.s32.totalorder %v2374_v39, 0  ;;  %v2439_v56 = vmul.f32 0.0, %v9031_v27 }
 0x1e2   : > { %7949 = vmatprep.subr.bf16.mxu1 %v9438_v62  ;;  %v10069_v49 = vsel %vm2390_vm1, 1.0, %v8882_v18 }
 0x1e3   : > { %12247 = vst [vmem:[#allocation6_spill] sm:$0xff] %v10069_v49 }
 0x1e4   : > { %7109 = vmatmul.mubr.f32.gmra.mrb[8].mxu1 %v5859_v10 }
 0x1e5   : > { %7951 = vmatpush3.bf16.msra.mxu1 %v9438_v62  ;;  %7111 = vmatprep.mubr.f32.mxu1 %v5860_v29  ;;  %v5864_v62 = vld [vmem:[%s12095_s2 + $0x370] sm:$0xff]  ;;  %v2438_v29 = vmul.f32 %v10069_v49, %v9043_v30 }
 0x1e6   : > { %7953 = vmatprep.subr.bf16.mxu1 %v9443_v42 }
 0x1e8   : > { %7112 = vmatmul.mubr.f32.gmra.mrb[10].mxu1 %v5861_v53 }
 0x1e9   : > { %7955 = vmatpush3.bf16.msra.mxu1 %v9443_v42  ;;  %7114 = vmatprep.mubr.f32.mxu1 %v5862_v6  ;;  %v5867_v42 = vld [vmem:[%s12095_s2 + $0x380] sm:$0xff] }
 0x1ea   : > { %7957 = vmatprep.subr.bf16.mxu1 %v9448_v33 }
 0x1ec   : > { %7115 = vmatmul.mubr.f32.gmra.mrb[12].mxu1 %v5863_v58 }
 0x1ed   : > { %7959 = vmatpush3.bf16.msra.mxu1 %v9448_v33  ;;  %7117 = vmatprep.mubr.f32.mxu1 %v5864_v62  ;;  %v5869_v33 = vld [vmem:[%s12095_s2 + $0x390] sm:$0xff]  ;;  %v2441_v62 = vmul.f32 0.0, %v9069_v43 }
 0x1ee   : > { %7961 = vmatprep.subr.bf16.mxu1 %v9450_v38 }
 0x1f0   : > { %7118 = vmatmul.mubr.f32.gmra.mrb[14].mxu1 %v5865_v5 }
 0x1f1   : > { %7963 = vmatpush3.bf16.msra.mxu1 %v9450_v38  ;;  %7152 = vmatprep.mubr.f32.mxu1 %v5867_v42  ;;  %v5871_v38 = vld [vmem:[%s12095_s2 + $0x3a0] sm:$0xff]  ;;  %v2440_v42 = vmul.f32 0.0, %v9077_v48 }
 0x1f2   : > { %7965 = vmatprep.subr.bf16.mxu1 %v9458_v28 }
 0x1f4   : > { %7153 = vmatmul.mubr.f32.vlgmr.msra.gmra.mrb[0].mxu1 %v5868_v24 }
 0x1f5   : > { %7967 = vmatpush3.bf16.msra.mxu1 %v9458_v28  ;;  %7155 = vmatprep.mubr.f32.mxu1 %v5869_v33  ;;  %v5873_v28 = vld [vmem:[%s12095_s2 + $0x3b0] sm:$0xff]  ;;  %v12248_v33 = vld [vmem:[#allocation3_spill] sm:$0xff] }
 0x1f6   : > { %7969 = vmatprep.subr.bf16.mxu1 %v9466_v63 }
 0x1f8   : > { %7156 = vmatmul.mubr.f32.gmra.mrb[2].mxu1 %v5870_v37  ;;  %v2443_v37 = vmul.f32 0.0, %v12248_v33 }
 0x1f9   : > { %7971 = vmatpush3.bf16.msra.mxu1 %v9466_v63  ;;  %7158 = vmatprep.mubr.f32.mxu1 %v5871_v38  ;;  %v5875_v63 = vld [vmem:[%s12095_s2 + $0x3c0] sm:$0xff]  ;;  %v12249_v38 = vld [vmem:[#allocation4_spill] sm:$0xff] }
 0x1fa   : > { %7973 = vmatprep.subr.bf16.mxu1 %v9471_v22  ;;  %v2442_v48 = vmul.f32 0.0, %v12249_v38 }
 0x1fc   : > { %7159 = vmatmul.mubr.f32.gmra.mrb[4].mxu1 %v5872_v47 }
 0x1fd   : > { %7975 = vmatpush3.bf16.msra.mxu1 %v9471_v22  ;;  %7161 = vmatprep.mubr.f32.mxu1 %v5873_v28  ;;  %v5877_v22 = vld [vmem:[%s12095_s2 + $0x3d0] sm:$0xff] }
 0x1fe   : > { %7977 = vmatprep.subr.bf16.mxu1 %v9476_v2 }
 0x200   : > { %7162 = vmatmul.mubr.f32.gmra.mrb[6].mxu1 %v5874_v23 }
 0x201   : > { %7979 = vmatpush3.bf16.msra.mxu1 %v9476_v2  ;;  %7164 = vmatprep.mubr.f32.mxu1 %v5875_v63  ;;  %v5879_v2 = vld [vmem:[%s12095_s2 + $0x3e0] sm:$0xff] }
 0x202   : > { %7981 = vmatprep.subr.bf16.mxu1 %v9478_v61 }
 0x204   : > { %7165 = vmatmul.mubr.f32.gmra.mrb[8].mxu1 %v5876_v1  ;;  %v12250_v1 = vld [vmem:[#allocation5_spill] sm:$0xff] }
 0x205   : > { %7983 = vmatpush3.bf16.msra.mxu1 %v9478_v61  ;;  %7167 = vmatprep.mubr.f32.mxu1 %v5877_v22  ;;  %v5881_v61 = vld [vmem:[%s12095_s2 + $0x3f0] sm:$0xff]  ;;  %v2444_v22 = vmul.f32 0.0, %v12250_v1 }
 0x206   : > { %7985 = vmatprep.subr.bf16.mxu1 %v9486_v31 }
 0x208   : > { %7168 = vmatmul.mubr.f32.gmra.mrb[10].mxu1 %v5878_v20 }
 0x209   : > { %7987 = vmatpush3.bf16.msra.mxu1 %v9486_v31  ;;  %7170 = vmatprep.mubr.f32.mxu1 %v5879_v2  ;;  %v5884_v31 = vld [vmem:[%s12095_s2 + $0x400] sm:$0xff] }
 0x20a   : > { %7989 = vmatprep.subr.bf16.mxu1 %v9493_v21 }
 0x20c   : > { %7171 = vmatmul.mubr.f32.gmra.mrb[12].mxu1 %v5880_v59 }
 0x20d   : > { %7991 = vmatpush3.bf16.msra.mxu1 %v9493_v21  ;;  %7173 = vmatprep.mubr.f32.mxu1 %v5881_v61  ;;  %v5886_v21 = vld [vmem:[%s12095_s2 + $0x410] sm:$0xff]  ;;  %v2446_v61 = vmul.f32 0.0, %v9179_v51  ;;  %v2448_v51 = vmul.f32 0.0, %v9213_v13 }
 0x20e   : > { %7993 = vmatprep.subr.bf16.mxu1 %v9495_v44 }
 0x210   : > { %7174 = vmatmul.mubr.f32.gmra.mrb[14].mxu1 %v5882_v52 }
 0x211   : > { %7995 = vmatpush3.bf16.msra.mxu1 %v9495_v44  ;;  %7208 = vmatprep.mubr.f32.mxu1 %v5884_v31  ;;  %v5889_v44 = vld [vmem:[%s12095_s2 + $0x428] sm:$0xff] }
 0x214   : > { %7209 = vmatmul.mubr.f32.vlgmr.msra.gmra.mrb[0].mxu1 %v5885_v50 }
 0x215   : > { %7211 = vmatprep.mubr.f32.mxu1 %v5886_v21 }
 0x218   : > { %7212 = vmatmul.mubr.f32.gmra.mrb[2].mxu1 %v5887_v55 }
 0x219   : > { %7214 = vmatprep.mubr.f32.mxu1 %v5888_v12 }
 0x21c   : > { %7215 = vmatmul.mubr.f32.gmra.mrb[4].mxu1 %v5889_v44  ;;  %v12251_v44 = vld [vmem:[#allocation10_spill] sm:$0xff] }
 0x21d   : > { %7217 = vmatprep.mubr.f32.mxu1 %v5890_v34  ;;  %v2450_v13 = vmul.f32 0.0, %v12251_v44 }
 0x220   : > { %7218 = vmatmul.mubr.f32.gmra.mrb[6].mxu1 %v5891_v14 }
 0x221   : > { %7220 = vmatprep.mubr.f32.mxu1 %v5892_v54 }
 0x224   : > { %7221 = vmatmul.mubr.f32.gmra.mrb[8].mxu1 %v5893_v26  ;;  %v2452_v26 = vmul.f32 0.0, %v9281_v36  ;;  %v10171_v36 = vld [vmem:[%s12100_s7] ss:$0 sm:$0xff] }
 0x225   : > { %7223 = vmatprep.mubr.f32.mxu1 %v5894_v4  ;;  %3020 = vrot.lane.b32.xlu0 %v10171_v36, %s8883_s29 }
 0x228   : > { %7224 = vmatmul.mubr.f32.gmra.mrb[10].mxu1 %v5895_v60 }
 0x229   : > { %7226 = vmatprep.mubr.f32.mxu1 %v5896_v3 }
 0x22c   : > { %7227 = vmatmul.mubr.f32.gmra.mrb[12].mxu1 %v5897_v8 }
 0x22d   : > { %7229 = vmatprep.mubr.f32.mxu1 %v5898_v25 }
 0x230   : > { %7230 = vmatmul.mubr.f32.gmra.mrb[14].mxu1 %v5899_v45 }
 0x2e7   : > { %v7210_v10 = vpop.f32.mrb[0].mxu1 }
 0x2e8   : > { %v10074_v53 = vadd.f32 %v7210_v10, %v2439_v56  ;;  %v2278_v6 = vpop.f32.mrb[1].mxu1 }
 0x2e9   : > { %v10076_v58 = vadd.f32 %v2438_v29, %v2278_v6 }
 0x2eb   : > { %v7213_v5 = vpop.f32.mrb[2].mxu1  ;;  %7256 = vmatprep.mubr.msk.f32.mxu0 %vm2482_vm2, %v10076_v58 }
 0x2ec   : > { %v10082_v24 = vadd.f32 %v7213_v5, %v2441_v62  ;;  %v2288_v27 = vpop.f32.mrb[3].mxu1  ;;  %7257 = vmatmul.mubr.msk.f32.vlgmr.msra.gmra.mrb[16].mxu0 %vm2482_vm2, %v10074_v53 }
 0x2ed   : > { %v10086_v30 = vadd.f32 %v2440_v42, %v2288_v27  ;;  %8023 = vmatpush3.bf16.msra.mxu0 %v9782_v11  ;;  %v2445_v11 = vmul.f32 0.0, %v9137_v15  ;;  %v2447_v15 = vmul.f32 0.0, %v9171_v41  ;;  %v2449_v41 = vmul.f32 0.0, %v9205_v7 }
 0x2ee   : > { %8025 = vmatprep.subr.bf16.mxu0 %v9791_v16  ;;  %v2451_v7 = vmul.f32 0.0, %v9239_v40  ;;  %v2453_v40 = vmul.f32 0.0, %v9273_v32  ;;  %v10166_v32 = vld [vmem:[%s12100_s7 + $0x1] ss:$0 sm:$0xff] }
 0x2ef   : > { %v7216_v43 = vpop.f32.mrb[4].mxu1  ;;  %7259 = vmatprep.mubr.msk.f32.mxu0 %vm2482_vm2, %v10086_v30  ;;  %3531 = vrot.lane.b32.xlu1 %v10166_v32, %s8883_s29 }
 0x2f0   : > { %v10094_v47 = vadd.f32 %v7216_v43, %v2443_v37  ;;  %v2298_v28 = vpop.f32.mrb[5].mxu1  ;;  %7260 = vmatmul.mubr.msk.f32.gmra.mrb[18].mxu0 %vm2482_vm2, %v10082_v24 }
 0x2f1   : > { %v10098_v23 = vadd.f32 %v2442_v48, %v2298_v28  ;;  %8027 = vmatpush3.bf16.msra.mxu0 %v9791_v16 }
 0x2f2   : > { %8029 = vmatprep.subr.bf16.mxu0 %v9810_v35 }
 0x2f3   : > { %v7219_v63 = vpop.f32.mrb[6].mxu1  ;;  %7262 = vmatprep.mubr.msk.f32.mxu0 %vm2482_vm2, %v10098_v23 }
 0x2f4   : > { %v10106_v20 = vadd.f32 %v7219_v63, %v2445_v11  ;;  %v2308_v2 = vpop.f32.mrb[7].mxu1  ;;  %7263 = vmatmul.mubr.msk.f32.gmra.mrb[20].mxu0 %vm2482_vm2, %v10094_v47 }
 0x2f5   : > { %v10110_v59 = vadd.f32 %v2444_v22, %v2308_v2  ;;  %8031 = vmatpush3.bf16.msra.mxu0 %v9810_v35 }
 0x2f6   : > { %8033 = vmatprep.subr.bf16.mxu0 %v9828_v9 }
 0x2f7   : > { %v7222_v16 = vpop.f32.mrb[8].mxu1  ;;  %7265 = vmatprep.mubr.msk.f32.mxu0 %vm2482_vm2, %v10110_v59 }
 0x2f8   : > { %v10118_v52 = vadd.f32 %v7222_v16, %v2447_v15  ;;  %v2318_v31 = vpop.f32.mrb[9].mxu1  ;;  %7266 = vmatmul.mubr.msk.f32.gmra.mrb[22].mxu0 %vm2482_vm2, %v10106_v20 }
 0x2f9   : > { %v10122_v50 = vadd.f32 %v2446_v61, %v2318_v31  ;;  %8035 = vmatpush3.bf16.msra.mxu0 %v9828_v9 }
 0x2fa   : > { %8037 = vmatprep.subr.bf16.mxu0 %v9846_v19 }
 0x2fb   : > { %v7225_v35 = vpop.f32.mrb[10].mxu1  ;;  %7268 = vmatprep.mubr.msk.f32.mxu0 %vm2482_vm2, %v10122_v50 }
 0x2fc   : > { %v10130_v21 = vadd.f32 %v7225_v35, %v2449_v41  ;;  %v2328_v55 = vpop.f32.mrb[11].mxu1  ;;  %7269 = vmatmul.mubr.msk.f32.gmra.mrb[24].mxu0 %vm2482_vm2, %v10118_v52 }
 0x2fd   : > { %v10134_v12 = vadd.f32 %v2448_v51, %v2328_v55  ;;  %8039 = vmatpush3.bf16.msra.mxu0 %v9846_v19 }
 0x2fe   : > { %8041 = vmatprep.subr.bf16.mxu0 %v10063_v17 }
 0x2ff   : > { %v7228_v9 = vpop.f32.mrb[12].mxu1  ;;  %7271 = vmatprep.mubr.msk.f32.mxu0 %vm2482_vm2, %v10134_v12 }
 0x300   : > { %v10142_v34 = vadd.f32 %v7228_v9, %v2451_v7  ;;  %v2338_v14 = vpop.f32.mrb[13].mxu1  ;;  %7272 = vmatmul.mubr.msk.f32.gmra.mrb[26].mxu0 %vm2482_vm2, %v10130_v21 }
 0x301   : > { %v10146_v54 = vadd.f32 %v2450_v13, %v2338_v14  ;;  %8043 = vmatpush3.bf16.msra.mxu0 %v10063_v17 }
 0x303   : > { %v7231_v19 = vpop.f32.mrb[14].mxu1  ;;  %7274 = vmatprep.mubr.msk.f32.mxu0 %vm2482_vm2, %v10146_v54 }
 0x304   : > { %v10153_v4 = vadd.f32 %v7231_v19, %v2453_v40  ;;  %v2348_v60 = vpop.f32.mrb[15].mxu1  ;;  %7275 = vmatmul.mubr.msk.f32.gmra.mrb[28].mxu0 %vm2482_vm2, %v10142_v34 }
 0x305   : > { %v10157_v3 = vadd.f32 %v2452_v26, %v2348_v60 }
 0x307   : > { %7277 = vmatprep.mubr.msk.f32.mxu0 %vm2482_vm2, %v10157_v3 }
 0x308   : > { %7278 = vmatmul.mubr.msk.f32.gmra.mrb[30].mxu0 %vm2482_vm2, %v10153_v4 }
 0x3bf   : > { %v7258_v8 = vpop.f32.mrb[16].mxu0 }
 0x3c0   : > { %v10178_v25 = vsub.f32 %v10074_v53, %v7258_v8  ;;  %v2597_v45 = vpop.f32.mrb[17].mxu0 }
 0x3c1   : > { %v10181_v57 = vsub.f32 %v10076_v58, %v2597_v45 }
 0x3c2   : > { %v2693_v39 = vmul.f32 %v10178_v25, %v10178_v25 }
 0x3c3   : > { %v2692_v46 = vmul.f32 %v10181_v57, %v10181_v57  ;;  %v7261_v17 = vpop.f32.mrb[18].mxu0 }
 0x3c4   : > { %v10188_v18 = vsub.f32 %v10082_v24, %v7261_v17  ;;  %v2607_v56 = vpop.f32.mrb[19].mxu0 }
 0x3c5   : > { %v10191_v10 = vsub.f32 %v10086_v30, %v2607_v56  ;;  %7304 = vmatprep.mubr.msk.f32.mxu0 %vm2482_vm2, %v2692_v46  ;;  %v10276_v46 = vld [vmem:[%s12098_s5] ss:$0 sm:$0xff] }
 0x3c6   : > { %7305 = vmatmul.mubr.msk.f32.vlgmr.msra.gmra.mrb[32].mxu0 %vm2482_vm2, %v2693_v39  ;;  %v2695_v6 = vmul.f32 %v10188_v18, %v10188_v18 }
 0x3c7   : > { %v2694_v29 = vmul.f32 %v10191_v10, %v10191_v10  ;;  %v7264_v53 = vpop.f32.mrb[20].mxu0 }
 0x3c8   : > { %v10200_v58 = vsub.f32 %v10094_v47, %v7264_v53  ;;  %v2617_v62 = vpop.f32.mrb[21].mxu0 }
 0x3c9   : > { %v10203_v5 = vsub.f32 %v10098_v23, %v2617_v62  ;;  %7307 = vmatprep.mubr.msk.f32.mxu0 %vm2482_vm2, %v2694_v29 }
 0x3ca   : > { %7308 = vmatmul.mubr.msk.f32.gmra.mrb[34].mxu0 %vm2482_vm2, %v2695_v6  ;;  %v2697_v27 = vmul.f32 %v10200_v58, %v10200_v58  ;;  %v10282_v6 = vld [vmem:[%s12099_s6] ss:$0 sm:$0xff] }
 0x3cb   : > { %v2696_v42 = vmul.f32 %v10203_v5, %v10203_v5  ;;  %v7267_v24 = vpop.f32.mrb[22].mxu0 }
 0x3cc   : > { %v10212_v30 = vsub.f32 %v10106_v20, %v7267_v24  ;;  %v2627_v33 = vpop.f32.mrb[23].mxu0 }
 0x3cd   : > { %v10215_v37 = vsub.f32 %v10110_v59, %v2627_v33  ;;  %7310 = vmatprep.mubr.msk.f32.mxu0 %vm2482_vm2, %v2696_v42 }
 0x3ce   : > { %7311 = vmatmul.mubr.msk.f32.gmra.mrb[36].mxu0 %vm2482_vm2, %v2697_v27  ;;  %v2699_v48 = vmul.f32 %v10212_v30, %v10212_v30 }
 0x3cf   : > { %v2698_v43 = vmul.f32 %v10215_v37, %v10215_v37  ;;  %v7270_v38 = vpop.f32.mrb[24].mxu0 }
 0x3d0   : > { %v10224_v47 = vsub.f32 %v10118_v52, %v7270_v38  ;;  %v2637_v28 = vpop.f32.mrb[25].mxu0 }
 0x3d1   : > { %v10227_v23 = vsub.f32 %v10122_v50, %v2637_v28  ;;  %7313 = vmatprep.mubr.msk.f32.mxu0 %vm2482_vm2, %v2698_v43 }
 0x3d2   : > { %7314 = vmatmul.mubr.msk.f32.gmra.mrb[38].mxu0 %vm2482_vm2, %v2699_v48  ;;  %v2701_v1 = vmul.f32 %v10224_v47, %v10224_v47  ;;  %v10287_v48 = vpop.permute.xlu0 %3020 }
 0x3d3   : > { %v2700_v11 = vmul.f32 %v10227_v23, %v10227_v23  ;;  %v7273_v63 = vpop.f32.mrb[26].mxu0 }
 0x3d4   : > { %v10236_v22 = vsub.f32 %v10130_v21, %v7273_v63  ;;  %v2647_v20 = vpop.f32.mrb[27].mxu0 }
 0x3d5   : > { %v10239_v2 = vsub.f32 %v10134_v12, %v2647_v20  ;;  %7316 = vmatprep.mubr.msk.f32.mxu0 %vm2482_vm2, %v2700_v11 }
 0x3d6   : > { %7317 = vmatmul.mubr.msk.f32.gmra.mrb[40].mxu0 %vm2482_vm2, %v2701_v1  ;;  %v2703_v16 = vmul.f32 %v10236_v22, %v10236_v22 }
 0x3d7   : > { %v2702_v59 = vmul.f32 %v10239_v2, %v10239_v2  ;;  %v7276_v15 = vpop.f32.mrb[28].mxu0 }
 0x3d8   : > { %v10248_v61 = vsub.f32 %v10142_v34, %v7276_v15  ;;  %v2657_v52 = vpop.f32.mrb[29].mxu0 }
 0x3d9   : > { %v10251_v31 = vsub.f32 %v10146_v54, %v2657_v52  ;;  %7319 = vmatprep.mubr.msk.f32.mxu0 %vm2482_vm2, %v2702_v59 }
 0x3da   : > { %7320 = vmatmul.mubr.msk.f32.gmra.mrb[42].mxu0 %vm2482_vm2, %v2703_v16  ;;  %v2705_v35 = vmul.f32 %v10248_v61, %v10248_v61 }
 0x3db   : > { %v2704_v50 = vmul.f32 %v10251_v31, %v10251_v31  ;;  %v7279_v41 = vpop.f32.mrb[30].mxu0 }
 0x3dc   : > { %v10260_v51 = vsub.f32 %v10153_v4, %v7279_v41  ;;  %v2667_v21 = vpop.f32.mrb[31].mxu0 }
 0x3dd   : > { %v10263_v55 = vsub.f32 %v10157_v3, %v2667_v21  ;;  %7322 = vmatprep.mubr.msk.f32.mxu0 %vm2482_vm2, %v2704_v50 }
 0x3de   : > { %7323 = vmatmul.mubr.msk.f32.gmra.mrb[44].mxu0 %vm2482_vm2, %v2705_v35  ;;  %v2707_v7 = vmul.f32 %v10260_v51, %v10260_v51 }
 0x3df   : > { %v2706_v12 = vmul.f32 %v10263_v55, %v10263_v55 }
 0x3e1   : > { %7325 = vmatprep.mubr.msk.f32.mxu0 %vm2482_vm2, %v2706_v12 }
 0x3e2   : > { %7326 = vmatmul.mubr.msk.f32.gmra.mrb[46].mxu0 %vm2482_vm2, %v2707_v7 }
 0x499   : > { %v7306_v9 = vpop.f32.mrb[32].mxu0 }
 0x49a   : > { %v2828_v44 = vadd.f32 1e-05, %v7306_v9  ;;  %v2822_v13 = vpop.f32.mrb[33].mxu0 }
 0x49b   : > { %v2823_v34 = vadd.f32 1e-05, %v2822_v13 }
 0x49c   : > { %8584 = vrsqrt.f32 %v2828_v44 }
 0x49d   : > { %8586 = vrsqrt.f32 %v2823_v34  ;;  %v7309_v14 = vpop.f32.mrb[34].mxu0 }
 0x49e   : > { %v2838_v54 = vadd.f32 1e-05, %v7309_v14  ;;  %v2832_v40 = vpop.f32.mrb[35].mxu0 }
 0x49f   : > { %v2833_v19 = vadd.f32 1e-05, %v2832_v40 }
 0x4a0   : > { %8588 = vrsqrt.f32 %v2838_v54 }
 0x4a1   : > { %8590 = vrsqrt.f32 %v2833_v19  ;;  %v7312_v26 = vpop.f32.mrb[36].mxu0 }
 0x4a2   : > { %v2848_v4 = vadd.f32 1e-05, %v7312_v26  ;;  %v2842_v60 = vpop.f32.mrb[37].mxu0 }
 0x4a3   : > { %v2843_v3 = vadd.f32 1e-05, %v2842_v60 }
 0x4a4   : > { %8592 = vrsqrt.f32 %v2848_v4 }
 0x4a5   : > { %8594 = vrsqrt.f32 %v2843_v3  ;;  %v7315_v8 = vpop.f32.mrb[38].mxu0 }
 0x4a6   : > { %v8585_v45 = vpop.eup %8584  ;;  %v2858_v17 = vadd.f32 1e-05, %v7315_v8  ;;  %v2852_v39 = vpop.f32.mrb[39].mxu0 }
 0x4a7   : > { %v8587_v56 = vpop.eup %8586  ;;  %v2918_v29 = vmul.f32 %v8585_v45, %v10178_v25  ;;  %v2853_v53 = vadd.f32 1e-05, %v2852_v39 }
 0x4a8   : > { %v2917_v62 = vmul.f32 %v8587_v56, %v10181_v57  ;;  %8596 = vrsqrt.f32 %v2858_v17 }
 0x4a9   : > { %v2941_v42 = vmul.f32 %v10276_v46, %v2918_v29  ;;  %8598 = vrsqrt.f32 %v2853_v53  ;;  %v7318_v24 = vpop.f32.mrb[40].mxu0 }
 0x4aa   : > { %v8589_v27 = vpop.eup %8588  ;;  %v2940_v33 = vmul.f32 %v10276_v46, %v2917_v62  ;;  %v2868_v43 = vadd.f32 1e-05, %v7318_v24  ;;  %v2862_v38 = vpop.f32.mrb[41].mxu0 }
 0x4ab   : > { %v8591_v25 = vpop.eup %8590  ;;  %v10290_v28 = vadd.f32 %v10282_v6, %v2941_v42  ;;  %v2920_v11 = vmul.f32 %v8589_v27, %v10188_v18  ;;  %v2863_v63 = vadd.f32 1e-05, %v2862_v38 }
 0x4ac   : > { %v10294_v57 = vadd.f32 %v10282_v6, %v2940_v33  ;;  %v2919_v1 = vmul.f32 %v8591_v25, %v10191_v10  ;;  %8600 = vrsqrt.f32 %v2868_v43 }
 0x4ad   : > { %12252 = vst [vmem:[#allocation7_spill] sm:$0xff] %v10290_v28  ;;  %v2943_v20 = vmul.f32 %v10276_v46, %v2920_v11  ;;  %8602 = vrsqrt.f32 %v2863_v63  ;;  %v7321_v59 = vpop.f32.mrb[42].mxu0  ;;  %v3024_v15 = vmul.f32 %v10287_v48, %v10290_v28 }
 0x4ae   : > { %12253 = vst [vmem:[#allocation9_spill] sm:$0xff] %v10294_v57  ;;  %v8593_v16 = vpop.eup %8592  ;;  %v2942_v52 = vmul.f32 %v10276_v46, %v2919_v1  ;;  %v2878_v50 = vadd.f32 1e-05, %v7321_v59  ;;  %v2872_v41 = vpop.f32.mrb[43].mxu0  ;;  %v10302_v18 = vmul.f32 0.35355338, %v10294_v57  ;;  %v3023_v35 = vmul.f32 %v10287_v48, %v10294_v57 }
 0x4af   : > { %v8595_v10 = vpop.eup %8594  ;;  %v10307_v21 = vadd.f32 %v10282_v6, %v2943_v20  ;;  %v2922_v12 = vmul.f32 %v8593_v16, %v10200_v58  ;;  %v2873_v7 = vadd.f32 1e-05, %v2872_v41 }
 0x4b0   : > { %12254 = vst [vmem:[#allocation11_spill] sm:$0xff] %v10302_v18  ;;  %v10311_v9 = vadd.f32 %v10282_v6, %v2942_v52  ;;  %v2921_v44 = vmul.f32 %v8595_v10, %v10203_v5  ;;  %8604 = vrsqrt.f32 %v2878_v50  ;;  %7360 = vmatprep.mubr.msk.f32.mxu0 %vm421_vm0, %v10302_v18  ;;  %7624 = vmatprep.mubr.msk.f32.mxu1 %vm421_vm0, %v10302_v18 }
 0x4b1   : > { %12255 = vst [vmem:[#allocation2_spill] sm:$0xff] %v10307_v21  ;;  %v8424_v13 = vpack.i.bf16 %v3024_v15, %v3023_v35  ;;  %v2945_v34 = vmul.f32 %v10276_v46, %v2922_v12  ;;  %8606 = vrsqrt.f32 %v2873_v7  ;;  %v7324_v14 = vpop.f32.mrb[44].mxu0  ;;  %v3026_v58 = vmul.f32 %v10287_v48, %v10307_v21 }
 0x4b2   : > { %12256 = vst [vmem:[#allocation8_spill] sm:$0xff] %v10311_v9  ;;  %v8597_v54 = vpop.eup %8596  ;;  %v2944_v40 = vmul.f32 %v10276_v46, %v2921_v44  ;;  %v2888_v19 = vadd.f32 1e-05, %v7324_v14  ;;  %v2882_v5 = vpop.f32.mrb[45].mxu0  ;;  %v3025_v26 = vmul.f32 %v10287_v48, %v10311_v9 }
 0x4b3   : > { %8425 = vrot.lane.b32.xlu0 %v8424_v13, %s8884_s15  ;;  %v8599_v4 = vpop.eup %8598  ;;  %v10326_v60 = vadd.f32 %v10282_v6, %v2945_v34  ;;  %v2924_v3 = vmul.f32 %v8597_v54, %v10212_v30  ;;  %v2883_v8 = vadd.f32 1e-05, %v2882_v5 }
 0x4b4   : > { %v10330_v45 = vadd.f32 %v10282_v6, %v2944_v40  ;;  %v2923_v17 = vmul.f32 %v8599_v4, %v10215_v37  ;;  %8608 = vrsqrt.f32 %v2888_v19  ;;  %v8429_v39 = vpack.i.bf16 %v3026_v58, %v3025_v26 }
 0x4b5   : > { %v2947_v56 = vmul.f32 %v10276_v46, %v2924_v3  ;;  %8610 = vrsqrt.f32 %v2883_v8  ;;  %v7327_v29 = vpop.f32.mrb[46].mxu0  ;;  %v3028_v53 = vmul.f32 %v10287_v48, %v10326_v60  ;;  %v3532_v8 = vpop.permute.xlu1 %3531 }
 0x4b6   : > { %v8601_v62 = vpop.eup %8600  ;;  %v2946_v42 = vmul.f32 %v10276_v46, %v2923_v17  ;;  %v2898_v24 = vadd.f32 1e-05, %v7327_v29  ;;  %8430 = vrot.lane.b32.xlu1 %v8429_v39, %s8884_s15  ;;  %v2892_v30 = vpop.f32.mrb[47].mxu0  ;;  %v3027_v27 = vmul.f32 %v10287_v48, %v10330_v45 }
 0x4b7   : > { %v8603_v37 = vpop.eup %8602  ;;  %v10341_v33 = vadd.f32 %v10282_v6, %v2947_v56  ;;  %v2926_v43 = vmul.f32 %v8601_v62, %v10224_v47  ;;  %v2893_v38 = vadd.f32 1e-05, %v2892_v30 }
 0x4b8   : > { %v10345_v25 = vadd.f32 %v10282_v6, %v2946_v42  ;;  %v2925_v11 = vmul.f32 %v8603_v37, %v10227_v23  ;;  %8612 = vrsqrt.f32 %v2898_v24  ;;  %v8434_v63 = vpack.i.bf16 %v3028_v53, %v3027_v27 }
 0x4b9   : > { %12257 = vst [vmem:[#allocation12_spill] sm:$0xff] %v10341_v33  ;;  %v2949_v1 = vmul.f32 %v10276_v46, %v2926_v43  ;;  %8614 = vrsqrt.f32 %v2893_v38  ;;  %v3030_v20 = vmul.f32 %v10287_v48, %v10341_v33  ;;  %v3534_v24 = vmul.f32 %v3532_v8, %v10294_v57 }
 0x4ba   : > { %12258 = vst [vmem:[#allocation13_spill] sm:$0xff] %v10345_v25  ;;  %v8605_v59 = vpop.eup %8604  ;;  %v2948_v15 = vmul.f32 %v10276_v46, %v2925_v11  ;;  %8435 = vrot.lane.b32.xlu0 %v8434_v63, %s8884_s15  ;;  %v3029_v47 = vmul.f32 %v10287_v48, %v10345_v25  ;;  %v3536_v38 = vmul.f32 %v3532_v8, %v10311_v9 }
 0x4bb   : > { %v8607_v16 = vpop.eup %8606  ;;  %v10356_v52 = vadd.f32 %v10282_v6, %v2949_v1  ;;  %v2928_v23 = vmul.f32 %v8605_v59, %v10236_v22  ;;  %v3538_v63 = vmul.f32 %v3532_v8, %v10330_v45  ;;  %v3539_v1 = vmul.f32 %v3532_v8, %v10326_v60 }
 0x4bc   : > { %v10360_v50 = vadd.f32 %v10282_v6, %v2948_v15  ;;  %v2927_v41 = vmul.f32 %v8607_v16, %v10239_v2  ;;  %v8439_v35 = vpack.i.bf16 %v3030_v20, %v3029_v47  ;;  %v3541_v15 = vmul.f32 %v3532_v8, %v10341_v33 }
 0x4bd   : > { %v2951_v10 = vmul.f32 %v10276_v46, %v2928_v23  ;;  %v3032_v12 = vmul.f32 %v10287_v48, %v10356_v52  ;;  %v3543_v59 = vmul.f32 %v3532_v8, %v10356_v52  ;;  %v8474_v47 = vpack.i.bf16 %v3539_v1, %v3538_v63 }
 0x4be   : > { %v8609_v7 = vpop.eup %8608  ;;  %v2950_v44 = vmul.f32 %v10276_v46, %v2927_v41  ;;  %8440 = vrot.lane.b32.xlu1 %v8439_v35, %s8884_s15  ;;  %v3031_v13 = vmul.f32 %v10287_v48, %v10360_v50  ;;  %v3542_v20 = vmul.f32 %v3532_v8, %v10360_v50 }
 0x4bf   : > { %v8611_v22 = vpop.eup %8610  ;;  %v10371_v34 = vadd.f32 %v10282_v6, %v2951_v10  ;;  %v2930_v2 = vmul.f32 %v8609_v7, %v10248_v61 }
 0x4c0   : > { %v10375_v14 = vadd.f32 %v10282_v6, %v2950_v44  ;;  %v2929_v58 = vmul.f32 %v8611_v22, %v10251_v31  ;;  %v8444_v54 = vpack.i.bf16 %v3032_v12, %v3031_v13  ;;  %v8484_v23 = vpack.i.bf16 %v3543_v59, %v3542_v20 }
 0x4c1   : > { %v2953_v40 = vmul.f32 %v10276_v46, %v2930_v2  ;;  %v3034_v19 = vmul.f32 %v10287_v48, %v10371_v34  ;;  %v3545_v7 = vmul.f32 %v3532_v8, %v10371_v34 }
 0x4c2   : > { %v8613_v5 = vpop.eup %8612  ;;  %v2952_v26 = vmul.f32 %v10276_v46, %v2929_v58  ;;  %8445 = vrot.lane.b32.xlu0 %v8444_v54, %s8884_s15  ;;  %v3033_v4 = vmul.f32 %v10287_v48, %v10375_v14  ;;  %v3544_v12 = vmul.f32 %v3532_v8, %v10375_v14 }
 0x4c3   : > { %v8615_v61 = vpop.eup %8614  ;;  %v10386_v3 = vadd.f32 %v10282_v6, %v2953_v40  ;;  %v2932_v31 = vmul.f32 %v8613_v5, %v10260_v51  ;;  %v12262_v5 = vmov 0 }
 0x4c4   : > { %v10390_v17 = vadd.f32 %v10282_v6, %v2952_v26  ;;  %v2931_v39 = vmul.f32 %v8615_v61, %v10263_v55  ;;  %v8449_v56 = vpack.i.bf16 %v3034_v19, %v3033_v4  ;;  %v3535_v55 = vmul.f32 %v3532_v8, %v10290_v28 }
 0x4c5   : > { %12259 = vst [vmem:[#allocation14_spill] sm:$0xff] %v10386_v3  ;;  %v2955_v29 = vmul.f32 %v10276_v46, %v2932_v31  ;;  %v3036_v53 = vmul.f32 %v10287_v48, %v10386_v3  ;;  %v3547_v10 = vmul.f32 %v3532_v8, %v10386_v3  ;;  %v8489_v13 = vpack.i.bf16 %v3545_v7, %v3544_v12 }
 0x4c6   : > { %v2954_v62 = vmul.f32 %v10276_v46, %v2931_v39  ;;  %8450 = vrot.lane.b32.xlu1 %v8449_v56, %s8884_s15  ;;  %v3035_v42 = vmul.f32 %v10287_v48, %v10390_v17  ;;  %v8464_v43 = vpack.i.bf16 %v3535_v55, %v3534_v24  ;;  %v3546_v35 = vmul.f32 %v3532_v8, %v10390_v17 }
 0x4c7   : > { %v10401_v51 = vadd.f32 %v10282_v6, %v2955_v29  ;;  %v12263_v5 = vsel %vm10442_vm3, 4294967295, %v12262_v5 }
 0x4c8   : > { %v10406_v30 = vadd.f32 %v10282_v6, %v2954_v62  ;;  %v8454_v27 = vpack.i.bf16 %v3036_v53, %v3035_v42  ;;  %v3537_v6 = vmul.f32 %v3532_v8, %v10307_v21  ;;  %v8494_v44 = vpack.i.bf16 %v3547_v10, %v3546_v35  ;;  %12264 = vst [vmem:[#allocation17_spill] sm:$0xff] %v12263_v5 }
 0x4c9   : > { %12260 = vst [vmem:[#allocation15_spill] sm:$0xff] %v10401_v51  ;;  %v3038_v37 = vmul.f32 %v10287_v48, %v10401_v51  ;;  %v3549_v2 = vmul.f32 %v3532_v8, %v10401_v51 }
 0x4ca   : > { %12261 = vst [vmem:[#allocation16_spill] sm:$0xff] %v10406_v30  ;;  %8455 = vrot.lane.b32.xlu0 %v8454_v27, %s8884_s15  ;;  %v3037_v46 = vmul.f32 %v10287_v48, %v10406_v30  ;;  %v3540_v48 = vmul.f32 %v3532_v8, %v10345_v25  ;;  %v8469_v16 = vpack.i.bf16 %v3537_v6, %v3536_v38 }
 0x4cb   : > { %v3548_v22 = vmul.f32 %v3532_v8, %v10406_v30 }
 0x4cc   : > { %v8459_v11 = vpack.i.bf16 %v3038_v37, %v3037_v46  ;;  %v8479_v41 = vpack.i.bf16 %v3541_v15, %v3540_v48 }
 0x4cd   : > { %v8499_v58 = vpack.i.bf16 %v3549_v2, %v3548_v22 }
 0x4ce   : > { %8465 = vrot.lane.b32.xlu0 %v8464_v43, %s8884_s15  ;;  %8460 = vrot.lane.b32.xlu1 %v8459_v11, %s8884_s15 }
 0x4d2   : > { %8475 = vrot.lane.b32.xlu0 %v8474_v47, %s8884_s15  ;;  %8470 = vrot.lane.b32.xlu1 %v8469_v16, %s8884_s15 }
 0x4d6   : > { %8485 = vrot.lane.b32.xlu0 %v8484_v23, %s8884_s15  ;;  %8480 = vrot.lane.b32.xlu1 %v8479_v41, %s8884_s15 }
 0x4da   : > { %8495 = vrot.lane.b32.xlu0 %v8494_v44, %s8884_s15  ;;  %8490 = vrot.lane.b32.xlu1 %v8489_v13, %s8884_s15 }
 0x4de   : > { %3498 = vrot.lane.b32.xlu0 %v10171_v36, %s8885_s16  ;;  %8500 = vrot.lane.b32.xlu1 %v8499_v58, %s8884_s15 }
 0x4e2   : > { %3960 = vrot.lane.b32.xlu1 %v10166_v32, %s8885_s16 }
 0x525   : > { %v8426_v54 = vpop.permute.xlu0 %8425 }
 0x526   : > { %v8428_v40 = vunpack.i.h.bf16 %v8426_v54  ;;  %v8427_v19 = vunpack.i.l.bf16 %v8426_v54 }
 0x528   : > { %v8044_v26 = vpack.c.bf16 %v8428_v40, %v8427_v19  ;;  %v8431_v4 = vpop.permute.xlu1 %8430 }
 0x529   : > { %v8433_v61 = vunpack.i.h.bf16 %v8431_v4  ;;  %v8432_v31 = vunpack.i.l.bf16 %v8431_v4 }
 0x52a   : > { %8046 = vmatprep.subr.msk.bf16.mxu0 %vm10442_vm3, %v8044_v26 }
 0x52b   : > { %8049 = vmatpush3.bf16.xpose.msk.msra.mxu0 %vm10442_vm3, %v8044_v26  ;;  %v8050_v32 = vpack.c.bf16 %v8433_v61, %v8432_v31  ;;  %v6018_v61 = vld [vmem:[%s12100_s7 + $0x2] ss:$0 sm:$0xff] }
 0x52c   : > { %v8436_v36 = vpop.permute.xlu0 %8435 }
 0x52d   : > { %v8438_v8 = vunpack.i.h.bf16 %v8436_v36  ;;  %v8437_v39 = vunpack.i.l.bf16 %v8436_v36  ;;  %8052 = vmatprep.subr.msk.bf16.mxu0 %vm10442_vm3, %v8050_v32 }
 0x52f   : > { %v8056_v56 = vpack.c.bf16 %v8438_v8, %v8437_v39 }
 0x530   : > { %v8441_v29 = vpop.permute.xlu1 %8440 }
 0x531   : > { %v8443_v53 = vunpack.i.h.bf16 %v8441_v29  ;;  %v8442_v62 = vunpack.i.l.bf16 %v8441_v29 }
 0x533   : > { %8055 = vmatpush3.bf16.xpose.msk.msra.mxu0 %vm10442_vm3, %v8050_v32  ;;  %v8062_v42 = vpack.c.bf16 %v8443_v53, %v8442_v62 }
 0x534   : > { %8058 = vmatprep.subr.msk.bf16.mxu0 %vm10442_vm3, %v8056_v56  ;;  %v8446_v24 = vpop.permute.xlu0 %8445 }
 0x535   : > { %v8448_v27 = vunpack.i.h.bf16 %v8446_v24  ;;  %v8447_v37 = vunpack.i.l.bf16 %v8446_v24 }
 0x537   : > { %v8068_v43 = vpack.c.bf16 %v8448_v27, %v8447_v37 }
 0x538   : > { %v8451_v55 = vpop.permute.xlu1 %8450 }
 0x539   : > { %v8453_v63 = vunpack.i.h.bf16 %v8451_v55  ;;  %v8452_v1 = vunpack.i.l.bf16 %v8451_v55 }
 0x53b   : > { %8061 = vmatpush3.bf16.xpose.msk.msra.mxu0 %vm10442_vm3, %v8056_v56  ;;  %v8074_v59 = vpack.c.bf16 %v8453_v63, %v8452_v1 }
 0x53c   : > { %8064 = vmatprep.subr.msk.bf16.mxu0 %vm10442_vm3, %v8062_v42  ;;  %v8456_v38 = vpop.permute.xlu0 %8455 }
 0x53d   : > { %v8458_v15 = vunpack.i.h.bf16 %v8456_v38  ;;  %v8457_v47 = vunpack.i.l.bf16 %v8456_v38 }
 0x53f   : > { %v8080_v41 = vpack.c.bf16 %v8458_v15, %v8457_v47 }
 0x540   : > { %v8461_v46 = vpop.permute.xlu1 %8460  ;;  %v8466_v6 = vpop.permute.xlu0 %8465 }
 0x541   : > { %v8463_v10 = vunpack.i.h.bf16 %v8461_v46  ;;  %v8462_v12 = vunpack.i.l.bf16 %v8461_v46  ;;  %v8468_v56 = vunpack.i.h.bf16 %v8466_v6  ;;  %v8467_v29 = vunpack.i.l.bf16 %v8466_v6 }
 0x543   : > { %8067 = vmatpush3.bf16.xpose.msk.msra.mxu0 %vm10442_vm3, %v8062_v42  ;;  %v8086_v26 = vpack.c.bf16 %v8463_v10, %v8462_v12  ;;  %v8092_v46 = vpack.c.bf16 %v8468_v56, %v8467_v29  ;;  %v10597_v29 = vmul.f32 0.35355338, %v10326_v60 }
 0x544   : > { %8070 = vmatprep.subr.msk.bf16.mxu0 %vm10442_vm3, %v8068_v43  ;;  %v10464_v11 = vpop.permute.xlu1 %8470  ;;  %v10474_v16 = vpop.permute.xlu0 %8475 }
 0x545   : > { %v8473_v15 = vunpack.i.h.bf16 %v10464_v11  ;;  %v8472_v47 = vunpack.i.l.bf16 %v10464_v11  ;;  %v6067_v11 = vld [vmem:[%s12100_s7 + $0x3] ss:$0 sm:$0xff]  ;;  %12269 = vst [vmem:[#allocation22_spill] sm:$0xff] %v10597_v29 }
 0x548   : > { %v10466_v20 = vpop.permute.xlu1 %8480  ;;  %v10480_v35 = vpop.permute.xlu0 %8485 }
 0x54b   : > { %8073 = vmatpush3.bf16.xpose.msk.msra.mxu0 %vm10442_vm3, %v8068_v43 }
 0x54c   : > { %8076 = vmatprep.subr.msk.bf16.mxu0 %vm10442_vm3, %v8074_v59  ;;  %v10472_v48 = vpop.permute.xlu1 %8490  ;;  %v10498_v4 = vpop.permute.xlu0 %8495 }
 0x550   : > { %v10476_v23 = vpop.permute.xlu1 %8500  ;;  %v10521_v42 = vpop.permute.xlu0 %3498 }
 0x551   : > { %v3503_v43 = vmul.f32 %v10521_v42, %v10311_v9  ;;  %v3504_v38 = vmul.f32 %v10521_v42, %v10307_v21  ;;  %v3501_v6 = vmul.f32 %v10521_v42, %v10294_v57  ;;  %v3505_v12 = vmul.f32 %v10521_v42, %v10330_v45 }
 0x552   : > { %v3510_v56 = vmul.f32 %v10521_v42, %v10356_v52 }
 0x553   : > { %8079 = vmatpush3.bf16.xpose.msk.msra.mxu0 %vm10442_vm3, %v8074_v59  ;;  %v3502_v59 = vmul.f32 %v10521_v42, %v10290_v28 }
 0x554   : > { %8082 = vmatprep.subr.msk.bf16.mxu0 %vm10442_vm3, %v8080_v41  ;;  %v10484_v7 = vpop.permute.xlu1 %3960 }
 0x555   : > { %v3965_v44 = vmul.f32 %v10484_v7, %v10311_v9  ;;  %v3966_v13 = vmul.f32 %v10484_v7, %v10307_v21  ;;  %v3963_v22 = vmul.f32 %v10484_v7, %v10294_v57  ;;  %v3964_v2 = vmul.f32 %v10484_v7, %v10290_v28 }
 0x556   : > { %v3967_v40 = vmul.f32 %v10484_v7, %v10330_v45  ;;  %v3968_v19 = vmul.f32 %v10484_v7, %v10326_v60  ;;  %v3969_v31 = vmul.f32 %v10484_v7, %v10345_v25  ;;  %v3970_v32 = vmul.f32 %v10484_v7, %v10341_v33 }
 0x557   : > { %v3980_v58 = vpack.c.bf16 %v3966_v13, %v3965_v44  ;;  %v3979_v54 = vpack.c.bf16 %v3964_v2, %v3963_v22  ;;  %v3971_v8 = vmul.f32 %v10484_v7, %v10360_v50  ;;  %v3972_v39 = vmul.f32 %v10484_v7, %v10356_v52 }
 0x558   : > { %v3981_v36 = vpack.c.bf16 %v3968_v19, %v3967_v40  ;;  %v3982_v53 = vpack.c.bf16 %v3970_v32, %v3969_v31  ;;  %v3973_v62 = vmul.f32 %v10484_v7, %v10375_v14  ;;  %v3974_v55 = vmul.f32 %v10484_v7, %v10371_v34 }
 0x559   : > { %3997 = vrot.lane.b32.xlu0 %v3980_v58, %s8885_s16  ;;  %3995 = vrot.lane.b32.xlu1 %v3979_v54, %s8885_s16  ;;  %v3983_v24 = vpack.c.bf16 %v3972_v39, %v3971_v8  ;;  %v3975_v27 = vmul.f32 %v10484_v7, %v10390_v17  ;;  %v3976_v37 = vmul.f32 %v10484_v7, %v10386_v3  ;;  %v10552_v13 = vmul.f32 0.35355338, %v10290_v28 }
 0x55a   : > { %v3984_v63 = vpack.c.bf16 %v3974_v55, %v3973_v62  ;;  %v3517_v10 = vpack.c.bf16 %v3502_v59, %v3501_v6  ;;  %v3506_v44 = vmul.f32 %v10521_v42, %v10326_v60  ;;  %v10557_v22 = vmul.f32 0.35355338, %v10311_v9 }
 0x55b   : > { %8085 = vmatpush3.bf16.xpose.msk.msra.mxu0 %vm10442_vm3, %v8080_v41  ;;  %v3985_v1 = vpack.c.bf16 %v3976_v37, %v3975_v27  ;;  %v3518_v41 = vpack.c.bf16 %v3504_v38, %v3503_v43  ;;  %12265 = vst [vmem:[#allocation18_spill] sm:$0xff] %v10552_v13  ;;  %v8098_v2 = vpack.c.bf16 %v8473_v15, %v8472_v47  ;;  %v10584_v31 = vmul.f32 0.35355338, %v10330_v45 }
 0x55c   : > { %8088 = vmatprep.subr.msk.bf16.mxu0 %vm10442_vm3, %v8086_v26  ;;  %12266 = vst [vmem:[#allocation19_spill] sm:$0xff] %v10557_v22  ;;  %v3507_v58 = vmul.f32 %v10521_v42, %v10345_v25  ;;  %v3508_v54 = vmul.f32 %v10521_v42, %v10341_v33  ;;  %v3519_v40 = vpack.c.bf16 %v3506_v44, %v3505_v12  ;;  %v8478_v32 = vunpack.i.h.bf16 %v10474_v16 }
 0x55d   : > { %4251 = vrot.lane.b32.xlu0 %v6018_v61, %s8883_s29  ;;  %3999 = vrot.lane.b32.xlu1 %v3981_v36, %s8885_s16  ;;  %v3977_v19 = vmul.f32 %v10484_v7, %v10406_v30  ;;  %v10579_v61 = vmul.f32 0.35355338, %v10307_v21  ;;  %12268 = vst [vmem:[#allocation21_spill] sm:$0xff] %v10584_v31  ;;  %v8477_v36 = vunpack.i.l.bf16 %v10474_v16  ;;  %v3509_v39 = vmul.f32 %v10521_v42, %v10360_v50 }
 0x55e   : > { %v3520_v8 = vpack.c.bf16 %v3508_v54, %v3507_v58  ;;  %v10602_v16 = vmul.f32 0.35355338, %v10345_v25  ;;  %v3512_v55 = vmul.f32 %v10521_v42, %v10371_v34  ;;  %v10617_v27 = vmul.f32 0.35355338, %v10341_v33 }
 0x55f   : > { %12267 = vst [vmem:[#allocation20_spill] sm:$0xff] %v10579_v61  ;;  %v3521_v62 = vpack.c.bf16 %v3510_v56, %v3509_v39  ;;  %v10621_v37 = vmul.f32 0.35355338, %v10360_v50  ;;  %v8482_v43 = vunpack.i.l.bf16 %v10466_v20  ;;  %v10634_v6 = vmul.f32 0.35355338, %v10356_v52 }
 0x560   : > { %12270 = vst [vmem:[#allocation23_spill] sm:$0xff] %v10602_v16  ;;  %12271 = vst [vmem:[#allocation24_spill] sm:$0xff] %v10617_v27  ;;  %v3515_v47 = vmul.f32 %v10521_v42, %v10406_v30  ;;  %v10657_v12 = vmul.f32 0.35355338, %v10390_v17  ;;  %v8488_v44 = vunpack.i.h.bf16 %v10480_v35  ;;  %v10670_v58 = vmul.f32 0.35355338, %v10406_v30 }
 0x561   : > { %4001 = vrot.lane.b32.xlu0 %v3982_v53, %s8885_s16  ;;  %4003 = vrot.lane.b32.xlu1 %v3983_v24, %s8885_s16  ;;  %v8104_v53 = vpack.c.bf16 %v8478_v32, %v8477_v36  ;;  %v3511_v24 = vmul.f32 %v10521_v42, %v10375_v14  ;;  %12272 = vst [vmem:[#allocation25_spill] sm:$0xff] %v10621_v37  ;;  %12273 = vst [vmem:[#allocation3_spill] sm:$0xff] %v10634_v6  ;;  %v8498_v32 = vunpack.i.h.bf16 %v10498_v4 }
 0x562   : > { %12276 = vst [vmem:[#allocation10_spill] sm:$0xff] %v10657_v12  ;;  %12278 = vst [vmem:[#allocation27_spill] sm:$0xff] %v10670_v58  ;;  %v8497_v36 = vunpack.i.l.bf16 %v10498_v4 }
 0x563   : > { %8091 = vmatpush3.bf16.xpose.msk.msra.mxu0 %vm10442_vm3, %v8086_v26  ;;  %v3978_v26 = vmul.f32 %v10484_v7, %v10401_v51  ;;  %v3522_v38 = vpack.c.bf16 %v3512_v55, %v3511_v24 }
 0x564   : > { %8094 = vmatprep.subr.msk.bf16.mxu0 %vm10442_vm3, %v8092_v46 }
 0x565   : > { %4005 = vrot.lane.b32.xlu0 %v3984_v63, %s8885_s16  ;;  %4007 = vrot.lane.b32.xlu1 %v3985_v1, %s8885_s16  ;;  %v3986_v7 = vpack.c.bf16 %v3978_v26, %v3977_v19  ;;  %v3513_v63 = vmul.f32 %v10521_v42, %v10390_v17  ;;  %v3514_v1 = vmul.f32 %v10521_v42, %v10386_v3  ;;  %v8492_v19 = vunpack.i.l.bf16 %v10472_v48 }
 0x567   : > { %v3523_v15 = vpack.c.bf16 %v3514_v1, %v3513_v63 }
 0x569   : > { %4126 = vrot.lane.b32.xlu0 %v3518_v41, %s8885_s16  ;;  %4124 = vrot.lane.b32.xlu1 %v3517_v10, %s8885_s16  ;;  %v3516_v41 = vmul.f32 %v10521_v42, %v10401_v51  ;;  %v10653_v10 = vmul.f32 0.35355338, %v10371_v34 }
 0x56a   : > { %7361 = vmatmul.mubr.msk.f32.vlgmr.msra.gmra.mrb[48].mxu0 %vm421_vm0, %v10552_v13 }
 0x56b   : > { %7363 = vmatprep.mubr.msk.f32.mxu0 %vm421_vm0, %v10557_v22  ;;  %8097 = vmatpush3.bf16.xpose.msk.msra.mxu0 %vm10442_vm3, %v8092_v46  ;;  %v8483_v46 = vunpack.i.h.bf16 %v10466_v20  ;;  %v10638_v20 = vmul.f32 0.35355338, %v10375_v14  ;;  %12275 = vst [vmem:[#allocation5_spill] sm:$0xff] %v10653_v10  ;;  %v3524_v42 = vpack.c.bf16 %v3516_v41, %v3515_v47 }
 0x56c   : > { %8100 = vmatprep.subr.msk.bf16.mxu0 %vm10442_vm3, %v8098_v2 }
 0x56d   : > { %4128 = vrot.lane.b32.xlu0 %v3519_v40, %s8885_s16  ;;  %4858 = vrot.lane.b32.xlu1 %v6067_v11, %s8883_s29  ;;  %12274 = vst [vmem:[#allocation4_spill] sm:$0xff] %v10638_v20  ;;  %v8110_v59 = vpack.c.bf16 %v8483_v46, %v8482_v43  ;;  %v10666_v11 = vmul.f32 0.35355338, %v10386_v3  ;;  %v8493_v40 = vunpack.i.h.bf16 %v10472_v48  ;;  %v8503_v48 = vunpack.i.h.bf16 %v10476_v23 }
 0x56e   : > { %7364 = vmatmul.mubr.msk.f32.gmra.mrb[50].mxu0 %vm421_vm0, %v10579_v61 }
 0x56f   : > { %7366 = vmatprep.mubr.msk.f32.mxu0 %vm421_vm0, %v10584_v31  ;;  %12277 = vst [vmem:[#allocation26_spill] sm:$0xff] %v10666_v11  ;;  %v8122_v26 = vpack.c.bf16 %v8493_v40, %v8492_v19 }
 0x571   : > { %4009 = vrot.lane.b32.xlu0 %v3986_v7, %s8885_s16  ;;  %4130 = vrot.lane.b32.xlu1 %v3520_v8, %s8885_s16  ;;  %v8128_v7 = vpack.c.bf16 %v8498_v32, %v8497_v36  ;;  %v8502_v8 = vunpack.i.l.bf16 %v10476_v23 }
 0x572   : > { %7367 = vmatmul.mubr.msk.f32.gmra.mrb[52].mxu0 %vm421_vm0, %v10597_v29 }
 0x573   : > { %7369 = vmatprep.mubr.msk.f32.mxu0 %vm421_vm0, %v10602_v16  ;;  %8103 = vmatpush3.bf16.xpose.msk.msra.mxu0 %vm10442_vm3, %v8098_v2  ;;  %v8487_v2 = vunpack.i.l.bf16 %v10480_v35  ;;  %v10681_v35 = vmul.f32 0.35355338, %v10401_v51  ;;  %v8134_v39 = vpack.c.bf16 %v8503_v48, %v8502_v8 }
 0x574   : > { %8106 = vmatprep.subr.msk.bf16.mxu0 %vm10442_vm3, %v8104_v53 }
 0x575   : > { %4132 = vrot.lane.b32.xlu1 %v3521_v62, %s8885_s16  ;;  %v8116_v54 = vpack.c.bf16 %v8488_v44, %v8487_v2  ;;  %12279 = vst [vmem:[#allocation28_spill] sm:$0xff] %v10681_v35 }
 0x576   : > { %7370 = vmatmul.mubr.msk.f32.gmra.mrb[54].mxu0 %vm421_vm0, %v10617_v27 }
 0x577   : > { %7372 = vmatprep.mubr.msk.f32.mxu0 %vm421_vm0, %v10621_v37 }
 0x579   : > { %4134 = vrot.lane.b32.xlu1 %v3522_v38, %s8885_s16 }
 0x57a   : > { %7373 = vmatmul.mubr.msk.f32.gmra.mrb[56].mxu0 %vm421_vm0, %v10634_v6 }
 0x57b   : > { %7375 = vmatprep.mubr.msk.f32.mxu0 %vm421_vm0, %v10638_v20  ;;  %8109 = vmatpush3.bf16.xpose.msk.msra.mxu0 %vm10442_vm3, %v8104_v53 }
 0x57c   : > { %8112 = vmatprep.subr.msk.bf16.mxu0 %vm10442_vm3, %v8110_v59 }
 0x57d   : > { %4136 = vrot.lane.b32.xlu1 %v3523_v15, %s8885_s16 }
 0x57e   : > { %7376 = vmatmul.mubr.msk.f32.gmra.mrb[58].mxu0 %vm421_vm0, %v10653_v10 }
 0x57f   : > { %7378 = vmatprep.mubr.msk.f32.mxu0 %vm421_vm0, %v10657_v12 }
 0x581   : > { %4138 = vrot.lane.b32.xlu1 %v3524_v42, %s8885_s16 }
 0x582   : > { %7379 = vmatmul.mubr.msk.f32.gmra.mrb[60].mxu0 %vm421_vm0, %v10666_v11 }
 0x583   : > { %7381 = vmatprep.mubr.msk.f32.mxu0 %vm421_vm0, %v10670_v58  ;;  %8115 = vmatpush3.bf16.xpose.msk.msra.mxu0 %vm10442_vm3, %v8110_v59  ;;  %v10747_v59 = vand.u32 127, %v2373_v0 }
 0x584   : > { %8118 = vmatprep.subr.msk.bf16.mxu0 %vm10442_vm3, %v8116_v54 }
 0x585   : > { %12283 = vst [vmem:[#allocation32_spill] sm:$0xff] %v10747_v59  ;;  %vm2997_vm4 = vcmp.lt.s32.totalorder %v10747_v59, 65 }
 0x586   : > { %7382 = vmatmul.mubr.msk.f32.gmra.mrb[62].mxu0 %vm421_vm0, %v10681_v35 }
 0x587   : > { %7416 = vmatprep.mubr.msk.f32.mxu0 %vm421_vm0, %v10302_v18 }
 0x58b   : > { %8121 = vmatpush3.bf16.xpose.msk.msra.mxu0 %vm10442_vm3, %v8116_v54 }
 0x58c   : > { %8124 = vmatprep.subr.msk.bf16.mxu0 %vm10442_vm3, %v8122_v26 }
 0x593   : > { %8127 = vmatpush3.bf16.xpose.msk.msra.mxu0 %vm10442_vm3, %v8122_v26 }
 0x594   : > { %8130 = vmatprep.subr.msk.bf16.mxu0 %vm10442_vm3, %v8128_v7 }
 0x59b   : > { %8133 = vmatpush3.bf16.xpose.msk.msra.mxu0 %vm10442_vm3, %v8128_v7 }
 0x59c   : > { %8136 = vmatprep.subr.msk.bf16.mxu0 %vm10442_vm3, %v8134_v39 }
 0x5a3   : > { %8139 = vmatpush3.bf16.xpose.msk.msra.mxu0 %vm10442_vm3, %v8134_v39 }
 0x5aa   : > { %7417 = vmatmul.mubr.msk.f32.vlgmr.msra.gmra.mrb[64].mxu0 %vm421_vm0, %v10552_v13 }
 0x5ab   : > { %7419 = vmatprep.mubr.msk.f32.mxu0 %vm421_vm0, %v10557_v22 }
 0x5ae   : > { %7420 = vmatmul.mubr.msk.f32.gmra.mrb[66].mxu0 %vm421_vm0, %v10579_v61 }
 0x5af   : > { %7422 = vmatprep.mubr.msk.f32.mxu0 %vm421_vm0, %v10584_v31 }
 0x5b2   : > { %7423 = vmatmul.mubr.msk.f32.gmra.mrb[68].mxu0 %vm421_vm0, %v10597_v29 }
 0x5b3   : > { %7425 = vmatprep.mubr.msk.f32.mxu0 %vm421_vm0, %v10602_v16 }
 0x5b6   : > { %7426 = vmatmul.mubr.msk.f32.gmra.mrb[70].mxu0 %vm421_vm0, %v10617_v27 }
 0x5b7   : > { %7428 = vmatprep.mubr.msk.f32.mxu0 %vm421_vm0, %v10621_v37 }
 0x5ba   : > { %7429 = vmatmul.mubr.msk.f32.gmra.mrb[72].mxu0 %vm421_vm0, %v10634_v6 }
 0x5bb   : > { %7431 = vmatprep.mubr.msk.f32.mxu0 %vm421_vm0, %v10638_v20 }
 0x5be   : > { %7432 = vmatmul.mubr.msk.f32.gmra.mrb[74].mxu0 %vm421_vm0, %v10653_v10 }
 0x5bf   : > { %7434 = vmatprep.mubr.msk.f32.mxu0 %vm421_vm0, %v10657_v12 }
 0x5c2   : > { %7435 = vmatmul.mubr.msk.f32.gmra.mrb[76].mxu0 %vm421_vm0, %v10666_v11 }
 0x5c3   : > { %7437 = vmatprep.mubr.msk.f32.mxu0 %vm421_vm0, %v10670_v58 }
 0x5c6   : > { %7438 = vmatmul.mubr.msk.f32.gmra.mrb[78].mxu0 %vm421_vm0, %v10681_v35 }
 0x5cb   : > { %v3998_v23 = vpop.permute.xlu0 %3997  ;;  %v3996_v4 = vpop.permute.xlu1 %3995 }
 0x5cc   : > { %7440 = vmatprep.subr.bf16.mxu0 %v3996_v4 }
 0x5cd   : > { %7441 = vmatpush3.bf16.msra.mxu0 %v3996_v4 }
 0x5ce   : > { %7442 = vmatprep.subr.bf16.mxu0 %v3998_v23 }
 0x5cf   : > { %v10737_v56 = vpop.permute.xlu0 %4251  ;;  %v4000_v53 = vpop.permute.xlu1 %3999 }
 0x5d1   : > { %7443 = vmatpush3.bf16.msra.mxu0 %v3998_v23 }
 0x5d2   : > { %7444 = vmatprep.subr.bf16.mxu0 %v4000_v53 }
 0x5d3   : > { %v4002_v62 = vpop.permute.xlu0 %4001  ;;  %v4004_v55 = vpop.permute.xlu1 %4003 }
 0x5d5   : > { %7445 = vmatpush3.bf16.msra.mxu0 %v4000_v53 }
 0x5d6   : > { %7446 = vmatprep.subr.bf16.mxu0 %v4002_v62 }
 0x5d7   : > { %v4006_v24 = vpop.permute.xlu0 %4005  ;;  %v4008_v38 = vpop.permute.xlu1 %4007 }
 0x5d9   : > { %7447 = vmatpush3.bf16.msra.mxu0 %v4002_v62 }
 0x5da   : > { %7448 = vmatprep.subr.bf16.mxu0 %v4004_v55 }
 0x5db   : > { %v10739_v46 = vpop.permute.xlu0 %4126  ;;  %v10743_v1 = vpop.permute.xlu1 %4124 }
 0x5dc   : > { %12280 = vst [vmem:[#allocation29_spill] sm:$0xff] %v10739_v46  ;;  %12282 = vst [vmem:[#allocation31_spill] sm:$0xff] %v10743_v1 }
 0x5dd   : > { %7449 = vmatpush3.bf16.msra.mxu0 %v4004_v55 }
 0x5de   : > { %7450 = vmatprep.subr.bf16.mxu0 %v4006_v24 }
 0x5df   : > { %v10741_v43 = vpop.permute.xlu0 %4128 }
 0x5e0   : > { %12281 = vst [vmem:[#allocation30_spill] sm:$0xff] %v10741_v43 }
 0x5e1   : > { %7451 = vmatpush3.bf16.msra.mxu0 %v4006_v24 }
 0x5e2   : > { %7452 = vmatprep.subr.bf16.mxu0 %v4008_v38 }
 0x5e3   : > { %v4010_v63 = vpop.permute.xlu0 %4009 }
 0x5e5   : > { %7453 = vmatpush3.bf16.msra.mxu0 %v4008_v38 }
 0x5e6   : > { %7454 = vmatprep.subr.bf16.mxu0 %v4010_v63 }
 0x5e9   : > { %7455 = vmatpush3.bf16.msra.mxu0 %v4010_v63 }
 0x5ea   : > { %7472 = vmatprep.subr.bf16.mxu0 %v10743_v1 }
 0x63d   : > { %v7362_v15 = vpop.f32.mrb[48].mxu0 }
 0x63e   : > { %3313 = vst [vmem:[%s10753_s26 + $0x8] sm:$0xff] %v7362_v15  ;;  %v3233_v47 = vpop.f32.mrb[49].mxu0  ;;  %v10759_v0 = vsel %vm2997_vm4, %v7362_v15, -1e+30 }
 0x63f   : > { %3312 = vst [vmem:[%s10753_s26] sm:$0xff] %v3233_v47  ;;  %3348 = vmax.xlane.f32.xlu0 %v10759_v0  ;;  %v10765_v41 = vsel %vm2997_vm4, %v3233_v47, -1e+30 }
 0x640   : > { %3346 = vmax.xlane.f32.xlu1 %v10765_v41 }
 0x641   : > { %v7365_v44 = vpop.f32.mrb[50].mxu0 }
 0x642   : > { %3315 = vst [vmem:[%s10753_s26 + $0x18] sm:$0xff] %v7365_v44  ;;  %v3243_v2 = vpop.f32.mrb[51].mxu0  ;;  %v10771_v42 = vsel %vm2997_vm4, %v7365_v44, -1e+30 }
 0x643   : > { %3314 = vst [vmem:[%s10753_s26 + $0x10] sm:$0xff] %v3243_v2  ;;  %3352 = vmax.xlane.f32.xlu0 %v10771_v42  ;;  %v10778_v19 = vsel %vm2997_vm4, %v3243_v2, -1e+30 }
 0x645   : > { %v7368_v54 = vpop.f32.mrb[52].mxu0 }
 0x646   : > { %3317 = vst [vmem:[%s10753_s26 + $0x28] sm:$0xff] %v7368_v54  ;;  %v3253_v40 = vpop.f32.mrb[53].mxu0  ;;  %v10782_v26 = vsel %vm2997_vm4, %v7368_v54, -1e+30 }
 0x647   : > { %3316 = vst [vmem:[%s10753_s26 + $0x20] sm:$0xff] %v3253_v40  ;;  %3350 = vmax.xlane.f32.xlu0 %v10778_v19  ;;  %3356 = vmax.xlane.f32.xlu1 %v10782_v26  ;;  %v10790_v7 = vsel %vm2997_vm4, %v3253_v40, -1e+30 }
 0x649   : > { %v7371_v32 = vpop.f32.mrb[54].mxu0 }
 0x64a   : > { %3319 = vst [vmem:[%s10753_s26 + $0x38] sm:$0xff] %v7371_v32  ;;  %v3263_v36 = vpop.f32.mrb[55].mxu0  ;;  %v10794_v48 = vsel %vm2997_vm4, %v7371_v32, -1e+30 }
 0x64b   : > { %3318 = vst [vmem:[%s10753_s26 + $0x30] sm:$0xff] %v3263_v36  ;;  %3354 = vmax.xlane.f32.xlu0 %v10790_v7  ;;  %3360 = vmax.xlane.f32.xlu1 %v10794_v48  ;;  %v10802_v23 = vsel %vm2997_vm4, %v3263_v36, -1e+30 }
 0x64d   : > { %v7374_v8 = vpop.f32.mrb[56].mxu0 }
 0x64e   : > { %3321 = vst [vmem:[%s10753_s26 + $0x48] sm:$0xff] %v7374_v8  ;;  %v3273_v39 = vpop.f32.mrb[57].mxu0  ;;  %v10809_v62 = vsel %vm2997_vm4, %v7374_v8, -1e+30 }
 0x64f   : > { %3320 = vst [vmem:[%s10753_s26 + $0x40] sm:$0xff] %v3273_v39  ;;  %3358 = vmax.xlane.f32.xlu1 %v10802_v23  ;;  %v10821_v63 = vsel %vm2997_vm4, %v3273_v39, -1e+30 }
 0x651   : > { %v7377_v4 = vpop.f32.mrb[58].mxu0 }
 0x652   : > { %3323 = vst [vmem:[%s10753_s26 + $0x58] sm:$0xff] %v7377_v4  ;;  %v3283_v53 = vpop.f32.mrb[59].mxu0  ;;  %v10813_v24 = vsel %vm2997_vm4, %v7377_v4, -1e+30 }
 0x653   : > { %3322 = vst [vmem:[%s10753_s26 + $0x50] sm:$0xff] %v3283_v53  ;;  %3364 = vmax.xlane.f32.xlu1 %v10809_v62  ;;  %3368 = vmax.xlane.f32.xlu0 %v10813_v24  ;;  %v10825_v15 = vsel %vm2997_vm4, %v3283_v53, -1e+30 }
 0x655   : > { %v7380_v55 = vpop.f32.mrb[60].mxu0 }
 0x656   : > { %3325 = vst [vmem:[%s10753_s26 + $0x68] sm:$0xff] %v7380_v55  ;;  %v3293_v38 = vpop.f32.mrb[61].mxu0  ;;  %v10833_v2 = vsel %vm2997_vm4, %v7380_v55, -1e+30 }
 0x657   : > { %3324 = vst [vmem:[%s10753_s26 + $0x60] sm:$0xff] %v3293_v38  ;;  %3362 = vmax.xlane.f32.xlu1 %v10821_v63  ;;  %3366 = vmax.xlane.f32.xlu0 %v10825_v15  ;;  %12284 = vst [vmem:[#allocation33_spill] sm:$0xff] %v10833_v2  ;;  %v10837_v54 = vsel %vm2997_vm4, %v3293_v38, -1e+30 }
 0x659   : > { %v7383_v47 = vpop.f32.mrb[62].mxu0 }
 0x65a   : > { %3327 = vst [vmem:[%s10753_s26 + $0x78] sm:$0xff] %v7383_v47  ;;  %v3303_v44 = vpop.f32.mrb[63].mxu0  ;;  %v10844_v40 = vsel %vm2997_vm4, %v7383_v47, -1e+30 }
 0x65b   : > { %3326 = vst [vmem:[%s10753_s26 + $0x70] sm:$0xff] %v3303_v44  ;;  %3372 = vmax.xlane.f32.xlu0 %v10833_v2  ;;  %3370 = vmax.xlane.f32.xlu1 %v10837_v54  ;;  %v10848_v32 = vsel %vm2997_vm4, %v3303_v44, -1e+30 }
 0x65f   : > { %3376 = vmax.xlane.f32.xlu0 %v10844_v40  ;;  %3374 = vmax.xlane.f32.xlu1 %v10848_v32 }
 0x67d   : > { %v7418_v36 = vpop.f32.mrb[64].mxu0 }
 0x67e   : > { %6003 = vst [vmem:[%s10753_s26 + $0x88] sm:$0xff] %v7418_v36  ;;  %v3696_v8 = vpop.f32.mrb[65].mxu0  ;;  %v10855_v39 = vsel %vm2997_vm4, %v7418_v36, -1e+30 }
 0x67f   : > { %6002 = vst [vmem:[%s10753_s26 + $0x80] sm:$0xff] %v3696_v8  ;;  %3810 = vmax.xlane.f32.xlu1 %v10855_v39  ;;  %v10861_v4 = vsel %vm2997_vm4, %v3696_v8, -1e+30 }
 0x680   : > { %3808 = vmax.xlane.f32.xlu0 %v10861_v4 }
 0x681   : > { %v7421_v53 = vpop.f32.mrb[66].mxu0 }
 0x682   : > { %6005 = vst [vmem:[%s10753_s26 + $0x98] sm:$0xff] %v7421_v53  ;;  %v3706_v55 = vpop.f32.mrb[67].mxu0  ;;  %v10867_v38 = vsel %vm2997_vm4, %v7421_v53, -1e+30 }
 0x683   : > { %6004 = vst [vmem:[%s10753_s26 + $0x90] sm:$0xff] %v3706_v55  ;;  %v10875_v36 = vsel %vm2997_vm4, %v3706_v55, -1e+30 }
 0x684   : > { %3814 = vmax.xlane.f32.xlu0 %v10867_v38 }
 0x685   : > { %v7424_v47 = vpop.f32.mrb[68].mxu0 }
 0x686   : > { %6007 = vst [vmem:[%s10753_s26 + $0xa8] sm:$0xff] %v7424_v47  ;;  %v3716_v44 = vpop.f32.mrb[69].mxu0  ;;  %v10887_v35 = vsel %vm2997_vm4, %v7424_v47, -1e+30 }
 0x687   : > { %6006 = vst [vmem:[%s10753_s26 + $0xa0] sm:$0xff] %v3716_v44  ;;  %v10879_v8 = vsel %vm2997_vm4, %v3716_v44, -1e+30 }
 0x688   : > { %3812 = vmax.xlane.f32.xlu0 %v10875_v36  ;;  %3816 = vmax.xlane.f32.xlu1 %v10879_v8 }
 0x689   : > { %v7427_v53 = vpop.f32.mrb[70].mxu0 }
 0x68a   : > { %6009 = vst [vmem:[%s10753_s26 + $0xb8] sm:$0xff] %v7427_v53  ;;  %v3726_v49 = vpop.f32.mrb[71].mxu0  ;;  %v10899_v11 = vsel %vm2997_vm4, %v7427_v53, -1e+30 }
 0x68b   : > { %6008 = vst [vmem:[%s10753_s26 + $0xb0] sm:$0xff] %v3726_v49  ;;  %v10891_v55 = vsel %vm2997_vm4, %v3726_v49, -1e+30 }
 0x68c   : > { %3818 = vmax.xlane.f32.xlu0 %v10887_v35  ;;  %3820 = vmax.xlane.f32.xlu1 %v10891_v55 }
 0x68d   : > { %v7430_v44 = vpop.f32.mrb[72].mxu0 }
 0x68e   : > { %6011 = vst [vmem:[%s10753_s26 + $0xc8] sm:$0xff] %v7430_v44  ;;  %v3736_v58 = vpop.f32.mrb[73].mxu0  ;;  %v10911_v10 = vsel %vm2997_vm4, %v7430_v44, -1e+30 }
 0x68f   : > { %6010 = vst [vmem:[%s10753_s26 + $0xc0] sm:$0xff] %v3736_v58  ;;  %v10903_v47 = vsel %vm2997_vm4, %v3736_v58, -1e+30 }
 0x690   : > { %3822 = vmax.xlane.f32.xlu0 %v10899_v11  ;;  %3824 = vmax.xlane.f32.xlu1 %v10903_v47 }
 0x691   : > { %v7433_v49 = vpop.f32.mrb[74].mxu0 }
 0x692   : > { %6013 = vst [vmem:[%s10753_s26 + $0xd8] sm:$0xff] %v7433_v49  ;;  %v3746_v12 = vpop.f32.mrb[75].mxu0  ;;  %v10923_v6 = vsel %vm2997_vm4, %v7433_v49, -1e+30 }
 0x693   : > { %6012 = vst [vmem:[%s10753_s26 + $0xd0] sm:$0xff] %v3746_v12  ;;  %v10915_v53 = vsel %vm2997_vm4, %v3746_v12, -1e+30 }
 0x694   : > { %3826 = vmax.xlane.f32.xlu0 %v10911_v10  ;;  %3828 = vmax.xlane.f32.xlu1 %v10915_v53 }
 0x695   : > { %v7436_v58 = vpop.f32.mrb[76].mxu0 }
 0x696   : > { %6015 = vst [vmem:[%s10753_s26 + $0xe8] sm:$0xff] %v7436_v58  ;;  %v3756_v20 = vpop.f32.mrb[77].mxu0  ;;  %v10930_v12 = vsel %vm2997_vm4, %v7436_v58, -1e+30  ;;  %v10948_v58 = vpop.permute.xlu1 %4858 }
 0x697   : > { %6014 = vst [vmem:[%s10753_s26 + $0xe0] sm:$0xff] %v3756_v20  ;;  %v10935_v27 = vsel %vm2997_vm4, %v3756_v20, -1e+30 }
 0x698   : > { %3830 = vmax.xlane.f32.xlu0 %v10923_v6 }
 0x699   : > { %v7439_v44 = vpop.f32.mrb[78].mxu0 }
 0x69a   : > { %6017 = vst [vmem:[%s10753_s26 + $0xf8] sm:$0xff] %v7439_v44  ;;  %v3766_v37 = vpop.f32.mrb[79].mxu0  ;;  %v10940_v49 = vsel %vm2997_vm4, %v7439_v44, -1e+30  ;;  %v10950_v29 = vpop.permute.xlu1 %4130 }
 0x69b   : > { %6016 = vst [vmem:[%s10753_s26 + $0xf0] sm:$0xff] %v3766_v37  ;;  %v10945_v16 = vsel %vm2997_vm4, %v3766_v37, -1e+30  ;;  %12285 = vst [vmem:[#allocation34_spill] sm:$0xff] %v10950_v29 }
 0x69c   : > { %3834 = vmax.xlane.f32.xlu0 %v10930_v12 }
 0x69e   : > { %v10952_v20 = vpop.permute.xlu1 %4132 }
 0x69f   : > { %12286 = vst [vmem:[#allocation35_spill] sm:$0xff] %v10952_v20 }
 0x6a0   : > { %3832 = vmax.xlane.f32.xlu0 %v10935_v27 }
 0x6a2   : > { %v10954_v31 = vpop.permute.xlu1 %4134 }
 0x6a3   : > { %12287 = vst [vmem:[#allocation36_spill] sm:$0xff] %v10954_v31 }
 0x6a4   : > { %3838 = vmax.xlane.f32.xlu0 %v10940_v49 }
 0x6a6   : > { %v10956_v61 = vpop.permute.xlu1 %4136 }
 0x6a7   : > { %12288 = vst [vmem:[#allocation37_spill] sm:$0xff] %v10956_v61 }
 0x6a8   : > { %3836 = vmax.xlane.f32.xlu0 %v10945_v16 }
 0x6aa   : > { %v10958_v44 = vpop.permute.xlu1 %4138 }
 0x6ab   : > { %12289 = vst [vmem:[#allocation38_spill] sm:$0xff] %v10958_v44 }
 0x6cc   : > { %v3349_v22 = vpop.xlane.xlu0 %3348 }
 0x6cd   : > { %v3379_v13 = vsub.f32 %v10759_v0, %v3349_v22  ;;  %v3347_v59 = vpop.xlane.xlu1 %3346 }
 0x6ce   : > { %v3378_v37 = vsub.f32 %v10765_v41, %v3347_v59 }
 0x6cf   : > { %v3396_v18 = vmul.f32 1.442695, %v3379_v13 }
 0x6d0   : > { %v3394_v5 = vmul.f32 1.442695, %v3378_v37  ;;  %v3353_v43 = vpop.xlane.xlu0 %3352 }
 0x6d1   : > { %8616 = vpow2.f32 %v3396_v18  ;;  %v3381_v29 = vsub.f32 %v10771_v42, %v3353_v43 }
 0x6d2   : > { %8618 = vpow2.f32 %v3394_v5 }
 0x6d3   : > { %v3400_v20 = vmul.f32 1.442695, %v3381_v29 }
 0x6d4   : > { %v3351_v2 = vpop.xlane.xlu0 %3350  ;;  %v10975_v5 = vpop.xlane.xlu1 %3356 }
 0x6d5   : > { %8620 = vpow2.f32 %v3400_v20  ;;  %v3380_v61 = vsub.f32 %v10778_v19, %v3351_v2 }
 0x6d7   : > { %v3398_v31 = vmul.f32 1.442695, %v3380_v61 }
 0x6d8   : > { %v10978_v61 = vpop.xlane.xlu1 %3360  ;;  %v3355_v29 = vpop.xlane.xlu0 %3354 }
 0x6d9   : > { %8622 = vpow2.f32 %v3398_v31 }
 0x6db   : > { %v10964_v44 = vpop.eup %8616 }
 0x6dc   : > { %12290 = vst [vmem:[#allocation39_spill] sm:$0xff] %v10964_v44  ;;  %v10966_v22 = vpop.eup %8618  ;;  %3428 = vadd.xlane.f32.xlu1 %v10964_v44  ;;  %v10980_v31 = vpop.xlane.xlu1 %3358 }
 0x6dd   : > { %12291 = vst [vmem:[#allocation40_spill] sm:$0xff] %v10966_v22  ;;  %3426 = vadd.xlane.f32.xlu0 %v10966_v22 }
 0x6df   : > { %v10970_v13 = vpop.eup %8620 }
 0x6e0   : > { %12292 = vst [vmem:[#allocation41_spill] sm:$0xff] %v10970_v13  ;;  %v10982_v43 = vpop.xlane.xlu1 %3364  ;;  %v10984_v59 = vpop.xlane.xlu0 %3368 }
 0x6e1   : > { %3432 = vadd.xlane.f32.xlu0 %v10970_v13 }
 0x6e3   : > { %v10973_v18 = vpop.eup %8622 }
 0x6e4   : > { %12293 = vst [vmem:[#allocation42_spill] sm:$0xff] %v10973_v18  ;;  %3430 = vadd.xlane.f32.xlu1 %v10973_v18  ;;  %v10986_v0 = vpop.xlane.xlu1 %3362  ;;  %v10988_v41 = vpop.xlane.xlu0 %3366 }
 0x6e8   : > { %v10990_v42 = vpop.xlane.xlu1 %3370  ;;  %v10992_v19 = vpop.xlane.xlu0 %3372 }
 0x6e9   : > { %12294 = vst [vmem:[#allocation43_spill] sm:$0xff] %v10992_v19 }
 0x6ec   : > { %v10994_v2 = vpop.xlane.xlu1 %3374  ;;  %v10996_v20 = vpop.xlane.xlu0 %3376 }
 0x70c   : > { %v3811_v37 = vpop.xlane.xlu1 %3810 }
 0x70d   : > { %v3841_v13 = vsub.f32 %v10855_v39, %v3811_v37  ;;  %v3809_v18 = vpop.xlane.xlu0 %3808 }
 0x70e   : > { %v3840_v44 = vsub.f32 %v10861_v4, %v3809_v18  ;;  %v3382_v18 = vsub.f32 %v10790_v7, %v3355_v29 }
 0x70f   : > { %v3858_v22 = vmul.f32 1.442695, %v3841_v13 }
 0x710   : > { %v3856_v46 = vmul.f32 1.442695, %v3840_v44  ;;  %v3402_v37 = vmul.f32 1.442695, %v3382_v18 }
 0x711   : > { %8624 = vpow2.f32 %v3858_v22  ;;  %v3815_v1 = vpop.xlane.xlu0 %3814 }
 0x712   : > { %8626 = vpow2.f32 %v3856_v46  ;;  %v3843_v51 = vsub.f32 %v10867_v38, %v3815_v1  ;;  %v4254_v1 = vmul.f32 %v10737_v56, %v10294_v57  ;;  %v4255_v38 = vmul.f32 %v10737_v56, %v10290_v28 }
 0x714   : > { %v3862_v30 = vmul.f32 1.442695, %v3843_v51  ;;  %v8504_v44 = vpack.i.bf16 %v4255_v38, %v4254_v1 }
 0x715   : > { %v3813_v33 = vpop.xlane.xlu0 %3812  ;;  %v3817_v22 = vpop.xlane.xlu1 %3816 }
 0x716   : > { %8628 = vpow2.f32 %v3862_v30  ;;  %v3842_v19 = vsub.f32 %v10875_v36, %v3813_v33  ;;  %v4256_v33 = vmul.f32 %v10737_v56, %v10311_v9 }
 0x718   : > { %v3860_v25 = vmul.f32 1.442695, %v3842_v19 }
 0x719   : > { %v3819_v30 = vpop.xlane.xlu0 %3818  ;;  %v3821_v19 = vpop.xlane.xlu1 %3820 }
 0x71a   : > { %8630 = vpow2.f32 %v3860_v25  ;;  %v4257_v25 = vmul.f32 %v10737_v56, %v10307_v21 }
 0x71b   : > { %v11002_v3 = vpop.eup %8624  ;;  %8632 = vpow2.f32 %v3402_v37 }
 0x71c   : > { %v11004_v39 = vpop.eup %8626  ;;  %3890 = vadd.xlane.f32.xlu0 %v11002_v3  ;;  %v8509_v51 = vpack.i.bf16 %v4257_v25, %v4256_v33  ;;  %v3844_v33 = vsub.f32 %v10879_v8, %v3817_v22 }
 0x71d   : > { %3888 = vadd.xlane.f32.xlu1 %v11004_v39  ;;  %v3823_v36 = vpop.xlane.xlu0 %3822  ;;  %v3825_v21 = vpop.xlane.xlu1 %3824 }
 0x71e   : > { %v3864_v9 = vmul.f32 1.442695, %v3844_v33  ;;  %v3847_v1 = vsub.f32 %v10899_v11, %v3823_v36  ;;  %v3848_v7 = vsub.f32 %v10903_v47, %v3825_v21 }
 0x720   : > { %v11008_v4 = vpop.eup %8628  ;;  %8634 = vpow2.f32 %v3864_v9  ;;  %v3870_v18 = vmul.f32 1.442695, %v3847_v1 }
 0x721   : > { %12295 = vst [vmem:[#allocation44_spill] sm:$0xff] %v11008_v4  ;;  %3894 = vadd.xlane.f32.xlu0 %v11008_v4  ;;  %v3827_v13 = vpop.xlane.xlu0 %3826  ;;  %v3829_v29 = vpop.xlane.xlu1 %3828 }
 0x722   : > { %v3849_v8 = vsub.f32 %v10911_v10, %v3827_v13  ;;  %v3384_v10 = vsub.f32 %v10802_v23, %v10980_v31 }
 0x724   : > { %v11011_v46 = vpop.eup %8630 }
 0x725   : > { %12296 = vst [vmem:[#allocation45_spill] sm:$0xff] %v11011_v46  ;;  %3892 = vadd.xlane.f32.xlu0 %v11011_v46  ;;  %v3831_v25 = vpop.xlane.xlu0 %3830  ;;  %v3846_v46 = vsub.f32 %v10891_v55, %v3821_v19  ;;  %v11032_v37 = vpop.eup %8632  ;;  %v3874_v55 = vmul.f32 1.442695, %v3849_v8  ;;  %v3406_v19 = vmul.f32 1.442695, %v3384_v10 }
 0x726   : > { %v3851_v11 = vsub.f32 %v10923_v6, %v3831_v25 }
 0x729   : > { %v3835_v38 = vpop.xlane.xlu0 %3834 }
 0x72a   : > { %v11037_v47 = vpop.eup %8634 }
 0x72d   : > { %v3833_v22 = vpop.xlane.xlu0 %3832 }
 0x72e   : > { %8510 = vrot.lane.b32.xlu1 %v8509_v51, %s8884_s15  ;;  %v3845_v51 = vsub.f32 %v10887_v35, %v3819_v30  ;;  %v3872_v35 = vmul.f32 1.442695, %v3848_v7  ;;  %v3850_v30 = vsub.f32 %v10915_v53, %v3829_v29  ;;  %v3852_v9 = vsub.f32 %v10935_v27, %v3833_v22 }
 0x72f   : > { %v3878_v53 = vmul.f32 1.442695, %v3851_v11  ;;  %v3385_v27 = vsub.f32 %v10794_v48, %v10978_v61  ;;  %v3383_v48 = vsub.f32 %v10782_v26, %v10975_v5  ;;  %v3387_v26 = vsub.f32 %v10809_v62, %v10982_v43 }
 0x730   : > { %v3866_v4 = vmul.f32 1.442695, %v3845_v51  ;;  %v3876_v21 = vmul.f32 1.442695, %v3850_v30  ;;  %v3389_v62 = vsub.f32 %v10813_v24, %v10984_v59  ;;  %v3392_v11 = vsub.f32 %v10848_v32, %v10994_v2 }
 0x731   : > { %v3839_v36 = vpop.xlane.xlu0 %3838  ;;  %v3408_v25 = vmul.f32 1.442695, %v3385_v27  ;;  %v4258_v59 = vmul.f32 %v10737_v56, %v10330_v45  ;;  %v4262_v27 = vmul.f32 %v10737_v56, %v10360_v50 }
 0x732   : > { %8636 = vpow2.f32 %v3866_v4  ;;  %v3853_v4 = vsub.f32 %v10930_v12, %v3835_v38  ;;  %v3855_v31 = vsub.f32 %v10940_v49, %v3839_v36  ;;  %v3404_v49 = vmul.f32 1.442695, %v3383_v48 }
 0x733   : > { %v3386_v38 = vsub.f32 %v10821_v63, %v10986_v0  ;;  %v3412_v63 = vmul.f32 1.442695, %v3387_v26  ;;  %v3388_v0 = vsub.f32 %v10825_v15, %v10988_v41  ;;  %v3416_v22 = vmul.f32 1.442695, %v3389_v62 }
 0x734   : > { %v3882_v23 = vmul.f32 1.442695, %v3853_v4  ;;  %v3886_v61 = vmul.f32 1.442695, %v3855_v31  ;;  %v3390_v15 = vsub.f32 %v10837_v54, %v10990_v42  ;;  %v3393_v54 = vsub.f32 %v10844_v40, %v10996_v20 }
 0x735   : > { %v3410_v5 = vmul.f32 1.442695, %v3386_v38  ;;  %v3414_v43 = vmul.f32 1.442695, %v3388_v0  ;;  %v3422_v42 = vmul.f32 1.442695, %v3392_v11  ;;  %v3837_v4 = vpop.xlane.xlu0 %3836 }
 0x736   : > { %v3424_v32 = vmul.f32 1.442695, %v3393_v54  ;;  %v12298_v11 = vld [vmem:[#allocation13_spill] sm:$0xff] }
 0x73b   : > { %8505 = vrot.lane.b32.xlu0 %v8504_v44, %s8884_s15  ;;  %v3868_v44 = vmul.f32 1.442695, %v3846_v46  ;;  %v3880_v46 = vmul.f32 1.442695, %v3852_v9 }
 0x73c   : > { %v11043_v6 = vpop.eup %8636 }
 0x73d   : > { %8638 = vpow2.f32 %v3868_v44 }
 0x73e   : > { %8640 = vpow2.f32 %v3870_v18 }
 0x73f   : > { %8642 = vpow2.f32 %v3872_v35 }
 0x740   : > { %8644 = vpow2.f32 %v3874_v55  ;;  %v3418_v55 = vmul.f32 1.442695, %v3390_v15  ;;  %v12297_v15 = vld [vmem:[#allocation14_spill] sm:$0xff] }
 0x741   : > { %8646 = vpow2.f32 %v3876_v21  ;;  %v4259_v21 = vmul.f32 %v10737_v56, %v10326_v60 }
 0x742   : > { %8648 = vpow2.f32 %v3878_v53 }
 0x743   : > { %8650 = vpow2.f32 %v3880_v46  ;;  %v8514_v10 = vpack.i.bf16 %v4259_v21, %v4258_v59  ;;  %v3854_v46 = vsub.f32 %v10945_v16, %v3837_v4  ;;  %v4862_v16 = vmul.f32 %v10948_v58, %v10290_v28 }
 0x744   : > { %8652 = vpow2.f32 %v3406_v19  ;;  %v4263_v19 = vmul.f32 %v10737_v56, %v10356_v52  ;;  %v4260_v59 = vmul.f32 %v10737_v56, %v12298_v11 }
 0x745   : > { %8654 = vpow2.f32 %v3882_v23  ;;  %v3884_v36 = vmul.f32 1.442695, %v3854_v46 }
 0x746   : > { %8656 = vpow2.f32 %v3408_v25  ;;  %v8524_v48 = vpack.i.bf16 %v4263_v19, %v4262_v27  ;;  %v12300_v19 = vld [vmem:[#allocation16_spill] sm:$0xff] }
 0x747   : > { %v11045_v13 = vpop.eup %8638  ;;  %8658 = vpow2.f32 %v3886_v61  ;;  %v4861_v61 = vmul.f32 %v10948_v58, %v10294_v57 }
 0x748   : > { %v11052_v12 = vpop.eup %8640  ;;  %8660 = vpow2.f32 %v3404_v49 }
 0x749   : > { %v11054_v33 = vpop.eup %8642  ;;  %8662 = vpow2.f32 %v3410_v5  ;;  %v8529_v26 = vpack.i.bf16 %v4862_v16, %v4861_v61  ;;  %v4264_v5 = vmul.f32 %v10737_v56, %v10375_v14  ;;  %v12301_v61 = vld [vmem:[#allocation15_spill] sm:$0xff] }
 0x74a   : > { %v11060_v51 = vpop.eup %8644  ;;  %8664 = vpow2.f32 %v3412_v63  ;;  %v4265_v63 = vmul.f32 %v10737_v56, %v10371_v34  ;;  %v4269_v16 = vmul.f32 %v10737_v56, %v12301_v61 }
 0x74b   : > { %v11062_v1 = vpop.eup %8646  ;;  %8666 = vpow2.f32 %v3414_v43 }
 0x74c   : > { %v11068_v44 = vpop.eup %8648  ;;  %8668 = vpow2.f32 %v3416_v22  ;;  %v8534_v43 = vpack.i.bf16 %v4265_v63, %v4264_v5  ;;  %v4266_v22 = vmul.f32 %v10737_v56, %v10390_v17 }
 0x74d   : > { %v11070_v7 = vpop.eup %8650  ;;  %8670 = vpow2.f32 %v3418_v55  ;;  %v4267_v55 = vmul.f32 %v10737_v56, %v12297_v15 }
 0x74e   : > { %v11076_v29 = vpop.eup %8652  ;;  %8672 = vpow2.f32 %v3422_v42  ;;  %v4865_v42 = vmul.f32 %v10948_v58, %v10330_v45 }
 0x74f   : > { %v11078_v18 = vpop.eup %8654  ;;  %8674 = vpow2.f32 %v3424_v32  ;;  %v8544_v54 = vpack.i.bf16 %v4267_v55, %v4266_v22  ;;  %v12299_v32 = vld [vmem:[#allocation12_spill] sm:$0xff] }
 0x750   : > { %v11084_v8 = vpop.eup %8656  ;;  %8676 = vpow2.f32 %v3884_v36  ;;  %v4261_v4 = vmul.f32 %v10737_v56, %v12299_v32  ;;  %v4868_v22 = vmul.f32 %v10948_v58, %v12299_v32 }
 0x751   : > { %v11086_v35 = vpop.eup %8658 }
 0x752   : > { %3434 = vadd.xlane.f32.xlu1 %v11032_v37  ;;  %v11092_v30 = vpop.eup %8660  ;;  %v8519_v27 = vpack.i.bf16 %v4261_v4, %v4260_v59  ;;  %v4871_v59 = vmul.f32 %v10948_v58, %v10375_v14  ;;  %v12303_v4 = vld [vmem:[#allocation45_spill] sm:$0xff] }
 0x753   : > { %v11097_v41 = vpop.eup %8662 }
 0x754   : > { %v11102_v24 = vpop.eup %8664 }
 0x755   : > { %v11111_v9 = vpop.eup %8666 }
 0x756   : > { %3896 = vadd.xlane.f32.xlu1 %v11037_v47  ;;  %v11115_v2 = vpop.eup %8668 }
 0x757   : > { %v11118_v53 = vpop.eup %8670 }
 0x758   : > { %v11121_v40 = vpop.eup %8672 }
 0x759   : > { %v11124_v20 = vpop.eup %8674 }
 0x75a   : > { %3898 = vadd.xlane.f32.xlu0 %v11043_v6  ;;  %3900 = vadd.xlane.f32.xlu1 %v11045_v13  ;;  %v11134_v31 = vpop.eup %8676 }
 0x75e   : > { %3902 = vadd.xlane.f32.xlu0 %v11052_v12  ;;  %3904 = vadd.xlane.f32.xlu1 %v11054_v33 }
 0x762   : > { %3906 = vadd.xlane.f32.xlu0 %v11060_v51  ;;  %3908 = vadd.xlane.f32.xlu1 %v11062_v1 }
 0x766   : > { %3910 = vadd.xlane.f32.xlu0 %v11068_v44  ;;  %3912 = vadd.xlane.f32.xlu1 %v11070_v7 }
 0x769   : > { %v11136_v25 = vpop.xlane.xlu1 %3428 }
 0x76a   : > { %3914 = vadd.xlane.f32.xlu0 %v11078_v18  ;;  %3438 = vadd.xlane.f32.xlu1 %v11076_v29  ;;  %v11132_v23 = vpop.xlane.xlu0 %3426 }
 0x76e   : > { %3918 = vadd.xlane.f32.xlu0 %v11086_v35  ;;  %3440 = vadd.xlane.f32.xlu1 %v11084_v8  ;;  %v11144_v49 = vpop.xlane.xlu0 %3432 }
 0x771   : > { %v11146_v38 = vpop.xlane.xlu1 %3430 }
 0x772   : > { %3436 = vadd.xlane.f32.xlu0 %v11092_v30 }
 0x776   : > { %3442 = vadd.xlane.f32.xlu0 %v11097_v41 }
 0x77a   : > { %3444 = vadd.xlane.f32.xlu0 %v11102_v24 }
 0x77e   : > { %3446 = vadd.xlane.f32.xlu0 %v11111_v9 }
 0x77f   : > { %8515 = vrot.lane.b32.xlu1 %v8514_v10, %s8884_s15  ;;  %v4866_v10 = vmul.f32 %v10948_v58, %v10326_v60 }
 0x781   : > { %v8549_v36 = vpack.i.bf16 %v4866_v10, %v4865_v42  ;;  %v12302_v42 = vld [vmem:[#allocation44_spill] sm:$0xff] }
 0x782   : > { %3448 = vadd.xlane.f32.xlu0 %v11115_v2 }
 0x786   : > { %3450 = vadd.xlane.f32.xlu0 %v11118_v53 }
 0x78a   : > { %3454 = vadd.xlane.f32.xlu0 %v11121_v40 }
 0x78e   : > { %3456 = vadd.xlane.f32.xlu0 %v11124_v20 }
 0x7a3   : > { %3916 = vadd.xlane.f32.xlu1 %v11134_v31 }
 0x7a4   : > { %8525 = vrot.lane.b32.xlu0 %v8524_v48, %s8884_s15  ;;  %v4268_v48 = vmul.f32 %v10737_v56, %v12300_v19 }
 0x7a8   : > { %8530 = vrot.lane.b32.xlu0 %v8529_v26, %s8884_s15 }
 0x7a9   : > { %v3891_v0 = vpop.xlane.xlu0 %3890 }
 0x7aa   : > { %8678 = vrcp.f32 %v3891_v0  ;;  %v3889_v62 = vpop.xlane.xlu1 %3888  ;;  %v8554_v0 = vpack.i.bf16 %v4269_v16, %v4268_v48 }
 0x7ab   : > { %8680 = vrcp.f32 %v3889_v62 }
 0x7ac   : > { %8535 = vrot.lane.b32.xlu0 %v8534_v43, %s8884_s15  ;;  %v4867_v43 = vmul.f32 %v10948_v58, %v12298_v11 }
 0x7ae   : > { %v3895_v21 = vpop.xlane.xlu0 %3894  ;;  %v8559_v55 = vpack.i.bf16 %v4868_v22, %v4867_v43  ;;  %v12308_v43 = vld [vmem:[#allocation30_spill] sm:$0xff] }
 0x7af   : > { %8682 = vrcp.f32 %v3895_v21  ;;  %v8872_v22 = vld [vmem:[%s12100_s7 + $0x2] ss:$0 sm:$0xff] }
 0x7b0   : > { %8545 = vrot.lane.b32.xlu0 %v8544_v54, %s8884_s15  ;;  %v4875_v54 = vmul.f32 %v10948_v58, %v12300_v19 }
 0x7b2   : > { %v3893_v46 = vpop.xlane.xlu0 %3892 }
 0x7b3   : > { %8684 = vrcp.f32 %v3893_v46 }
 0x7b4   : > { %v8679_v26 = vpop.eup %8678  ;;  %8550 = vrot.lane.b32.xlu0 %v8549_v36, %s8884_s15  ;;  %8520 = vrot.lane.b32.xlu1 %v8519_v27, %s8884_s15  ;;  %v4876_v27 = vmul.f32 %v10948_v58, %v12301_v61 }
 0x7b5   : > { %v8681_v5 = vpop.eup %8680  ;;  %v3937_v63 = vmul.f32 %v8679_v26, %v11002_v3  ;;  %v4872_v3 = vmul.f32 %v10948_v58, %v10371_v34  ;;  %v12304_v26 = vld [vmem:[#allocation31_spill] sm:$0xff] }
 0x7b6   : > { %v3936_v62 = vmul.f32 %v8681_v5, %v11004_v39  ;;  %v8579_v16 = vpack.i.bf16 %v4876_v27, %v4875_v54  ;;  %v12305_v5 = vld [vmem:[#allocation29_spill] sm:$0xff] }
 0x7b7   : > { %v8569_v36 = vpack.i.bf16 %v4872_v3, %v4871_v59  ;;  %v12310_v59 = vld [vmem:[#allocation35_spill] sm:$0xff]  ;;  %v12311_v3 = vld [vmem:[#allocation36_spill] sm:$0xff]  ;;  %v12312_v54 = vld [vmem:[#allocation37_spill] sm:$0xff] }
 0x7b8   : > { %8555 = vrot.lane.b32.xlu0 %v8554_v0, %s8884_s15  ;;  %v3952_v56 = vpack.c.bf16 %v3937_v63, %v3936_v62  ;;  %v12306_v63 = vld [vmem:[#allocation43_spill] sm:$0xff]  ;;  %v12307_v0 = vld [vmem:[#allocation33_spill] sm:$0xff] }
 0x7b9   : > { %v8683_v21 = vpop.eup %8682  ;;  %v3391_v62 = vsub.f32 %v12307_v0, %v12306_v63  ;;  %v12316_v63 = vld [vmem:[#allocation2_spill] sm:$0xff] }
 0x7ba   : > { %7456 = vmatprep.mubr.bf16.mxu0 %v3952_v56  ;;  %v3939_v10 = vmul.f32 %v8683_v21, %v12302_v42  ;;  %v4864_v0 = vmul.f32 %v10948_v58, %v12316_v63 }
 0x7bb   : > { %v3420_v56 = vmul.f32 1.442695, %v3391_v62 }
 0x7bc   : > { %8560 = vrot.lane.b32.xlu0 %v8559_v55, %s8884_s15  ;;  %v12309_v55 = vld [vmem:[#allocation34_spill] sm:$0xff] }
 0x7bd   : > { %v8685_v39 = vpop.eup %8684  ;;  %8686 = vpow2.f32 %v3420_v56  ;;  %v4869_v56 = vmul.f32 %v10948_v58, %v10360_v50 }
 0x7be   : > { %v3938_v46 = vmul.f32 %v8685_v39, %v12303_v4  ;;  %v8506_v39 = vpop.permute.xlu0 %8505  ;;  %v11214_v4 = vpop.permute.xlu1 %8510 }
 0x7bf   : > { %v8508_v42 = vunpack.i.h.bf16 %v8506_v39 }
 0x7c0   : > { %8570 = vrot.lane.b32.xlu0 %v8569_v36, %s8884_s15  ;;  %v3953_v48 = vpack.c.bf16 %v3939_v10, %v3938_v46  ;;  %v8507_v10 = vunpack.i.l.bf16 %v8506_v39  ;;  %v12313_v46 = vld [vmem:[#allocation38_spill] sm:$0xff] }
 0x7c2   : > { %7457 = vmatmul.mubr.bf16.vlgmr.msra.gmra.mrb[80].mxu0 %v3953_v48  ;;  %v11218_v36 = vpack.c.bf16 %v8508_v42, %v8507_v10  ;;  %v4874_v42 = vmul.f32 %v10948_v58, %v12297_v15 }
 0x7c3   : > { %7473 = vmatpush3.bf16.msra.mxu0 %v12304_v26  ;;  %v12315_v26 = vld [vmem:[#allocation8_spill] sm:$0xff] }
 0x7c4   : > { %7474 = vmatprep.subr.bf16.mxu0 %v12305_v5  ;;  %8580 = vrot.lane.b32.xlu0 %v8579_v16, %s8884_s15 }
 0x7c7   : > { %7475 = vmatpush3.bf16.msra.mxu0 %v12305_v5  ;;  %v11209_v21 = vpop.eup %8686  ;;  %v4863_v5 = vmul.f32 %v10948_v58, %v12315_v26 }
 0x7c8   : > { %7476 = vmatprep.subr.bf16.mxu0 %v12308_v43  ;;  %4680 = vrot.lane.b32.xlu0 %v8872_v22, %s8885_s16 }
 0x7c9   : > { %v8539_v22 = vpack.i.bf16 %v4864_v0, %v4863_v5 }
 0x7cb   : > { %7477 = vmatpush3.bf16.msra.mxu0 %v12308_v43 }
 0x7cc   : > { %7478 = vmatprep.subr.bf16.mxu0 %v12309_v55 }
 0x7cf   : > { %7479 = vmatpush3.bf16.msra.mxu0 %v12309_v55  ;;  %v4870_v55 = vmul.f32 %v10948_v58, %v10356_v52 }
 0x7d0   : > { %7480 = vmatprep.subr.bf16.mxu0 %v12310_v59 }
 0x7d1   : > { %v8564_v39 = vpack.i.bf16 %v4870_v55, %v4869_v56 }
 0x7d3   : > { %7481 = vmatpush3.bf16.msra.mxu0 %v12310_v59 }
 0x7d4   : > { %7482 = vmatprep.subr.bf16.mxu0 %v12311_v3 }
 0x7d7   : > { %7483 = vmatpush3.bf16.msra.mxu0 %v12311_v3 }
 0x7d8   : > { %7484 = vmatprep.subr.bf16.mxu0 %v12312_v54  ;;  %3452 = vadd.xlane.f32.xlu1 %v11209_v21 }
 0x7db   : > { %7485 = vmatpush3.bf16.msra.mxu0 %v12312_v54  ;;  %v4873_v54 = vmul.f32 %v10948_v58, %v10390_v17 }
 0x7dc   : > { %7486 = vmatprep.subr.bf16.mxu0 %v12313_v46 }
 0x7df   : > { %7487 = vmatpush3.bf16.msra.mxu0 %v12313_v46  ;;  %v11221_v27 = vpop.xlane.xlu1 %3434 }
 0x7e0   : > { %8142 = vmatprep.subr.msk.bf16.mxu0 %vm10442_vm3, %v11218_v36 }
 0x7e3   : > { %v3897_v16 = vpop.xlane.xlu1 %3896 }
 0x7e4   : > { %8688 = vrcp.f32 %v3897_v16  ;;  %v8574_v16 = vpack.i.bf16 %v4874_v42, %v4873_v54 }
 0x7e7   : > { %v3899_v62 = vpop.xlane.xlu0 %3898  ;;  %v3901_v43 = vpop.xlane.xlu1 %3900 }
 0x7e8   : > { %8690 = vrcp.f32 %v3899_v62 }
 0x7e9   : > { %8540 = vrot.lane.b32.xlu1 %v8539_v22, %s8884_s15  ;;  %8692 = vrcp.f32 %v3901_v43 }
 0x7eb   : > { %v3903_v59 = vpop.xlane.xlu0 %3902  ;;  %v3905_v3 = vpop.xlane.xlu1 %3904 }
 0x7ec   : > { %8694 = vrcp.f32 %v3903_v59 }
 0x7ed   : > { %8565 = vrot.lane.b32.xlu1 %v8564_v39, %s8884_s15  ;;  %8696 = vrcp.f32 %v3905_v3 }
 0x7ee   : > { %v8689_v5 = vpop.eup %8688 }
 0x7ef   : > { %v3907_v10 = vpop.xlane.xlu0 %3906  ;;  %v3909_v46 = vpop.xlane.xlu1 %3908  ;;  %v3940_v22 = vmul.f32 %v8689_v5, %v11037_v47 }
 0x7f0   : > { %8698 = vrcp.f32 %v3907_v10 }
 0x7f1   : > { %8575 = vrot.lane.b32.xlu1 %v8574_v16, %s8884_s15  ;;  %8700 = vrcp.f32 %v3909_v46 }
 0x7f2   : > { %v8691_v0 = vpop.eup %8690 }
 0x7f3   : > { %v3911_v62 = vpop.xlane.xlu0 %3910  ;;  %v3913_v43 = vpop.xlane.xlu1 %3912  ;;  %v3941_v56 = vmul.f32 %v8691_v0, %v11043_v6 }
 0x7f4   : > { %v8693_v58 = vpop.eup %8692  ;;  %8702 = vrcp.f32 %v3911_v62 }
 0x7f5   : > { %v3954_v55 = vpack.c.bf16 %v3941_v56, %v3940_v22  ;;  %8704 = vrcp.f32 %v3913_v43  ;;  %v3942_v39 = vmul.f32 %v8693_v58, %v11045_v13 }
 0x7f6   : > { %v8695_v59 = vpop.eup %8694 }
 0x7f7   : > { %v3915_v3 = vpop.xlane.xlu0 %3914  ;;  %7460 = vmatprep.mubr.bf16.mxu0 %v3954_v55  ;;  %v3943_v54 = vmul.f32 %v8695_v59, %v11052_v12  ;;  %v8697_v42 = vpop.eup %8696 }
 0x7f8   : > { %8706 = vrcp.f32 %v3915_v3  ;;  %v3944_v47 = vmul.f32 %v8697_v42, %v11054_v33 }
 0x7f9   : > { %v3955_v10 = vpack.c.bf16 %v3943_v54, %v3942_v39 }
 0x7fa   : > { %v8699_v46 = vpop.eup %8698 }
 0x7fb   : > { %v3919_v16 = vpop.xlane.xlu0 %3918  ;;  %7461 = vmatmul.mubr.bf16.gmra.mrb[84].mxu0 %v3955_v10  ;;  %v3945_v6 = vmul.f32 %v8699_v46, %v11060_v51  ;;  %v8701_v5 = vpop.eup %8700 }
 0x7fc   : > { %v3946_v22 = vmul.f32 %v8701_v5, %v11062_v1  ;;  %v3439_v46 = vpop.xlane.xlu1 %3438 }
 0x7fd   : > { %v3956_v0 = vpack.c.bf16 %v3945_v6, %v3944_v47 }
 0x7fe   : > { %v8703_v62 = vpop.eup %8702 }
 0x7ff   : > { %v3437_v43 = vpop.xlane.xlu0 %3436  ;;  %7464 = vmatprep.mubr.bf16.mxu0 %v3956_v0  ;;  %v3947_v13 = vmul.f32 %v8703_v62, %v11068_v44  ;;  %v8705_v12 = vpop.eup %8704 }
 0x800   : > { %v3948_v59 = vmul.f32 %v8705_v12, %v11070_v7 }
 0x801   : > { %v3957_v56 = vpack.c.bf16 %v3947_v13, %v3946_v22 }
 0x802   : > { %v8707_v58 = vpop.eup %8706 }
 0x803   : > { %v3443_v55 = vpop.xlane.xlu0 %3442  ;;  %7465 = vmatmul.mubr.bf16.gmra.mrb[88].mxu0 %v3957_v56  ;;  %v3949_v33 = vmul.f32 %v8707_v58, %v11078_v18  ;;  %v3441_v18 = vpop.xlane.xlu1 %3440 }
 0x805   : > { %v3958_v3 = vpack.c.bf16 %v3949_v33, %v3948_v59 }
 0x807   : > { %v3445_v51 = vpop.xlane.xlu0 %3444  ;;  %7468 = vmatprep.mubr.bf16.mxu0 %v3958_v3  ;;  %v8516_v56 = vpop.permute.xlu1 %8515  ;;  %v12317_v3 = vld [vmem:[#allocation40_spill] sm:$0xff] }
 0x80b   : > { %v3447_v39 = vpop.xlane.xlu0 %3446 }
 0x80f   : > { %v3449_v54 = vpop.xlane.xlu0 %3448 }
 0x813   : > { %v11251_v42 = vpop.xlane.xlu0 %3450 }
 0x817   : > { %v3455_v10 = vpop.xlane.xlu0 %3454 }
 0x818   : > { %8708 = vrcp.f32 %v3455_v10 }
 0x81b   : > { %v3457_v1 = vpop.xlane.xlu0 %3456 }
 0x81c   : > { %8710 = vrcp.f32 %v3457_v1  ;;  %v12318_v1 = vld [vmem:[#allocation39_spill] sm:$0xff] }
 0x81d   : > { %8712 = vrcp.f32 %v11136_v25 }
 0x81e   : > { %8714 = vrcp.f32 %v11132_v23 }
 0x81f   : > { %v11253_v44 = vpop.permute.xlu0 %8525  ;;  %8716 = vrcp.f32 %v3919_v16 }
 0x822   : > { %v8709_v6 = vpop.eup %8708 }
 0x823   : > { %v8531_v47 = vpop.permute.xlu0 %8530  ;;  %v11256_v22 = vmul.f32 %v8709_v6, %v11121_v40 }
 0x824   : > { %v8533_v5 = vunpack.i.h.bf16 %v8531_v47  ;;  %v8532_v7 = vunpack.i.l.bf16 %v8531_v47 }
 0x826   : > { %v8711_v0 = vpop.eup %8710  ;;  %v8188_v62 = vpack.c.bf16 %v8533_v5, %v8532_v7  ;;  %v12319_v5 = vld [vmem:[#allocation42_spill] sm:$0xff] }
 0x827   : > { %v11259_v13 = vmul.f32 %v8711_v0, %v11124_v20  ;;  %v8713_v20 = vpop.eup %8712 }
 0x828   : > { %8190 = vmatprep.subr.msk.bf16.mxu1 %vm10442_vm3, %v8188_v62  ;;  %v8715_v58 = vpop.eup %8714  ;;  %v3475_v25 = vmul.f32 %v8713_v20, %v12318_v1 }
 0x829   : > { %8193 = vmatpush3.bf16.xpose.msk.msra.mxu1 %vm10442_vm3, %v8188_v62  ;;  %v3497_v12 = vpack.c.bf16 %v11259_v13, %v11256_v22  ;;  %v8717_v59 = vpop.eup %8716  ;;  %v3474_v10 = vmul.f32 %v8715_v58, %v12317_v3  ;;  %v12320_v62 = vld [vmem:[#allocation41_spill] sm:$0xff] }
 0x82a   : > { %v3951_v16 = vmul.f32 %v8717_v59, %v11086_v35  ;;  %v8513_v35 = vunpack.i.h.bf16 %v11214_v4 }
 0x82b   : > { %v3490_v47 = vpack.c.bf16 %v3475_v25, %v3474_v10 }
 0x830   : > { %v3917_v40 = vpop.xlane.xlu1 %3916 }
 0x831   : > { %8718 = vrcp.f32 %v3917_v40 }
 0x832   : > { %8720 = vrcp.f32 %v11146_v38 }
 0x833   : > { %8722 = vrcp.f32 %v3437_v43 }
 0x834   : > { %8724 = vrcp.f32 %v11144_v49 }
 0x835   : > { %8726 = vrcp.f32 %v11221_v27 }
 0x836   : > { %8728 = vrcp.f32 %v3441_v18 }
 0x837   : > { %8730 = vrcp.f32 %v3445_v51  ;;  %v8512_v51 = vunpack.i.l.bf16 %v11214_v4 }
 0x838   : > { %8732 = vrcp.f32 %v3439_v46 }
 0x839   : > { %8734 = vrcp.f32 %v3443_v55  ;;  %v8146_v58 = vpack.c.bf16 %v8513_v35, %v8512_v51 }
 0x83a   : > { %8736 = vrcp.f32 %v3449_v54  ;;  %v8518_v54 = vunpack.i.h.bf16 %v8516_v56 }
 0x83b   : > { %v8719_v33 = vpop.eup %8718  ;;  %8738 = vrcp.f32 %v3447_v39  ;;  %v8517_v39 = vunpack.i.l.bf16 %v8516_v56 }
 0x83c   : > { %v3950_v23 = vmul.f32 %v8719_v33, %v11134_v31  ;;  %v8721_v43 = vpop.eup %8720  ;;  %8740 = vrcp.f32 %v11251_v42 }
 0x83d   : > { %v8723_v49 = vpop.eup %8722  ;;  %v3476_v7 = vmul.f32 %v8721_v43, %v12319_v5 }
 0x83e   : > { %v3959_v38 = vpack.c.bf16 %v3951_v16, %v3950_v23  ;;  %v8725_v27 = vpop.eup %8724  ;;  %v3479_v0 = vmul.f32 %v8723_v49, %v11092_v30  ;;  %v8152_v23 = vpack.c.bf16 %v8518_v54, %v8517_v39  ;;  %v8521_v16 = vpop.permute.xlu1 %8520  ;;  %v8527_v49 = vunpack.i.l.bf16 %v11253_v44 }
 0x83f   : > { %v8727_v6 = vpop.eup %8726  ;;  %v3477_v31 = vmul.f32 %v8725_v27, %v12320_v62 }
 0x840   : > { %7469 = vmatmul.mubr.bf16.gmra.mrb[92].mxu0 %v3959_v38  ;;  %v3478_v46 = vmul.f32 %v8727_v6, %v11032_v37  ;;  %v8729_v40 = vpop.eup %8728  ;;  %v8536_v38 = vpop.permute.xlu0 %8535 }
 0x841   : > { %7488 = vmatprep.mubr.bf16.mxu0 %v3490_v47  ;;  %v3491_v18 = vpack.c.bf16 %v3477_v31, %v3476_v7  ;;  %v8731_v20 = vpop.eup %8730  ;;  %v3481_v4 = vmul.f32 %v8729_v40, %v11084_v8  ;;  %v8528_v47 = vunpack.i.h.bf16 %v11253_v44  ;;  %v8538_v6 = vunpack.i.h.bf16 %v8536_v38 }
 0x842   : > { %v3492_v55 = vpack.c.bf16 %v3479_v0, %v3478_v46  ;;  %v8733_v59 = vpop.eup %8732  ;;  %v3483_v37 = vmul.f32 %v8731_v20, %v11102_v24  ;;  %v8523_v24 = vunpack.i.h.bf16 %v8521_v16  ;;  %v8537_v5 = vunpack.i.l.bf16 %v8536_v38 }
 0x843   : > { %v8735_v30 = vpop.eup %8734  ;;  %v3480_v33 = vmul.f32 %v8733_v59, %v11076_v29  ;;  %v8522_v29 = vunpack.i.l.bf16 %v8521_v16 }
 0x844   : > { %v3482_v3 = vmul.f32 %v8735_v30, %v11097_v41  ;;  %v8737_v1 = vpop.eup %8736  ;;  %v8546_v27 = vpop.permute.xlu0 %8545  ;;  %v8170_v0 = vpack.c.bf16 %v8538_v6, %v8537_v5 }
 0x845   : > { %v3493_v10 = vpack.c.bf16 %v3481_v4, %v3480_v33  ;;  %v3485_v8 = vmul.f32 %v8737_v1, %v11115_v2  ;;  %v8158_v43 = vpack.c.bf16 %v8523_v24, %v8522_v29  ;;  %v8164_v2 = vpack.c.bf16 %v8528_v47, %v8527_v49  ;;  %v12322_v29 = vld [vmem:[#allocation18_spill] sm:$0xff]  ;;  %v12325_v47 = vld [vmem:[#allocation21_spill] sm:$0xff] }
 0x846   : > { %v3494_v25 = vpack.c.bf16 %v3483_v37, %v3482_v3  ;;  %v8547_v40 = vunpack.i.l.bf16 %v8546_v27 }
 0x848   : > { %7489 = vmatmul.mubr.bf16.vlgmr.msra.gmra.mrb[80].mxu0 %v3491_v18  ;;  %v8548_v18 = vunpack.i.h.bf16 %v8546_v27 }
 0x849   : > { %8145 = vmatpush3.bf16.xpose.msk.msra.mxu0 %vm10442_vm3, %v11218_v36  ;;  %7492 = vmatprep.mubr.bf16.mxu0 %v3492_v55  ;;  %v8739_v36 = vpop.eup %8738 }
 0x84a   : > { %8148 = vmatprep.subr.msk.bf16.mxu0 %vm10442_vm3, %v8146_v58  ;;  %v3484_v41 = vmul.f32 %v8739_v36, %v11111_v9  ;;  %v8551_v9 = vpop.permute.xlu0 %8550  ;;  %v8741_v55 = vpop.eup %8740  ;;  %v8176_v30 = vpack.c.bf16 %v8548_v18, %v8547_v40  ;;  %v12335_v18 = vld [vmem:[#allocation27_spill] sm:$0xff]  ;;  %v12336_v40 = vld [vmem:[#allocation28_spill] sm:$0xff] }
 0x84b   : > { %v8553_v31 = vunpack.i.h.bf16 %v8551_v9  ;;  %v8552_v35 = vunpack.i.l.bf16 %v8551_v9  ;;  %v3486_v4 = vmul.f32 %v8741_v55, %v11118_v53  ;;  %v12327_v9 = vld [vmem:[#allocation23_spill] sm:$0xff] }
 0x84c   : > { %v3495_v56 = vpack.c.bf16 %v3485_v8, %v3484_v41  ;;  %v12323_v41 = vld [vmem:[#allocation19_spill] sm:$0xff] }
 0x84d   : > { %v8200_v20 = vpack.c.bf16 %v8553_v31, %v8552_v35  ;;  %v12331_v31 = vld [vmem:[#allocation4_spill] sm:$0xff]  ;;  %v12332_v35 = vld [vmem:[#allocation5_spill] sm:$0xff] }
 0x84e   : > { %v8556_v62 = vpop.permute.xlu0 %8555 }
 0x84f   : > { %v8558_v3 = vunpack.i.h.bf16 %v8556_v62 }
 0x850   : > { %7493 = vmatmul.mubr.bf16.gmra.mrb[84].mxu0 %v3493_v10  ;;  %v8557_v10 = vunpack.i.l.bf16 %v8556_v62 }
 0x851   : > { %8151 = vmatpush3.bf16.xpose.msk.msra.mxu0 %vm10442_vm3, %v8146_v58  ;;  %7496 = vmatprep.mubr.bf16.mxu0 %v3494_v25 }
 0x852   : > { %8154 = vmatprep.subr.msk.bf16.mxu0 %vm10442_vm3, %v8152_v23  ;;  %v8561_v58 = vpop.permute.xlu0 %8560  ;;  %v8182_v53 = vpack.c.bf16 %v8558_v3, %v8557_v10 }
 0x853   : > { %v8563_v54 = vunpack.i.h.bf16 %v8561_v58  ;;  %v8562_v39 = vunpack.i.l.bf16 %v8561_v58 }
 0x855   : > { %v8206_v1 = vpack.c.bf16 %v8563_v54, %v8562_v39 }
 0x856   : > { %v8571_v13 = vpop.permute.xlu0 %8570 }
 0x857   : > { %v8572_v16 = vunpack.i.l.bf16 %v8571_v13 }
 0x858   : > { %7497 = vmatmul.mubr.bf16.gmra.mrb[88].mxu0 %v3495_v56 }
 0x859   : > { %8157 = vmatpush3.bf16.xpose.msk.msra.mxu0 %vm10442_vm3, %v8152_v23  ;;  %v12321_v23 = vld [vmem:[#allocation11_spill] sm:$0xff] }
 0x85a   : > { %8160 = vmatprep.subr.msk.bf16.mxu0 %vm10442_vm3, %v8158_v43  ;;  %v8581_v27 = vpop.permute.xlu0 %8580 }
 0x85b   : > { %v8583_v6 = vunpack.i.h.bf16 %v8581_v27  ;;  %v8582_v5 = vunpack.i.l.bf16 %v8581_v27 }
 0x85d   : > { %v8230_v62 = vpack.c.bf16 %v8583_v6, %v8582_v5 }
 0x861   : > { %8163 = vmatpush3.bf16.xpose.msk.msra.mxu0 %vm10442_vm3, %v8158_v43  ;;  %v12324_v43 = vld [vmem:[#allocation20_spill] sm:$0xff] }
 0x862   : > { %8166 = vmatprep.subr.msk.bf16.mxu0 %vm10442_vm3, %v8164_v2 }
 0x865   : > { %v3453_v7 = vpop.xlane.xlu1 %3452 }
 0x866   : > { %8742 = vrcp.f32 %v3453_v7  ;;  %v12328_v7 = vld [vmem:[#allocation24_spill] sm:$0xff] }
 0x869   : > { %8169 = vmatpush3.bf16.xpose.msk.msra.mxu0 %vm10442_vm3, %v8164_v2  ;;  %v8541_v44 = vpop.permute.xlu1 %8540  ;;  %v12326_v2 = vld [vmem:[#allocation22_spill] sm:$0xff] }
 0x86a   : > { %v8543_v51 = vunpack.i.h.bf16 %v8541_v44  ;;  %v8542_v46 = vunpack.i.l.bf16 %v8541_v44  ;;  %8172 = vmatprep.subr.msk.bf16.mxu0 %vm10442_vm3, %v8170_v0  ;;  %v12330_v44 = vld [vmem:[#allocation3_spill] sm:$0xff] }
 0x86c   : > { %v8194_v42 = vpack.c.bf16 %v8543_v51, %v8542_v46  ;;  %v12333_v51 = vld [vmem:[#allocation10_spill] sm:$0xff] }
 0x86d   : > { %v8566_v25 = vpop.permute.xlu1 %8565  ;;  %v12334_v46 = vld [vmem:[#allocation26_spill] sm:$0xff] }
 0x86e   : > { %8196 = vmatprep.subr.msk.bf16.mxu1 %vm10442_vm3, %v8194_v42  ;;  %v8567_v36 = vunpack.i.l.bf16 %v8566_v25 }
 0x86f   : > { %8199 = vmatpush3.bf16.xpose.msk.msra.mxu1 %vm10442_vm3, %v8194_v42 }
 0x870   : > { %v8743_v59 = vpop.eup %8742  ;;  %8202 = vmatprep.subr.msk.bf16.mxu1 %vm10442_vm3, %v8200_v20 }
 0x871   : > { %8175 = vmatpush3.bf16.xpose.msk.msra.mxu0 %vm10442_vm3, %v8170_v0  ;;  %v3487_v37 = vmul.f32 %v8743_v59, %v11209_v21  ;;  %v8568_v21 = vunpack.i.h.bf16 %v8566_v25  ;;  %v8576_v24 = vpop.permute.xlu1 %8575  ;;  %v12329_v0 = vld [vmem:[#allocation25_spill] sm:$0xff] }
 0x872   : > { %8178 = vmatprep.subr.msk.bf16.mxu0 %vm10442_vm3, %v8176_v30  ;;  %v8578_v56 = vunpack.i.h.bf16 %v8576_v24  ;;  %v8577_v38 = vunpack.i.l.bf16 %v8576_v24 }
 0x873   : > { %v3496_v33 = vpack.c.bf16 %v3487_v37, %v3486_v4  ;;  %v8212_v22 = vpack.c.bf16 %v8568_v21, %v8567_v36 }
 0x874   : > { %v8224_v49 = vpack.c.bf16 %v8578_v56, %v8577_v38 }
 0x875   : > { %7500 = vmatprep.mubr.bf16.mxu0 %v3496_v33 }
 0x876   : > { %7501 = vmatmul.mubr.bf16.gmra.mrb[92].mxu0 %v3497_v12  ;;  %v8573_v12 = vunpack.i.h.bf16 %v8571_v13 }
 0x877   : > { %7536 = vmatprep.mubr.msk.f32.mxu0 %vm421_vm0, %v12321_v23  ;;  %8205 = vmatpush3.bf16.xpose.msk.msra.mxu1 %vm10442_vm3, %v8200_v20 }
 0x878   : > { %8208 = vmatprep.subr.msk.bf16.mxu1 %vm10442_vm3, %v8206_v1  ;;  %v8218_v8 = vpack.c.bf16 %v8573_v12, %v8572_v16 }
 0x879   : > { %8181 = vmatpush3.bf16.xpose.msk.msra.mxu0 %vm10442_vm3, %v8176_v30 }
 0x87a   : > { %8184 = vmatprep.subr.msk.bf16.mxu0 %vm10442_vm3, %v8182_v53 }
 0x87f   : > { %8211 = vmatpush3.bf16.xpose.msk.msra.mxu1 %vm10442_vm3, %v8206_v1 }
 0x880   : > { %8214 = vmatprep.subr.msk.bf16.mxu1 %vm10442_vm3, %v8212_v22 }
 0x881   : > { %8187 = vmatpush3.bf16.xpose.msk.msra.mxu0 %vm10442_vm3, %v8182_v53 }
 0x887   : > { %8217 = vmatpush3.bf16.xpose.msk.msra.mxu1 %vm10442_vm3, %v8212_v22 }
 0x888   : > { %7537 = vmatmul.mubr.msk.f32.vlgmr.msra.gmra.mrb[96].mxu0 %vm421_vm0, %v12322_v29  ;;  %8220 = vmatprep.subr.msk.bf16.mxu1 %vm10442_vm3, %v8218_v8 }
 0x889   : > { %7539 = vmatprep.mubr.msk.f32.mxu0 %vm421_vm0, %v12323_v41 }
 0x88c   : > { %7540 = vmatmul.mubr.msk.f32.gmra.mrb[98].mxu0 %vm421_vm0, %v12324_v43 }
 0x88d   : > { %7542 = vmatprep.mubr.msk.f32.mxu0 %vm421_vm0, %v12325_v47 }
 0x88f   : > { %8223 = vmatpush3.bf16.xpose.msk.msra.mxu1 %vm10442_vm3, %v8218_v8 }
 0x890   : > { %7543 = vmatmul.mubr.msk.f32.gmra.mrb[100].mxu0 %vm421_vm0, %v12326_v2  ;;  %8226 = vmatprep.subr.msk.bf16.mxu1 %vm10442_vm3, %v8224_v49 }
 0x891   : > { %7545 = vmatprep.mubr.msk.f32.mxu0 %vm421_vm0, %v12327_v9 }
 0x894   : > { %7546 = vmatmul.mubr.msk.f32.gmra.mrb[102].mxu0 %vm421_vm0, %v12328_v7 }
 0x895   : > { %7548 = vmatprep.mubr.msk.f32.mxu0 %vm421_vm0, %v12329_v0 }
 0x897   : > { %8229 = vmatpush3.bf16.xpose.msk.msra.mxu1 %vm10442_vm3, %v8224_v49 }
 0x898   : > { %7549 = vmatmul.mubr.msk.f32.gmra.mrb[104].mxu0 %vm421_vm0, %v12330_v44  ;;  %8232 = vmatprep.subr.msk.bf16.mxu1 %vm10442_vm3, %v8230_v62 }
 0x899   : > { %7551 = vmatprep.mubr.msk.f32.mxu0 %vm421_vm0, %v12331_v31 }
 0x89c   : > { %7552 = vmatmul.mubr.msk.f32.gmra.mrb[106].mxu0 %vm421_vm0, %v12332_v35 }
 0x89d   : > { %7554 = vmatprep.mubr.msk.f32.mxu0 %vm421_vm0, %v12333_v51 }
 0x89f   : > { %8235 = vmatpush3.bf16.xpose.msk.msra.mxu1 %vm10442_vm3, %v8230_v62 }
 0x8a0   : > { %7555 = vmatmul.mubr.msk.f32.gmra.mrb[108].mxu0 %vm421_vm0, %v12334_v46 }
 0x8a1   : > { %7557 = vmatprep.mubr.msk.f32.mxu0 %vm421_vm0, %v12335_v18 }
 0x8a4   : > { %7558 = vmatmul.mubr.msk.f32.gmra.mrb[110].mxu0 %vm421_vm0, %v12336_v40 }
 0x8a6   : > { %7625 = vmatmul.mubr.msk.f32.vlgmr.msra.gmra.mrb[16].mxu1 %vm421_vm0, %v12322_v29 }
 0x8a7   : > { %7627 = vmatprep.mubr.msk.f32.mxu1 %vm421_vm0, %v12323_v41 }
 0x8aa   : > { %7628 = vmatmul.mubr.msk.f32.gmra.mrb[18].mxu1 %vm421_vm0, %v12324_v43 }
 0x8ab   : > { %7630 = vmatprep.mubr.msk.f32.mxu1 %vm421_vm0, %v12325_v47 }
 0x8ae   : > { %7631 = vmatmul.mubr.msk.f32.gmra.mrb[20].mxu1 %vm421_vm0, %v12326_v2 }
 0x8af   : > { %7633 = vmatprep.mubr.msk.f32.mxu1 %vm421_vm0, %v12327_v9 }
 0x8b2   : > { %7634 = vmatmul.mubr.msk.f32.gmra.mrb[22].mxu1 %vm421_vm0, %v12328_v7 }
 0x8b3   : > { %7636 = vmatprep.mubr.msk.f32.mxu1 %vm421_vm0, %v12329_v0 }
 0x8b6   : > { %7637 = vmatmul.mubr.msk.f32.gmra.mrb[24].mxu1 %vm421_vm0, %v12330_v44 }
 0x8b7   : > { %7639 = vmatprep.mubr.msk.f32.mxu1 %vm421_vm0, %v12331_v31 }
 0x8ba   : > { %7640 = vmatmul.mubr.msk.f32.gmra.mrb[26].mxu1 %vm421_vm0, %v12332_v35 }
 0x8bb   : > { %7642 = vmatprep.mubr.msk.f32.mxu1 %vm421_vm0, %v12333_v51 }
 0x8be   : > { %7643 = vmatmul.mubr.msk.f32.gmra.mrb[28].mxu1 %vm421_vm0, %v12334_v46  ;;  %v4681_v46 = vpop.permute.xlu0 %4680 }
 0x8bf   : > { %7645 = vmatprep.mubr.msk.f32.mxu1 %vm421_vm0, %v12335_v18 }
 0x8c2   : > { %7646 = vmatmul.mubr.msk.f32.gmra.mrb[30].mxu1 %vm421_vm0, %v12336_v40  ;;  %v4685_v40 = vmul.f32 %v4681_v46, %v12315_v26 }
 0x95b   : > { %v11417_v48 = vpop.f32.mrb[96].mxu0 }
 0x95c   : > { %6052 = vst [vmem:[%s10753_s26 + $0x108] sm:$0xff] %v11417_v48  ;;  %v11421_v42 = vpop.f32.mrb[97].mxu0 }
 0x95d   : > { %6051 = vst [vmem:[%s10753_s26 + $0x100] sm:$0xff] %v11421_v42 }
 0x95f   : > { %v11425_v55 = vpop.f32.mrb[98].mxu0 }
 0x960   : > { %6054 = vst [vmem:[%s10753_s26 + $0x118] sm:$0xff] %v11425_v55  ;;  %v11429_v20 = vpop.f32.mrb[99].mxu0 }
 0x961   : > { %6053 = vst [vmem:[%s10753_s26 + $0x110] sm:$0xff] %v11429_v20 }
 0x963   : > { %v11433_v58 = vpop.f32.mrb[100].mxu0 }
 0x964   : > { %6056 = vst [vmem:[%s10753_s26 + $0x128] sm:$0xff] %v11433_v58  ;;  %v11437_v59 = vpop.f32.mrb[101].mxu0 }
 0x965   : > { %6055 = vst [vmem:[%s10753_s26 + $0x120] sm:$0xff] %v11437_v59 }
 0x967   : > { %v11441_v30 = vpop.f32.mrb[102].mxu0 }
 0x968   : > { %6058 = vst [vmem:[%s10753_s26 + $0x138] sm:$0xff] %v11441_v30  ;;  %v11445_v4 = vpop.f32.mrb[103].mxu0 }
 0x969   : > { %6057 = vst [vmem:[%s10753_s26 + $0x130] sm:$0xff] %v11445_v4 }
 0x96b   : > { %v11449_v37 = vpop.f32.mrb[104].mxu0 }
 0x96c   : > { %6060 = vst [vmem:[%s10753_s26 + $0x148] sm:$0xff] %v11449_v37  ;;  %v11453_v54 = vpop.f32.mrb[105].mxu0 }
 0x96d   : > { %6059 = vst [vmem:[%s10753_s26 + $0x140] sm:$0xff] %v11453_v54 }
 0x96f   : > { %v11457_v39 = vpop.f32.mrb[106].mxu0 }
 0x970   : > { %6062 = vst [vmem:[%s10753_s26 + $0x158] sm:$0xff] %v11457_v39  ;;  %v11461_v33 = vpop.f32.mrb[107].mxu0 }
 0x971   : > { %6061 = vst [vmem:[%s10753_s26 + $0x150] sm:$0xff] %v11461_v33 }
 0x973   : > { %v11465_v3 = vpop.f32.mrb[108].mxu0 }
 0x974   : > { %6064 = vst [vmem:[%s10753_s26 + $0x168] sm:$0xff] %v11465_v3  ;;  %v11469_v10 = vpop.f32.mrb[109].mxu0 }
 0x975   : > { %6063 = vst [vmem:[%s10753_s26 + $0x160] sm:$0xff] %v11469_v10 }
 0x977   : > { %v11473_v1 = vpop.f32.mrb[110].mxu0 }
 0x978   : > { %6066 = vst [vmem:[%s10753_s26 + $0x178] sm:$0xff] %v11473_v1  ;;  %v11477_v25 = vpop.f32.mrb[111].mxu0 }
 0x979   : > { %6065 = vst [vmem:[%s10753_s26 + $0x170] sm:$0xff] %v11477_v25  ;;  %v7626_v23 = vpop.f32.mrb[16].mxu1 }
 0x97a   : > { %6101 = vst [vmem:[%s10753_s26 + $0x188] sm:$0xff] %v7626_v23  ;;  %v5023_v53 = vpop.f32.mrb[17].mxu1  ;;  %v11484_v36 = vsel %vm2997_vm4, %v7626_v23, -1e+30  ;;  %v4686_v23 = vmul.f32 %v4681_v46, %v12316_v63 }
 0x97b   : > { %6100 = vst [vmem:[%s10753_s26 + $0x180] sm:$0xff] %v5023_v53  ;;  %5137 = vmax.xlane.f32.xlu0 %v11484_v36  ;;  %v11490_v22 = vsel %vm2997_vm4, %v5023_v53, -1e+30  ;;  %v8873_v53 = vld [vmem:[%s12100_s7 + $0x3] ss:$0 sm:$0xff] }
 0x97c   : > { %5135 = vmax.xlane.f32.xlu1 %v11490_v22 }
 0x97d   : > { %v7629_v13 = vpop.f32.mrb[18].mxu1 }
 0x97e   : > { %6103 = vst [vmem:[%s10753_s26 + $0x198] sm:$0xff] %v7629_v13  ;;  %v5033_v12 = vpop.f32.mrb[19].mxu1  ;;  %v11504_v29 = vsel %vm2997_vm4, %v7629_v13, -1e+30 }
 0x97f   : > { %6102 = vst [vmem:[%s10753_s26 + $0x190] sm:$0xff] %v5033_v12  ;;  %v11497_v16 = vsel %vm2997_vm4, %v5033_v12, -1e+30  ;;  %v4700_v12 = vpack.c.bf16 %v4686_v23, %v4685_v40  ;;  %v4683_v40 = vmul.f32 %v4681_v46, %v10294_v57  ;;  %v4684_v23 = vmul.f32 %v4681_v46, %v10290_v28 }
 0x980   : > { %5139 = vmax.xlane.f32.xlu1 %v11497_v16 }
 0x981   : > { %v7632_v8 = vpop.f32.mrb[20].mxu1 }
 0x982   : > { %6105 = vst [vmem:[%s10753_s26 + $0x1a8] sm:$0xff] %v7632_v8  ;;  %v5043_v24 = vpop.f32.mrb[21].mxu1  ;;  %v11518_v49 = vsel %vm2997_vm4, %v7632_v8, -1e+30  ;;  %v4689_v8 = vmul.f32 %v4681_v46, %v12298_v11 }
 0x983   : > { %6104 = vst [vmem:[%s10753_s26 + $0x1a0] sm:$0xff] %v5043_v24  ;;  %v11511_v38 = vsel %vm2997_vm4, %v5043_v24, -1e+30  ;;  %v4690_v24 = vmul.f32 %v4681_v46, %v12299_v32 }
 0x984   : > { %5141 = vmax.xlane.f32.xlu1 %v11504_v29 }
 0x985   : > { %v7635_v41 = vpop.f32.mrb[22].mxu1 }
 0x986   : > { %6107 = vst [vmem:[%s10753_s26 + $0x1b8] sm:$0xff] %v7635_v41  ;;  %v5053_v56 = vpop.f32.mrb[23].mxu1  ;;  %v11537_v0 = vsel %vm2997_vm4, %v7635_v41, -1e+30 }
 0x987   : > { %6106 = vst [vmem:[%s10753_s26 + $0x1b0] sm:$0xff] %v5053_v56  ;;  %v11525_v9 = vsel %vm2997_vm4, %v5053_v56, -1e+30  ;;  %v4702_v56 = vpack.c.bf16 %v4690_v24, %v4689_v8  ;;  %v4691_v24 = vmul.f32 %v4681_v46, %v10360_v50 }
 0x988   : > { %5143 = vmax.xlane.f32.xlu1 %v11511_v38 }
 0x989   : > { %v7638_v43 = vpop.f32.mrb[24].mxu1 }
 0x98a   : > { %6109 = vst [vmem:[%s10753_s26 + $0x1c8] sm:$0xff] %v7638_v43  ;;  %v5063_v47 = vpop.f32.mrb[25].mxu1  ;;  %v11549_v35 = vsel %vm2997_vm4, %v7638_v43, -1e+30  ;;  %v4693_v43 = vmul.f32 %v4681_v46, %v10375_v14 }
 0x98b   : > { %6108 = vst [vmem:[%s10753_s26 + $0x1c0] sm:$0xff] %v5063_v47  ;;  %v11544_v31 = vsel %vm2997_vm4, %v5063_v47, -1e+30  ;;  %v4694_v47 = vmul.f32 %v4681_v46, %v10371_v34 }
 0x98c   : > { %5145 = vmax.xlane.f32.xlu1 %v11518_v49 }
 0x98d   : > { %v7641_v27 = vpop.f32.mrb[26].mxu1 }
 0x98e   : > { %6111 = vst [vmem:[%s10753_s26 + $0x1d8] sm:$0xff] %v7641_v27  ;;  %v5073_v2 = vpop.f32.mrb[27].mxu1  ;;  %v11554_v51 = vsel %vm2997_vm4, %v7641_v27, -1e+30 }
 0x98f   : > { %6110 = vst [vmem:[%s10753_s26 + $0x1d0] sm:$0xff] %v5073_v2  ;;  %v11529_v6 = vsel %vm2997_vm4, %v5073_v2, -1e+30  ;;  %v4704_v2 = vpack.c.bf16 %v4694_v47, %v4693_v43  ;;  %v4695_v47 = vmul.f32 %v4681_v46, %v10390_v17 }
 0x990   : > { %5147 = vmax.xlane.f32.xlu1 %v11525_v9  ;;  %5155 = vmax.xlane.f32.xlu0 %v11529_v6 }
 0x991   : > { %v7644_v5 = vpop.f32.mrb[28].mxu1 }
 0x992   : > { %6113 = vst [vmem:[%s10753_s26 + $0x1e8] sm:$0xff] %v7644_v5  ;;  %v5083_v7 = vpop.f32.mrb[29].mxu1  ;;  %v11570_v13 = vsel %vm2997_vm4, %v7644_v5, -1e+30  ;;  %v4697_v5 = vmul.f32 %v4681_v46, %v12300_v19 }
 0x993   : > { %6112 = vst [vmem:[%s10753_s26 + $0x1e0] sm:$0xff] %v5083_v7  ;;  %v11559_v18 = vsel %vm2997_vm4, %v5083_v7, -1e+30  ;;  %v4698_v7 = vmul.f32 %v4681_v46, %v12301_v61 }
 0x994   : > { %5149 = vmax.xlane.f32.xlu1 %v11537_v0  ;;  %12338 = vst [vmem:[#allocation13_spill] sm:$0xff] %v11559_v18 }
 0x995   : > { %v7647_v62 = vpop.f32.mrb[30].mxu1 }
 0x996   : > { %6115 = vst [vmem:[%s10753_s26 + $0x1f8] sm:$0xff] %v7647_v62  ;;  %v5093_v44 = vpop.f32.mrb[31].mxu1  ;;  %v11586_v27 = vsel %vm2997_vm4, %v7647_v62, -1e+30  ;;  %v4687_v62 = vmul.f32 %v4681_v46, %v10330_v45 }
 0x997   : > { %6114 = vst [vmem:[%s10753_s26 + $0x1f0] sm:$0xff] %v5093_v44  ;;  %v11578_v41 = vsel %vm2997_vm4, %v5093_v44, -1e+30  ;;  %12339 = vst [vmem:[#allocation12_spill] sm:$0xff] %v11586_v27  ;;  %v4706_v44 = vpack.c.bf16 %v4698_v7, %v4697_v5 }
 0x998   : > { %5151 = vmax.xlane.f32.xlu1 %v11544_v31 }
 0x99c   : > { %5153 = vmax.xlane.f32.xlu1 %v11549_v35 }
 0x9a0   : > { %5157 = vmax.xlane.f32.xlu1 %v11554_v51 }
 0x9a4   : > { %5159 = vmax.xlane.f32.xlu1 %v11559_v18 }
 0x9a6   : > { %5287 = vrot.lane.b32.xlu0 %v8873_v53, %s8885_s16  ;;  %v4699_v53 = vpack.c.bf16 %v4684_v23, %v4683_v40 }
 0x9a8   : > { %5161 = vmax.xlane.f32.xlu1 %v11570_v13 }
 0x9aa   : > { %4717 = vrot.lane.b32.xlu0 %v4700_v12, %s8885_s16  ;;  %v4688_v12 = vmul.f32 %v4681_v46, %v10326_v60 }
 0x9ac   : > { %5163 = vmax.xlane.f32.xlu1 %v11578_v41  ;;  %v4701_v8 = vpack.c.bf16 %v4688_v12, %v4687_v62 }
 0x9ae   : > { %4721 = vrot.lane.b32.xlu0 %v4702_v56, %s8885_s16  ;;  %v4692_v56 = vmul.f32 %v4681_v46, %v10356_v52 }
 0x9b0   : > { %5165 = vmax.xlane.f32.xlu1 %v11586_v27  ;;  %v4703_v43 = vpack.c.bf16 %v4692_v56, %v4691_v24 }
 0x9b2   : > { %4725 = vrot.lane.b32.xlu0 %v4704_v2, %s8885_s16  ;;  %v4696_v2 = vmul.f32 %v4681_v46, %v12297_v15 }
 0x9b4   : > { %v4705_v5 = vpack.c.bf16 %v4696_v2, %v4695_v47 }
 0x9b6   : > { %4729 = vrot.lane.b32.xlu0 %v4706_v44, %s8885_s16 }
 0x9c1   : > { %4715 = vrot.lane.b32.xlu1 %v4699_v53, %s8885_s16 }
 0x9c5   : > { %4719 = vrot.lane.b32.xlu1 %v4701_v8, %s8885_s16 }
 0x9c9   : > { %4723 = vrot.lane.b32.xlu1 %v4703_v43, %s8885_s16 }
 0x9cd   : > { %4727 = vrot.lane.b32.xlu1 %v4705_v5, %s8885_s16 }
 0xa08   : > { %v5138_v7 = vpop.xlane.xlu0 %5137 }
 0xa09   : > { %v5168_v44 = vsub.f32 %v11484_v36, %v5138_v7  ;;  %v5136_v40 = vpop.xlane.xlu1 %5135 }
 0xa0b   : > { %v5185_v23 = vmul.f32 1.442695, %v5168_v44 }
 0xa0d   : > { %8744 = vpow2.f32 %v5185_v23  ;;  %v5140_v53 = vpop.xlane.xlu1 %5139 }
 0xa0e   : > { %v5169_v62 = vsub.f32 %v11497_v16, %v5140_v53 }
 0xa10   : > { %v5187_v12 = vmul.f32 1.442695, %v5169_v62 }
 0xa11   : > { %v5142_v8 = vpop.xlane.xlu1 %5141 }
 0xa12   : > { %8746 = vpow2.f32 %v5187_v12  ;;  %v5170_v61 = vsub.f32 %v11504_v29, %v5142_v8 }
 0xa15   : > { %v11607_v24 = vpop.xlane.xlu1 %5143 }
 0xa17   : > { %v11609_v46 = vpop.eup %8744 }
 0xa18   : > { %5217 = vadd.xlane.f32.xlu0 %v11609_v46 }
 0xa19   : > { %v5146_v56 = vpop.xlane.xlu1 %5145 }
 0xa1c   : > { %v11612_v43 = vpop.eup %8746 }
 0xa1d   : > { %v5148_v47 = vpop.xlane.xlu1 %5147  ;;  %5219 = vadd.xlane.f32.xlu0 %v11612_v43  ;;  %v11615_v36 = vpop.xlane.xlu0 %5155 }
 0xa21   : > { %v11617_v2 = vpop.xlane.xlu1 %5149  ;;  %v11619_v16 = vpop.permute.xlu0 %5287 }
 0xa22   : > { %v5290_v5 = vmul.f32 %v11619_v16, %v10294_v57  ;;  %v5291_v7 = vmul.f32 %v11619_v16, %v10290_v28  ;;  %v5292_v12 = vmul.f32 %v11619_v16, %v12315_v26  ;;  %v5293_v27 = vmul.f32 %v11619_v16, %v12316_v63 }
 0xa23   : > { %v5189_v26 = vmul.f32 1.442695, %v5170_v61  ;;  %v5172_v63 = vsub.f32 %v11518_v49, %v5146_v56  ;;  %v5294_v8 = vmul.f32 %v11619_v16, %v10330_v45  ;;  %v5295_v56 = vmul.f32 %v11619_v16, %v10326_v60 }
 0xa24   : > { %v5306_v44 = vpack.c.bf16 %v5291_v7, %v5290_v5  ;;  %v5307_v57 = vpack.c.bf16 %v5293_v27, %v5292_v12  ;;  %v5167_v7 = vsub.f32 %v11490_v22, %v5136_v40 }
 0xa25   : > { %v11625_v23 = vpop.xlane.xlu1 %5151  ;;  %v5193_v27 = vmul.f32 1.442695, %v5172_v63  ;;  %v4718_v12 = vpop.permute.xlu0 %4717 }
 0xa26   : > { %5322 = vrot.lane.b32.xlu1 %v5306_v44, %s8885_s16  ;;  %v5183_v28 = vmul.f32 1.442695, %v5167_v7  ;;  %v5308_v7 = vpack.c.bf16 %v5295_v56, %v5294_v8  ;;  %v11684_v8 = vsel %vm2997_vm4, %v11417_v48, -1e+30  ;;  %v11787_v56 = vsel %vm2997_vm4, %v11477_v25, -1e+30 }
 0xa27   : > { %v5175_v25 = vsub.f32 %v11544_v31, %v11625_v23 }
 0xa28   : > { %8748 = vpow2.f32 %v5183_v28 }
 0xa29   : > { %v11628_v53 = vpop.xlane.xlu1 %5153  ;;  %8750 = vpow2.f32 %v5189_v26  ;;  %v4722_v28 = vpop.permute.xlu0 %4721 }
 0xa2a   : > { %8752 = vpow2.f32 %v5193_v27  ;;  %v5296_v27 = vmul.f32 %v11619_v16, %v12298_v11  ;;  %v5176_v48 = vsub.f32 %v11549_v35, %v11628_v53  ;;  %v11724_v35 = vsel %vm2997_vm4, %v11441_v30, -1e+30 }
 0xa2b   : > { %v11739_v30 = vsel %vm2997_vm4, %v11449_v37, -1e+30  ;;  %v11756_v37 = vsel %vm2997_vm4, %v11461_v33, -1e+30  ;;  %v11774_v33 = vsel %vm2997_vm4, %v11469_v10, -1e+30  ;;  %v5300_v10 = vmul.f32 %v11619_v16, %v10375_v14 }
 0xa2d   : > { %v11630_v62 = vpop.xlane.xlu1 %5157  ;;  %v4726_v63 = vpop.permute.xlu0 %4725 }
 0xa31   : > { %v11636_v18 = vpop.xlane.xlu1 %5159 }
 0xa32   : > { %v11649_v29 = vpop.eup %8748 }
 0xa33   : > { %5324 = vrot.lane.b32.xlu0 %v5307_v57, %s8885_s16  ;;  %v5173_v57 = vsub.f32 %v11525_v9, %v5148_v47  ;;  %v11652_v61 = vpop.eup %8750  ;;  %v4730_v47 = vpop.permute.xlu0 %4729 }
 0xa35   : > { %v11639_v5 = vpop.xlane.xlu1 %5161  ;;  %v5195_v22 = vmul.f32 1.442695, %v5173_v57  ;;  %v5297_v57 = vmul.f32 %v11619_v16, %v12299_v32 }
 0xa37   : > { %8754 = vpow2.f32 %v5195_v22  ;;  %v5171_v22 = vsub.f32 %v11511_v38, %v11607_v24  ;;  %v11689_v38 = vsel %vm2997_vm4, %v11421_v42, -1e+30  ;;  %v11701_v24 = vsel %vm2997_vm4, %v11429_v20, -1e+30 }
 0xa38   : > { %v11710_v42 = vsel %vm2997_vm4, %v11433_v58, -1e+30  ;;  %v5177_v20 = vsub.f32 %v11529_v6, %v11615_v36  ;;  %v11729_v58 = vsel %vm2997_vm4, %v11445_v4, -1e+30  ;;  %v11744_v4 = vsel %vm2997_vm4, %v11453_v54, -1e+30 }
 0xa39   : > { %v11642_v44 = vpop.xlane.xlu1 %5163  ;;  %v11751_v6 = vsel %vm2997_vm4, %v11457_v39, -1e+30  ;;  %v11765_v36 = vsel %vm2997_vm4, %v11465_v3, -1e+30  ;;  %v11781_v3 = vsel %vm2997_vm4, %v11473_v1, -1e+30  ;;  %v5299_v1 = vmul.f32 %v11619_v16, %v10356_v52 }
 0xa3d   : > { %v11645_v19 = vpop.xlane.xlu1 %5165 }
 0xa41   : > { %v4716_v15 = vpop.permute.xlu1 %4715 }
 0xa42   : > { %7560 = vmatprep.subr.bf16.mxu0 %v4716_v15 }
 0xa43   : > { %7561 = vmatpush3.bf16.msra.mxu0 %v4716_v15  ;;  %v11655_v15 = vpop.eup %8752 }
 0xa44   : > { %7562 = vmatprep.subr.bf16.mxu0 %v4718_v12  ;;  %v11658_v49 = vpop.eup %8754 }
 0xa45   : > { %v4720_v40 = vpop.permute.xlu1 %4719 }
 0xa47   : > { %7563 = vmatpush3.bf16.msra.mxu0 %v4718_v12  ;;  %v5309_v12 = vpack.c.bf16 %v5297_v57, %v5296_v27 }
 0xa48   : > { %7564 = vmatprep.subr.bf16.mxu0 %v4720_v40 }
 0xa49   : > { %v4724_v26 = vpop.permute.xlu1 %4723 }
 0xa4a   : > { %5215 = vadd.xlane.f32.xlu1 %v11649_v29 }
 0xa4b   : > { %7565 = vmatpush3.bf16.msra.mxu0 %v4720_v40  ;;  %v5191_v40 = vmul.f32 1.442695, %v5171_v22  ;;  %v5178_v22 = vsub.f32 %v11554_v51, %v11630_v62 }
 0xa4c   : > { %7566 = vmatprep.subr.bf16.mxu0 %v4722_v28 }
 0xa4d   : > { %v4728_v9 = vpop.permute.xlu1 %4727  ;;  %8756 = vpow2.f32 %v5191_v40 }
 0xa4e   : > { %5221 = vadd.xlane.f32.xlu1 %v11652_v61 }
 0xa4f   : > { %7567 = vmatpush3.bf16.msra.mxu0 %v4722_v28  ;;  %v5174_v28 = vsub.f32 %v11537_v0, %v11617_v2  ;;  %v11696_v0 = vsel %vm2997_vm4, %v11425_v55, -1e+30  ;;  %v11715_v55 = vsel %vm2997_vm4, %v11437_v59, -1e+30  ;;  %v5201_v2 = vmul.f32 1.442695, %v5176_v48 }
 0xa50   : > { %7568 = vmatprep.subr.bf16.mxu0 %v4724_v26  ;;  %v5203_v59 = vmul.f32 1.442695, %v5177_v20 }
 0xa52   : > { %5225 = vadd.xlane.f32.xlu0 %v11655_v15 }
 0xa53   : > { %7569 = vmatpush3.bf16.msra.mxu0 %v4724_v26  ;;  %v5197_v26 = vmul.f32 1.442695, %v5174_v28 }
 0xa54   : > { %7570 = vmatprep.subr.bf16.mxu0 %v4726_v63 }
 0xa55   : > { %8758 = vpow2.f32 %v5197_v26  ;;  %v5205_v26 = vmul.f32 1.442695, %v5178_v22 }
 0xa56   : > { %5227 = vadd.xlane.f32.xlu0 %v11658_v49  ;;  %8760 = vpow2.f32 %v5201_v2 }
 0xa57   : > { %7571 = vmatpush3.bf16.msra.mxu0 %v4726_v63  ;;  %v11675_v63 = vpop.eup %8756  ;;  %8762 = vpow2.f32 %v5203_v59 }
 0xa58   : > { %7572 = vmatprep.subr.bf16.mxu0 %v4728_v9 }
 0xa5b   : > { %7573 = vmatpush3.bf16.msra.mxu0 %v4728_v9 }
 0xa5c   : > { %7574 = vmatprep.subr.bf16.mxu0 %v4730_v47 }
 0xa5f   : > { %5326 = vrot.lane.b32.xlu1 %v5308_v7, %s8885_s16  ;;  %7575 = vmatpush3.bf16.msra.mxu0 %v4730_v47  ;;  %v11678_v9 = vpop.eup %8758  ;;  %v5301_v47 = vmul.f32 %v11619_v16, %v10371_v34  ;;  %v5298_v7 = vmul.f32 %v11619_v16, %v10360_v50 }
 0xa60   : > { %v11760_v54 = vpop.eup %8760 }
 0xa61   : > { %v11769_v39 = vpop.eup %8762  ;;  %v5311_v27 = vpack.c.bf16 %v5301_v47, %v5300_v10  ;;  %v5310_v21 = vpack.c.bf16 %v5299_v1, %v5298_v7 }
 0xa6c   : > { %5328 = vrot.lane.b32.xlu0 %v5309_v12, %s8885_s16  ;;  %v5199_v12 = vmul.f32 1.442695, %v5175_v25 }
 0xa83   : > { %5223 = vadd.xlane.f32.xlu1 %v11675_v63 }
 0xa87   : > { %5229 = vadd.xlane.f32.xlu1 %v11678_v9 }
 0xa8b   : > { %4530 = vmax.xlane.f32.xlu0 %v11684_v8  ;;  %4528 = vmax.xlane.f32.xlu1 %v11689_v38 }
 0xa8f   : > { %4534 = vmax.xlane.f32.xlu1 %v11696_v0  ;;  %4532 = vmax.xlane.f32.xlu0 %v11701_v24 }
 0xa93   : > { %4538 = vmax.xlane.f32.xlu1 %v11710_v42  ;;  %4536 = vmax.xlane.f32.xlu0 %v11715_v55 }
 0xa97   : > { %4542 = vmax.xlane.f32.xlu1 %v11724_v35  ;;  %4540 = vmax.xlane.f32.xlu0 %v11729_v58 }
 0xa98   : > { %v11733_v53 = vpop.permute.xlu1 %5322 }
 0xa99   : > { %7648 = vmatprep.subr.bf16.mxu0 %v11733_v53 }
 0xa9b   : > { %4546 = vmax.xlane.f32.xlu1 %v11739_v30  ;;  %4544 = vmax.xlane.f32.xlu0 %v11744_v4 }
 0xa9f   : > { %4550 = vmax.xlane.f32.xlu1 %v11751_v6  ;;  %4548 = vmax.xlane.f32.xlu0 %v11756_v37 }
 0xaa3   : > { %5233 = vadd.xlane.f32.xlu0 %v11760_v54  ;;  %4554 = vmax.xlane.f32.xlu1 %v11765_v36 }
 0xaa5   : > { %v5218_v57 = vpop.xlane.xlu0 %5217 }
 0xaa6   : > { %8764 = vrcp.f32 %v5218_v57 }
 0xaa7   : > { %5235 = vadd.xlane.f32.xlu0 %v11769_v39  ;;  %4552 = vmax.xlane.f32.xlu1 %v11774_v33 }
 0xaaa   : > { %v5220_v40 = vpop.xlane.xlu0 %5219 }
 0xaab   : > { %4558 = vmax.xlane.f32.xlu1 %v11781_v3 }
 0xaaf   : > { %4556 = vmax.xlane.f32.xlu1 %v11787_v56 }
 0xab0   : > { %v8765_v20 = vpop.eup %8764 }
 0xab1   : > { %v11810_v23 = vmul.f32 %v8765_v20, %v11609_v46 }
 0xabd   : > { %5332 = vrot.lane.b32.xlu0 %v5311_v27, %s8885_s16 }
 0xac0   : > { %5330 = vrot.lane.b32.xlu1 %v5310_v21, %s8885_s16 }
 0xad7   : > { %v5216_v28 = vpop.xlane.xlu1 %5215 }
 0xad8   : > { %8766 = vrcp.f32 %v5216_v28 }
 0xad9   : > { %8768 = vpow2.f32 %v5199_v12 }
 0xada   : > { %8770 = vrcp.f32 %v5220_v40 }
 0xadb   : > { %v5222_v48 = vpop.xlane.xlu1 %5221 }
 0xadc   : > { %8772 = vrcp.f32 %v5222_v48 }
 0xadd   : > { %8774 = vpow2.f32 %v5205_v26 }
 0xadf   : > { %v11828_v21 = vpop.permute.xlu1 %5326 }
 0xae2   : > { %v8767_v2 = vpop.eup %8766 }
 0xae3   : > { %v11804_v59 = vpop.eup %8768  ;;  %v11807_v31 = vmul.f32 %v8767_v2, %v11649_v29  ;;  %v11826_v29 = vpop.permute.xlu0 %5324 }
 0xae4   : > { %v8771_v51 = vpop.eup %8770  ;;  %5231 = vadd.xlane.f32.xlu1 %v11804_v59 }
 0xae5   : > { %v11818_v7 = vmul.f32 %v8771_v51, %v11612_v43 }
 0xae6   : > { %v8773_v10 = vpop.eup %8772 }
 0xae7   : > { %v11815_v47 = vpop.eup %8774  ;;  %v11821_v1 = vmul.f32 %v8773_v10, %v11652_v61  ;;  %v5226_v27 = vpop.xlane.xlu0 %5225 }
 0xae8   : > { %5237 = vadd.xlane.f32.xlu1 %v11815_v47  ;;  %8776 = vrcp.f32 %v5226_v27 }
 0xaeb   : > { %v5228_v25 = vpop.xlane.xlu0 %5227 }
 0xaef   : > { %v11830_v43 = vpop.permute.xlu0 %5328 }
 0xaf2   : > { %v8777_v40 = vpop.eup %8776 }
 0xb10   : > { %v5224_v57 = vpop.xlane.xlu1 %5223 }
 0xb11   : > { %8778 = vrcp.f32 %v5224_v57 }
 0xb12   : > { %8780 = vrcp.f32 %v5228_v25  ;;  %v11838_v25 = vmul.f32 %v8777_v40, %v11655_v15 }
 0xb14   : > { %v5230_v12 = vpop.xlane.xlu1 %5229 }
 0xb15   : > { %8782 = vrcp.f32 %v5230_v12 }
 0xb18   : > { %v4531_v61 = vpop.xlane.xlu0 %4530  ;;  %v4529_v22 = vpop.xlane.xlu1 %4528 }
 0xb19   : > { %v4561_v28 = vsub.f32 %v11684_v8, %v4531_v61  ;;  %v4560_v26 = vsub.f32 %v11689_v38, %v4529_v22 }
 0xb1b   : > { %v8779_v48 = vpop.eup %8778  ;;  %v4578_v20 = vmul.f32 1.442695, %v4561_v28  ;;  %v4576_v2 = vmul.f32 1.442695, %v4560_v26 }
 0xb1c   : > { %v4535_v51 = vpop.xlane.xlu1 %4534  ;;  %v4533_v10 = vpop.xlane.xlu0 %4532  ;;  %v11835_v27 = vmul.f32 %v8779_v48, %v11675_v63 }
 0xb1d   : > { %v8781_v57 = vpop.eup %8780  ;;  %8784 = vpow2.f32 %v4578_v20  ;;  %v4563_v12 = vsub.f32 %v11696_v0, %v4535_v51  ;;  %v4562_v8 = vsub.f32 %v11701_v24, %v4533_v10 }
 0xb1e   : > { %8786 = vpow2.f32 %v4576_v2  ;;  %v11845_v63 = vmul.f32 %v8781_v57, %v11658_v49 }
 0xb1f   : > { %v8783_v61 = vpop.eup %8782  ;;  %v4582_v22 = vmul.f32 1.442695, %v4563_v12  ;;  %v4580_v0 = vmul.f32 1.442695, %v4562_v8 }
 0xb20   : > { %v4539_v28 = vpop.xlane.xlu1 %4538  ;;  %v4537_v26 = vpop.xlane.xlu0 %4536  ;;  %v11848_v15 = vmul.f32 %v8783_v61, %v11678_v9 }
 0xb21   : > { %8788 = vpow2.f32 %v4582_v22  ;;  %v4565_v40 = vsub.f32 %v11710_v42, %v4539_v28  ;;  %v4564_v48 = vsub.f32 %v11715_v55, %v4537_v26 }
 0xb23   : > { %v4586_v20 = vmul.f32 1.442695, %v4565_v40  ;;  %v4584_v49 = vmul.f32 1.442695, %v4564_v48 }
 0xb24   : > { %v4543_v2 = vpop.xlane.xlu1 %4542  ;;  %v4541_v51 = vpop.xlane.xlu0 %4540 }
 0xb25   : > { %8790 = vpow2.f32 %v4586_v20  ;;  %v4567_v10 = vsub.f32 %v11724_v35, %v4543_v2  ;;  %v4566_v61 = vsub.f32 %v11729_v58, %v4541_v51 }
 0xb26   : > { %8792 = vpow2.f32 %v4580_v0 }
 0xb27   : > { %v11855_v57 = vpop.eup %8784  ;;  %v4590_v55 = vmul.f32 1.442695, %v4567_v10  ;;  %8794 = vpow2.f32 %v4584_v49  ;;  %v4588_v40 = vmul.f32 1.442695, %v4566_v61 }
 0xb28   : > { %v11857_v9 = vpop.eup %8786  ;;  %v4547_v12 = vpop.xlane.xlu1 %4546  ;;  %4610 = vadd.xlane.f32.xlu1 %v11855_v57 }
 0xb29   : > { %v4545_v42 = vpop.xlane.xlu0 %4544  ;;  %4608 = vadd.xlane.f32.xlu0 %v11857_v9  ;;  %8796 = vpow2.f32 %v4590_v55  ;;  %v4569_v0 = vsub.f32 %v11739_v30, %v4547_v12 }
 0xb2a   : > { %v4568_v8 = vsub.f32 %v11744_v4, %v4545_v42 }
 0xb2b   : > { %v11863_v22 = vpop.eup %8788 }
 0xb2c   : > { %v4592_v35 = vmul.f32 1.442695, %v4568_v8  ;;  %v4551_v28 = vpop.xlane.xlu1 %4550 }
 0xb2d   : > { %v4571_v26 = vsub.f32 %v11751_v6, %v4551_v28  ;;  %4614 = vadd.xlane.f32.xlu0 %v11863_v22  ;;  %v4549_v20 = vpop.xlane.xlu0 %4548  ;;  %v4594_v6 = vmul.f32 1.442695, %v4569_v0 }
 0xb2e   : > { %8798 = vpow2.f32 %v4592_v35  ;;  %v4570_v51 = vsub.f32 %v11756_v37, %v4549_v20 }
 0xb2f   : > { %v11868_v48 = vpop.eup %8790  ;;  %v4598_v4 = vmul.f32 1.442695, %v4571_v26 }
 0xb30   : > { %v11870_v2 = vpop.eup %8792  ;;  %v4555_v58 = vpop.xlane.xlu1 %4554  ;;  %4618 = vadd.xlane.f32.xlu1 %v11868_v48  ;;  %v4596_v12 = vmul.f32 1.442695, %v4570_v51 }
 0xb31   : > { %8800 = vpow2.f32 %v4598_v4  ;;  %4612 = vadd.xlane.f32.xlu0 %v11870_v2  ;;  %v11875_v10 = vpop.eup %8794  ;;  %v4573_v42 = vsub.f32 %v11765_v36, %v4555_v58 }
 0xb32   : > { %8802 = vpow2.f32 %v4588_v40 }
 0xb33   : > { %8804 = vpow2.f32 %v4594_v6  ;;  %v11880_v55 = vpop.eup %8796  ;;  %v4602_v28 = vmul.f32 1.442695, %v4573_v42 }
 0xb34   : > { %v4553_v30 = vpop.xlane.xlu1 %4552 }
 0xb35   : > { %4616 = vadd.xlane.f32.xlu0 %v11875_v10  ;;  %v4572_v49 = vsub.f32 %v11774_v33, %v4553_v30  ;;  %v5180_v33 = vsub.f32 %v11570_v13, %v11639_v5  ;;  %v5181_v13 = vsub.f32 %v11578_v41, %v11642_v44 }
 0xb37   : > { %v4600_v8 = vmul.f32 1.442695, %v4572_v49  ;;  %v5209_v4 = vmul.f32 1.442695, %v5180_v33  ;;  %v5211_v51 = vmul.f32 1.442695, %v5181_v13  ;;  %v5302_v49 = vmul.f32 %v11619_v16, %v10390_v17  ;;  %v5234_v13 = vpop.xlane.xlu0 %5233 }
 0xb38   : > { %v11882_v61 = vpop.eup %8798  ;;  %v4559_v35 = vpop.xlane.xlu1 %4558 }
 0xb39   : > { %8806 = vpow2.f32 %v4600_v8  ;;  %4622 = vadd.xlane.f32.xlu0 %v11880_v55  ;;  %v4575_v37 = vsub.f32 %v11781_v3, %v4559_v35  ;;  %4624 = vadd.xlane.f32.xlu1 %v11882_v61 }
 0xb3a   : > { %8808 = vpow2.f32 %v4596_v12  ;;  %v12340_v12 = vld [vmem:[#allocation14_spill] sm:$0xff] }
 0xb3b   : > { %v11889_v26 = vpop.eup %8800  ;;  %v4606_v36 = vmul.f32 1.442695, %v4575_v37  ;;  %v5303_v42 = vmul.f32 %v11619_v16, %v12340_v12  ;;  %v12341_v37 = vld [vmem:[#allocation16_spill] sm:$0xff] }
 0xb3c   : > { %v11891_v40 = vpop.eup %8802  ;;  %v4557_v0 = vpop.xlane.xlu1 %4556  ;;  %v5304_v33 = vmul.f32 %v11619_v16, %v12341_v37 }
 0xb3d   : > { %8810 = vpow2.f32 %v4606_v36  ;;  %4620 = vadd.xlane.f32.xlu0 %v11891_v40  ;;  %4630 = vadd.xlane.f32.xlu1 %v11889_v26  ;;  %v4574_v3 = vsub.f32 %v11787_v56, %v4557_v0  ;;  %v11896_v20 = vpop.eup %8804  ;;  %v5312_v35 = vpack.c.bf16 %v5303_v42, %v5302_v49  ;;  %v12343_v0 = vld [vmem:[#allocation13_spill] sm:$0xff] }
 0xb3e   : > { %8812 = vpow2.f32 %v4602_v28  ;;  %v12342_v28 = vld [vmem:[#allocation15_spill] sm:$0xff] }
 0xb3f   : > { %8814 = vpow2.f32 %v5209_v4  ;;  %v4604_v5 = vmul.f32 1.442695, %v4574_v3  ;;  %v5305_v36 = vmul.f32 %v11619_v16, %v12342_v28  ;;  %v5179_v4 = vsub.f32 %v12343_v0, %v11636_v18 }
 0xb40   : > { %v11936_v49 = vpop.permute.xlu1 %5330 }
 0xb41   : > { %4626 = vadd.xlane.f32.xlu0 %v11896_v20  ;;  %8816 = vpow2.f32 %v4604_v5  ;;  %v5313_v3 = vpack.c.bf16 %v5305_v36, %v5304_v33  ;;  %v5207_v5 = vmul.f32 1.442695, %v5179_v4 }
 0xb42   : > { %8818 = vpow2.f32 %v5211_v51  ;;  %v12344_v51 = vld [vmem:[#allocation12_spill] sm:$0xff] }
 0xb43   : > { %v11901_v58 = vpop.eup %8806  ;;  %v5182_v24 = vsub.f32 %v12344_v51, %v11645_v19  ;;  %8820 = vrcp.f32 %v5234_v13  ;;  %v5500_v51 = vld [vmem:[%s12101_s8 + $0x8] sm:$0xff] }
 0xb44   : > { %v11903_v6 = vpop.eup %8808  ;;  %4632 = vadd.xlane.f32.xlu1 %v11901_v58  ;;  %8822 = vpow2.f32 %v5207_v5 }
 0xb45   : > { %4628 = vadd.xlane.f32.xlu0 %v11903_v6  ;;  %v5213_v42 = vmul.f32 1.442695, %v5182_v24 }
 0xb47   : > { %v11907_v56 = vpop.eup %8810 }
 0xb48   : > { %v11909_v30 = vpop.eup %8812  ;;  %4638 = vadd.xlane.f32.xlu1 %v11907_v56 }
 0xb49   : > { %4634 = vadd.xlane.f32.xlu0 %v11909_v30  ;;  %v11913_v41 = vpop.eup %8814 }
 0xb4b   : > { %v11916_v44 = vpop.eup %8816 }
 0xb4c   : > { %v11923_v8 = vpop.eup %8818 }
 0xb4d   : > { %5241 = vadd.xlane.f32.xlu0 %v11913_v41  ;;  %v8821_v18 = vpop.eup %8820 }
 0xb4e   : > { %v11938_v33 = vpop.eup %8822  ;;  %v11945_v0 = vmul.f32 %v8821_v18, %v11760_v54  ;;  %v5499_v54 = vld [vmem:[%s12101_s8] sm:$0xff] }
 0xb51   : > { %4636 = vadd.xlane.f32.xlu0 %v11916_v44 }
 0xb55   : > { %5243 = vadd.xlane.f32.xlu0 %v11923_v8 }
 0xb59   : > { %5334 = vrot.lane.b32.xlu1 %v5312_v35, %s8885_s16  ;;  %v5236_v35 = vpop.xlane.xlu0 %5235 }
 0xb6b   : > { %5336 = vrot.lane.b32.xlu0 %v5313_v3, %s8885_s16 }
 0xb71   : > { %v5232_v38 = vpop.xlane.xlu1 %5231 }
 0xb72   : > { %8824 = vrcp.f32 %v5232_v38 }
 0xb73   : > { %8826 = vrcp.f32 %v5236_v35  ;;  %v11966_v35 = vpop.permute.xlu0 %5332 }
 0xb74   : > { %8828 = vpow2.f32 %v5213_v42  ;;  %v5503_v42 = vpack.c.bf16 %v5500_v51, %v5499_v54 }
 0xb75   : > { %v5238_v16 = vpop.xlane.xlu1 %5237 }
 0xb76   : > { %8830 = vrcp.f32 %v5238_v16  ;;  %7680 = vmatprep.subr.bf16.mxu1 %v5503_v42 }
 0xb77   : > { %7681 = vmatpush3.bf16.msra.mxu1 %v5503_v42 }
 0xb7c   : > { %v8825_v36 = vpop.eup %8824 }
 0xb7d   : > { %5239 = vadd.xlane.f32.xlu1 %v11938_v33  ;;  %v11942_v19 = vmul.f32 %v8825_v36, %v11804_v59  ;;  %v8827_v24 = vpop.eup %8826 }
 0xb7e   : > { %v11947_v4 = vpop.eup %8828  ;;  %v11953_v13 = vmul.f32 %v8827_v24, %v11769_v39 }
 0xb80   : > { %v8831_v3 = vpop.eup %8830 }
 0xb81   : > { %5245 = vadd.xlane.f32.xlu1 %v11947_v4  ;;  %v11956_v5 = vmul.f32 %v8831_v3, %v11815_v47 }
 0xbb5   : > { %v4611_v39 = vpop.xlane.xlu1 %4610 }
 0xbb6   : > { %v4609_v16 = vpop.xlane.xlu0 %4608  ;;  %8832 = vrcp.f32 %v4611_v39 }
 0xbb7   : > { %8834 = vrcp.f32 %v4609_v16 }
 0xbba   : > { %v4615_v47 = vpop.xlane.xlu0 %4614 }
 0xbbb   : > { %8836 = vrcp.f32 %v4615_v47 }
 0xbbd   : > { %v4619_v36 = vpop.xlane.xlu1 %4618 }
 0xbbe   : > { %v4613_v18 = vpop.xlane.xlu0 %4612 }
 0xbbf   : > { %8838 = vrcp.f32 %v4613_v18 }
 0xbc0   : > { %v8833_v24 = vpop.eup %8832  ;;  %8840 = vrcp.f32 %v4619_v36 }
 0xbc1   : > { %v8835_v3 = vpop.eup %8834  ;;  %v4657_v59 = vmul.f32 %v8833_v24, %v11855_v57 }
 0xbc2   : > { %v4617_v38 = vpop.xlane.xlu0 %4616  ;;  %v4656_v54 = vmul.f32 %v8835_v3, %v11857_v9 }
 0xbc3   : > { %8842 = vrcp.f32 %v4617_v38 }
 0xbc4   : > { %v4672_v51 = vpack.c.bf16 %v4657_v59, %v4656_v54 }
 0xbc5   : > { %v8837_v46 = vpop.eup %8836 }
 0xbc6   : > { %v4623_v42 = vpop.xlane.xlu0 %4622  ;;  %7576 = vmatprep.mubr.bf16.mxu0 %v4672_v51  ;;  %v4625_v39 = vpop.xlane.xlu1 %4624  ;;  %v4659_v47 = vmul.f32 %v8837_v46, %v11863_v22 }
 0xbc7   : > { %8844 = vrcp.f32 %v4623_v42 }
 0xbc9   : > { %v8839_v16 = vpop.eup %8838 }
 0xbca   : > { %v4658_v18 = vmul.f32 %v8839_v16, %v11870_v2  ;;  %v4621_v62 = vpop.xlane.xlu0 %4620  ;;  %v8841_v12 = vpop.eup %8840 }
 0xbcb   : > { %8846 = vrcp.f32 %v4621_v62  ;;  %v4631_v24 = vpop.xlane.xlu1 %4630  ;;  %v4661_v59 = vmul.f32 %v8841_v12, %v11868_v48 }
 0xbcc   : > { %v4673_v36 = vpack.c.bf16 %v4659_v47, %v4658_v18  ;;  %8848 = vrcp.f32 %v4625_v39 }
 0xbcd   : > { %v8843_v57 = vpop.eup %8842 }
 0xbce   : > { %v4627_v9 = vpop.xlane.xlu0 %4626  ;;  %7577 = vmatmul.mubr.bf16.vlgmr.msra.gmra.mrb[80].mxu0 %v4673_v36  ;;  %v4660_v38 = vmul.f32 %v8843_v57, %v11875_v10 }
 0xbcf   : > { %8850 = vrcp.f32 %v4627_v9  ;;  %7649 = vmatpush3.bf16.msra.mxu0 %v11733_v53 }
 0xbd0   : > { %7650 = vmatprep.subr.bf16.mxu0 %v11826_v29  ;;  %v4674_v46 = vpack.c.bf16 %v4661_v59, %v4660_v38  ;;  %8852 = vrcp.f32 %v4631_v24 }
 0xbd1   : > { %v4633_v62 = vpop.xlane.xlu1 %4632  ;;  %v8845_v2 = vpop.eup %8844 }
 0xbd2   : > { %v4629_v22 = vpop.xlane.xlu0 %4628  ;;  %7580 = vmatprep.mubr.bf16.mxu0 %v4674_v46  ;;  %v4663_v53 = vmul.f32 %v8845_v2, %v11880_v55 }
 0xbd3   : > { %8854 = vrcp.f32 %v4629_v22  ;;  %7651 = vmatpush3.bf16.msra.mxu0 %v11826_v29 }
 0xbd4   : > { %7652 = vmatprep.subr.bf16.mxu0 %v11828_v21  ;;  %8856 = vrcp.f32 %v4633_v62 }
 0xbd5   : > { %v8847_v3 = vpop.eup %8846  ;;  %v4639_v42 = vpop.xlane.xlu1 %4638 }
 0xbd6   : > { %v4635_v10 = vpop.xlane.xlu0 %4634  ;;  %v4662_v48 = vmul.f32 %v8847_v3, %v11891_v40  ;;  %v8849_v12 = vpop.eup %8848  ;;  %v5501_v3 = vld [vmem:[%s12101_s8 + $0x10] sm:$0xff] }
 0xbd7   : > { %8858 = vrcp.f32 %v4635_v10  ;;  %7653 = vmatpush3.bf16.msra.mxu0 %v11828_v21  ;;  %v4664_v29 = vmul.f32 %v8849_v12, %v11882_v61 }
 0xbd8   : > { %7654 = vmatprep.subr.bf16.mxu0 %v11830_v43  ;;  %v4675_v54 = vpack.c.bf16 %v4663_v53, %v4662_v48  ;;  %8860 = vrcp.f32 %v4639_v42 }
 0xbd9   : > { %v8851_v51 = vpop.eup %8850  ;;  %v5335_v38 = vpop.permute.xlu1 %5334 }
 0xbda   : > { %v5242_v39 = vpop.xlane.xlu0 %5241  ;;  %7581 = vmatmul.mubr.bf16.gmra.mrb[84].mxu0 %v4675_v54  ;;  %v4665_v16 = vmul.f32 %v8851_v51, %v11896_v20  ;;  %v8853_v47 = vpop.eup %8852  ;;  %v12353_v51 = vld [vmem:[#allocation8_spill] sm:$0xff] }
 0xbdb   : > { %7655 = vmatpush3.bf16.msra.mxu0 %v11830_v43  ;;  %v4667_v36 = vmul.f32 %v8853_v47, %v11889_v26 }
 0xbdc   : > { %7656 = vmatprep.subr.bf16.mxu0 %v11936_v49  ;;  %v4676_v55 = vpack.c.bf16 %v4665_v16, %v4664_v29 }
 0xbdd   : > { %v8855_v40 = vpop.eup %8854 }
 0xbde   : > { %v4637_v21 = vpop.xlane.xlu0 %4636  ;;  %7584 = vmatprep.mubr.bf16.mxu0 %v4676_v55  ;;  %v4666_v18 = vmul.f32 %v8855_v40, %v11903_v6  ;;  %v8857_v57 = vpop.eup %8856  ;;  %v12355_v55 = vld [vmem:[#allocation7_spill] sm:$0xff] }
 0xbdf   : > { %8862 = vrcp.f32 %v4637_v21  ;;  %7657 = vmatpush3.bf16.msra.mxu0 %v11936_v49  ;;  %v4668_v24 = vmul.f32 %v8857_v57, %v11901_v58  ;;  %v12345_v58 = vpack.c.bf16 %v11810_v23, %v11807_v31  ;;  %v12350_v31 = vpack.c.bf16 %v11956_v5, %v11953_v13 }
 0xbe0   : > { %7658 = vmatprep.subr.bf16.mxu0 %v11966_v35  ;;  %v4677_v61 = vpack.c.bf16 %v4667_v36, %v4666_v18  ;;  %8864 = vrcp.f32 %v5242_v39  ;;  %v12354_v39 = vld [vmem:[#allocation2_spill] sm:$0xff] }
 0xbe1   : > { %v8859_v20 = vpop.eup %8858 }
 0xbe2   : > { %v5244_v43 = vpop.xlane.xlu0 %5243  ;;  %7585 = vmatmul.mubr.bf16.gmra.mrb[88].mxu0 %v4677_v61  ;;  %v4669_v9 = vmul.f32 %v8859_v20, %v11909_v30  ;;  %v8861_v59 = vpop.eup %8860  ;;  %v12346_v30 = vpack.c.bf16 %v11821_v1, %v11818_v7 }
 0xbe3   : > { %7659 = vmatpush3.bf16.msra.mxu0 %v11966_v35  ;;  %v4671_v22 = vmul.f32 %v8861_v59, %v11907_v56  ;;  %v12347_v35 = vpack.c.bf16 %v11838_v25, %v11835_v27  ;;  %v12349_v56 = vpack.c.bf16 %v11945_v0, %v11942_v19 }
 0xbe4   : > { %7660 = vmatprep.subr.bf16.mxu0 %v5335_v38  ;;  %v4678_v6 = vpack.c.bf16 %v4669_v9, %v4668_v24 }
 0xbe6   : > { %v5337_v26 = vpop.permute.xlu0 %5336  ;;  %7588 = vmatprep.mubr.bf16.mxu0 %v4678_v6 }
 0xbe7   : > { %7661 = vmatpush3.bf16.msra.mxu0 %v5335_v38 }
 0xbe8   : > { %7662 = vmatprep.subr.bf16.mxu0 %v5337_v26 }
 0xbe9   : > { %v8863_v49 = vpop.eup %8862 }
 0xbea   : > { %v4670_v46 = vmul.f32 %v8863_v49, %v11916_v44  ;;  %v12348_v44 = vpack.c.bf16 %v11848_v15, %v11845_v63  ;;  %v8865_v1 = vpop.eup %8864 }
 0xbeb   : > { %7663 = vmatpush3.bf16.msra.mxu0 %v5337_v26  ;;  %v5276_v63 = vmul.f32 %v8865_v1, %v11913_v41  ;;  %v12351_v41 = vld [vmem:[#allocation6_spill] sm:$0xff] }
 0xbec   : > { %v4679_v62 = vpack.c.bf16 %v4671_v22, %v4670_v46  ;;  %v2998_v48 = vsub.f32 1.0, %v12351_v41  ;;  %v6116_v1 = vld [vmem:[%s12102_s9] ss:$0 sm:$0xff] }
 0xbee   : > { %7589 = vmatmul.mubr.bf16.gmra.mrb[92].mxu0 %v4679_v62 }
 0xbef   : > { %7664 = vmatprep.mubr.bf16.mxu0 %v12345_v58 }
 0xbf6   : > { %7665 = vmatmul.mubr.bf16.vlgmr.msra.gmra.mrb[80].mxu0 %v12346_v30 }
 0xbf7   : > { %7668 = vmatprep.mubr.bf16.mxu0 %v12347_v35 }
 0xbfe   : > { %7669 = vmatmul.mubr.bf16.gmra.mrb[84].mxu0 %v12348_v44 }
 0xbff   : > { %7672 = vmatprep.mubr.bf16.mxu0 %v12349_v56 }
 0xc06   : > { %7673 = vmatmul.mubr.bf16.gmra.mrb[88].mxu0 %v12350_v31 }
 0xc0a   : > { %v5240_v23 = vpop.xlane.xlu1 %5239 }
 0xc0b   : > { %8866 = vrcp.f32 %v5240_v23 }
 0xc0c   : > { %8868 = vrcp.f32 %v5244_v43 }
 0xc0e   : > { %v5246_v7 = vpop.xlane.xlu1 %5245 }
 0xc0f   : > { %8870 = vrcp.f32 %v5246_v7 }
 0xc15   : > { %v8867_v27 = vpop.eup %8866 }
 0xc16   : > { %v5275_v25 = vmul.f32 %v8867_v27, %v11938_v33  ;;  %v8869_v15 = vpop.eup %8868  ;;  %v5502_v33 = vld [vmem:[%s12101_s8 + $0x18] sm:$0xff] }
 0xc17   : > { %v5277_v0 = vmul.f32 %v8869_v15, %v11923_v8  ;;  %v5504_v10 = vpack.c.bf16 %v5502_v33, %v5501_v3  ;;  %v12352_v8 = vld [vmem:[#allocation9_spill] sm:$0xff] }
 0xc18   : > { %v5285_v2 = vpack.c.bf16 %v5276_v63, %v5275_v25  ;;  %v5459_v54 = vmul.f32 %v2998_v48, %v12352_v8 }
 0xc19   : > { %v8871_v19 = vpop.eup %8870  ;;  %7682 = vmatprep.subr.bf16.mxu1 %v5504_v10 }
 0xc1a   : > { %7676 = vmatprep.mubr.bf16.mxu0 %v5285_v2  ;;  %v5278_v13 = vmul.f32 %v8871_v19, %v11947_v4  ;;  %7683 = vmatpush3.bf16.msra.mxu1 %v5504_v10 }
 0xc1c   : > { %v5286_v5 = vpack.c.bf16 %v5278_v13, %v5277_v0 }
 0xc1e   : > { %7677 = vmatmul.mubr.bf16.gmra.mrb[92].mxu0 %v5286_v5 }
 0xcc9   : > { %v7666_v53 = vpop.f32.mrb[80].mxu0 }
 0xcca   : > { %v5380_v12 = vpop.f32.mrb[81].mxu0  ;;  %v5477_v42 = vadd.f32 %v7666_v53, %v12353_v51 }
 0xccb   : > { %v7667_v4 = vpop.f32.mrb[82].mxu0  ;;  %v5475_v47 = vadd.f32 %v5459_v54, %v5380_v12 }
 0xccc   : > { %v5478_v29 = vadd.f32 %v7667_v4, %v12354_v39  ;;  %v5383_v16 = vpop.f32.mrb[83].mxu0 }
 0xccd   : > { %v5476_v40 = vadd.f32 %v5383_v16, %v12355_v55 }
 0xcce   : > { %v5492_v21 = vpack.c.bf16 %v5478_v29, %v5477_v42 }
 0xccf   : > { %v5491_v18 = vpack.c.bf16 %v5476_v40, %v5475_v47 }
 0xcd1   : > { %v7670_v36 = vpop.f32.mrb[84].mxu0  ;;  %7684 = vmatprep.mubr.msk.bf16.mxu1 %vm421_vm0, %v5491_v18 }
 0xcd2   : > { %v5396_v57 = vpop.f32.mrb[85].mxu0  ;;  %7685 = vmatmul.mubr.msk.bf16.vlgmr.msra.gmra.mrb[32].mxu1 %vm421_vm0, %v5492_v21  ;;  %v5481_v20 = vadd.f32 %v7670_v36, %v12298_v11 }
 0xcd3   : > { %v7671_v61 = vpop.f32.mrb[86].mxu0  ;;  %v5479_v9 = vadd.f32 %v5396_v57, %v10330_v45 }
 0xcd4   : > { %v5482_v43 = vadd.f32 %v7671_v61, %v12299_v32  ;;  %v5399_v24 = vpop.f32.mrb[87].mxu0 }
 0xcd5   : > { %v5480_v38 = vadd.f32 %v5399_v24, %v10326_v60 }
 0xcd6   : > { %v5494_v6 = vpack.c.bf16 %v5482_v43, %v5481_v20 }
 0xcd7   : > { %v5493_v26 = vpack.c.bf16 %v5480_v38, %v5479_v9 }
 0xcd9   : > { %v7674_v59 = vpop.f32.mrb[88].mxu0  ;;  %7688 = vmatprep.mubr.msk.bf16.mxu1 %vm421_vm0, %v5493_v26 }
 0xcda   : > { %v5412_v49 = vpop.f32.mrb[89].mxu0  ;;  %7689 = vmatmul.mubr.msk.bf16.gmra.mrb[36].mxu1 %vm421_vm0, %v5494_v6  ;;  %v5485_v22 = vadd.f32 %v7674_v59, %v10375_v14 }
 0xcdb   : > { %v7675_v46 = vpop.f32.mrb[90].mxu0  ;;  %v5483_v32 = vadd.f32 %v5412_v49, %v10360_v50  ;;  %v12356_v50 = vld [vmem:[#allocation14_spill] sm:$0xff] }
 0xcdc   : > { %v5486_v11 = vadd.f32 %v7675_v46, %v10371_v34  ;;  %v5415_v62 = vpop.f32.mrb[91].mxu0 }
 0xcdd   : > { %v5484_v45 = vadd.f32 %v5415_v62, %v10356_v52 }
 0xcde   : > { %v5496_v58 = vpack.c.bf16 %v5486_v11, %v5485_v22 }
 0xcdf   : > { %v5495_v60 = vpack.c.bf16 %v5484_v45, %v5483_v32 }
 0xce1   : > { %7692 = vmatprep.mubr.msk.bf16.mxu1 %vm421_vm0, %v5495_v60 }
 0xce2   : > { %7693 = vmatmul.mubr.msk.bf16.gmra.mrb[40].mxu1 %vm421_vm0, %v5496_v58 }
 0xcf1   : > { %v7678_v30 = vpop.f32.mrb[92].mxu0 }
 0xcf2   : > { %v5428_v35 = vpop.f32.mrb[93].mxu0  ;;  %v5489_v56 = vadd.f32 %v7678_v30, %v12341_v37 }
 0xcf3   : > { %v7679_v44 = vpop.f32.mrb[94].mxu0  ;;  %v5487_v31 = vadd.f32 %v5428_v35, %v10390_v17 }
 0xcf4   : > { %v5490_v14 = vadd.f32 %v7679_v44, %v12342_v28  ;;  %v5431_v34 = vpop.f32.mrb[95].mxu0 }
 0xcf5   : > { %v5488_v23 = vadd.f32 %v5431_v34, %v12356_v50 }
 0xcf6   : > { %v5498_v52 = vpack.c.bf16 %v5490_v14, %v5489_v56 }
 0xcf7   : > { %v5497_v7 = vpack.c.bf16 %v5488_v23, %v5487_v31 }
 0xcf9   : > { %7696 = vmatprep.mubr.msk.bf16.mxu1 %vm421_vm0, %v5497_v7 }
 0xcfa   : > { %7697 = vmatmul.mubr.msk.bf16.gmra.mrb[44].mxu1 %vm421_vm0, %v5498_v52 }
 0xda5   : > { %v7686_v17 = vpop.f32.mrb[32].mxu1 }
 0xda6   : > { %v5579_v37 = vadd.f32 %v7686_v17, %v6116_v1  ;;  %v5570_v28 = vpop.f32.mrb[33].mxu1 }
 0xda7   : > { %v5571_v27 = vadd.f32 %v6116_v1, %v5570_v28  ;;  %v7687_v25 = vpop.f32.mrb[34].mxu1 }
 0xda8   : > { %5635 = vst.msk [vmem:[%s12056_s28 + $0x10] sm:$0xff] %vm421_vm0, %v5579_v37  ;;  %v5582_v63 = vadd.f32 %v7687_v25, %v6116_v1  ;;  %v5573_v15 = vpop.f32.mrb[35].mxu1 }
 0xda9   : > { %5633 = vst.msk [vmem:[%s12056_s28] sm:$0xff] %vm421_vm0, %v5571_v27  ;;  %v5574_v2 = vadd.f32 %v6116_v1, %v5573_v15 }
 0xdaa   : > { %5636 = vst.msk [vmem:[%s12056_s28 + $0x18] sm:$0xff] %vm421_vm0, %v5582_v63 }
 0xdab   : > { %5634 = vst.msk [vmem:[%s12056_s28 + $0x8] sm:$0xff] %vm421_vm0, %v5574_v2 }
 0xdad   : > { %v7690_v19 = vpop.f32.mrb[36].mxu1 }
 0xdae   : > { %v5595_v0 = vadd.f32 %v7690_v19, %v6116_v1  ;;  %v5586_v13 = vpop.f32.mrb[37].mxu1 }
 0xdaf   : > { %v5587_v5 = vadd.f32 %v6116_v1, %v5586_v13  ;;  %v7691_v3 = vpop.f32.mrb[38].mxu1 }
 0xdb0   : > { %5639 = vst.msk [vmem:[%s12056_s28 + $0x30] sm:$0xff] %vm421_vm0, %v5595_v0  ;;  %v5598_v33 = vadd.f32 %v7691_v3, %v6116_v1  ;;  %v5589_v10 = vpop.f32.mrb[39].mxu1 }
 0xdb1   : > { %5637 = vst.msk [vmem:[%s12056_s28 + $0x20] sm:$0xff] %vm421_vm0, %v5587_v5  ;;  %v5590_v41 = vadd.f32 %v6116_v1, %v5589_v10 }
 0xdb2   : > { %5640 = vst.msk [vmem:[%s12056_s28 + $0x38] sm:$0xff] %vm421_vm0, %v5598_v33 }
 0xdb3   : > { %5638 = vst.msk [vmem:[%s12056_s28 + $0x28] sm:$0xff] %vm421_vm0, %v5590_v41 }
 0xdb5   : > { %v7694_v48 = vpop.f32.mrb[40].mxu1 }
 0xdb6   : > { %v5611_v53 = vadd.f32 %v7694_v48, %v6116_v1  ;;  %v5602_v12 = vpop.f32.mrb[41].mxu1 }
 0xdb7   : > { %v5603_v8 = vadd.f32 %v6116_v1, %v5602_v12  ;;  %v7695_v54 = vpop.f32.mrb[42].mxu1 }
 0xdb8   : > { %5643 = vst.msk [vmem:[%s12056_s28 + $0x50] sm:$0xff] %vm421_vm0, %v5611_v53  ;;  %v5614_v4 = vadd.f32 %v7695_v54, %v6116_v1  ;;  %v5605_v51 = vpop.f32.mrb[43].mxu1 }
 0xdb9   : > { %5641 = vst.msk [vmem:[%s12056_s28 + $0x40] sm:$0xff] %vm421_vm0, %v5603_v8  ;;  %v5606_v42 = vadd.f32 %v6116_v1, %v5605_v51 }
 0xdba   : > { %5644 = vst.msk [vmem:[%s12056_s28 + $0x58] sm:$0xff] %vm421_vm0, %v5614_v4 }
 0xdbb   : > { %5642 = vst.msk [vmem:[%s12056_s28 + $0x48] sm:$0xff] %vm421_vm0, %v5606_v42 }
 0xdcd   : > { %v7698_v39 = vpop.f32.mrb[44].mxu1 }
 0xdce   : > { %v5627_v29 = vadd.f32 %v7698_v39, %v6116_v1  ;;  %v5618_v16 = vpop.f32.mrb[45].mxu1 }
 0xdcf   : > { %v5619_v47 = vadd.f32 %v6116_v1, %v5618_v16  ;;  %v7699_v55 = vpop.f32.mrb[46].mxu1 }
 0xdd0   : > { %5647 = vst.msk [vmem:[%s12056_s28 + $0x70] sm:$0xff] %vm421_vm0, %v5627_v29  ;;  %v5630_v40 = vadd.f32 %v7699_v55, %v6116_v1  ;;  %v5621_v21 = vpop.f32.mrb[47].mxu1 }
 0xdd1   : > { %5645 = vst.msk [vmem:[%s12056_s28 + $0x60] sm:$0xff] %vm421_vm0, %v5619_v47  ;;  %v5622_v18 = vadd.f32 %v6116_v1, %v5621_v21 }
 0xdd2   : > { %5648 = vst.msk [vmem:[%s12056_s28 + $0x78] sm:$0xff] %vm421_vm0, %v5630_v40 }
 0xdd3   : > { %5646 = vst.msk [vmem:[%s12056_s28 + $0x68] sm:$0xff] %vm421_vm0, %v5622_v18 }
 0xdd4 PF: > { %s22_s17 = sadd.s32 1, %s8880_s17  }
 0xdd5   : > { %p19_p4 = scmp.ge.s32.totalorder %s22_s17, 4  }
 0xdd7   :  { %21 = sbr.rel (!%p19_p4) target bundleno = 1 (0x1), region = 113 }

</bundles_post_ra>
